<compile_context>
chip_gen: v7x
topology: tpu7x:2x2x1
jax: 0.10.0
libtpu: 0.0.40
codegen_flags: <defaults>
</compile_context>

<pallas_src>
import math

import jax
import jax.numpy as jnp
from jax import lax
from jax.experimental import pallas as pl
from jax.experimental.pallas import tpu as pltpu

EMBEDING_DEPTH = 512
HIDDEN = EMBEDING_DEPTH * 2
LN_EPS = 1e-5


def _round_up(n, m):
    return ((n + m - 1) // m) * m


def _device_caps():
    """Return (tm_cap, multi_core) for the local TPU generation.

    v5e / v6e: one TensorCore, 128 MiB VMEM  -> large tiles, no even-step need.
    v7x / v5p / unknown: assume 64 MiB VMEM per core and >=2 TensorCores
    sharing the "parallel" grid axis -> conservative tile cap, even step count.
    """
    kind = ""
    try:
        kind = jax.devices()[0].device_kind.lower()
    except Exception:
        pass
    if any(tag in kind for tag in ("v5 lite", "v5e", "v6 lite", "v6e", "v6")):
        return 1024, False
    return 512, True


def _choose_tm(N, cap, prefer_even_steps):
    # 128-aligned row tiles keep the bf16 LHS sublane-aligned and fill the
    # 256-wide MXU on v6e/v7x; small N gets a single (ragged) tile.
    tm = min(cap, _round_up(max(N, 1), 128))
    if prefer_even_steps:
        steps = pl.cdiv(N, tm)
        if steps > 1 and steps % 2 == 1:
            # Multi-TC chips split the "parallel" axis across TensorCores:
            # rebalance to an even step count with ~equal 128-aligned tiles.
            tm = max(128, min(tm, _round_up(pl.cdiv(N, steps + 1), 128)))
    return tm


def mlp_kernel(x_ref, gamma_ref, beta_ref, w1_ref, b1_ref, w2_ref, b2_ref, o_ref):
    x = x_ref[...].astype(jnp.float32)                        # (TM, D)
    # --- LayerNorm over the feature (lane) dim, in f32 ---
    mean = jnp.mean(x, axis=-1, keepdims=True)
    xc = x - mean
    var = jnp.mean(xc * xc, axis=-1, keepdims=True)
    xn = xc * lax.rsqrt(var + LN_EPS)
    xn = xn * gamma_ref[...] + beta_ref[...]                  # broadcast (1, D)
    # --- Linear 1: D -> 2D (bf16 operands, f32 accumulation on the MXU) ---
    h = jnp.dot(xn.astype(jnp.bfloat16), w1_ref[...],
                preferred_element_type=jnp.float32) + b1_ref[...]
    # --- Linear 2: 2D -> D ---
    y = jnp.dot(h.astype(jnp.bfloat16), w2_ref[...],
                preferred_element_type=jnp.float32) + b2_ref[...]
    # --- exact GELU (torch nn.GELU default, erf-based), in f32 ---
    g = 0.5 * y * (1.0 + lax.erf(y * (1.0 / math.sqrt(2.0))))
    # --- residual add with the ORIGINAL (pre-LayerNorm) input ---
    o_ref[...] = (g + x).astype(o_ref.dtype)


def mlp_forward(x, gamma, beta, w1, b1, w2, b2, *, tm=None):
    """x: (N, D) float32 or bfloat16. Returns (N, D) in x.dtype."""
    N, D = x.shape
    assert D == EMBEDING_DEPTH

    if tm is None:
        cap, multi_core = _device_caps()
        tm = _choose_tm(N, cap, multi_core)
    grid_steps = pl.cdiv(N, tm)

    gamma2 = gamma.reshape(1, D).astype(jnp.float32)
    beta2 = beta.reshape(1, D).astype(jnp.float32)
    b1_2 = b1.reshape(1, HIDDEN).astype(jnp.float32)
    b2_2 = b2.reshape(1, D).astype(jnp.float32)
    w1_bf = w1.astype(jnp.bfloat16)                           # (D, HIDDEN)
    w2_bf = w2.astype(jnp.bfloat16)                           # (HIDDEN, D)

    full = lambda i: (0, 0)
    const = dict(pipeline_mode=pl.Buffered(1))                # resident, single-buffered

    # VMEM budget: double-buffered x/out row tiles, resident bf16 weights,
    # f32 + bf16 intermediates (xn, h, y/g), plus headroom.  Capped at 48 MiB
    # so it always fits v7x's 64 MiB per-core VMEM.
    xbytes = jnp.dtype(x.dtype).itemsize
    io_tiles = 2 * tm * D * xbytes * 2
    weight_bytes = 2 * D * HIDDEN * 2 + (3 * D + HIDDEN) * 4
    interm = tm * (D * 4 + D * 2 + HIDDEN * 4 + HIDDEN * 2 + 2 * D * 4)
    vmem_limit = int(min(48 << 20,
                         max(16 << 20, io_tiles + weight_bytes + interm + (8 << 20))))

    out = pl.pallas_call(
        mlp_kernel,
        out_shape=jax.ShapeDtypeStruct((N, D), x.dtype),
        grid_spec=pltpu.PrefetchScalarGridSpec(
            num_scalar_prefetch=0,
            grid=(grid_steps,),
            in_specs=[
                pl.BlockSpec((tm, D), lambda i: (i, 0)),              # x rows (ragged OK)
                pl.BlockSpec((1, D), full, **const),                  # gamma
                pl.BlockSpec((1, D), full, **const),                  # beta
                pl.BlockSpec((D, HIDDEN), full, **const),             # W1 (in, out) bf16
                pl.BlockSpec((1, HIDDEN), full, **const),             # b1
                pl.BlockSpec((HIDDEN, D), full, **const),             # W2 (in, out) bf16
                pl.BlockSpec((1, D), full, **const),                  # b2
            ],
            out_specs=pl.BlockSpec((tm, D), lambda i: (i, 0)),
        ),
        compiler_params=pltpu.CompilerParams(
            dimension_semantics=("parallel",),
            vmem_limit_bytes=vmem_limit,
        ),
    )(x, gamma2, beta2, w1_bf, b1_2, w2_bf, b2_2)

    return out


def mlp_reference(x, gamma, beta, w1, b1, w2, b2, *, matmul_dtype=jnp.float32):
    x = x.astype(jnp.float32)
    mean = jnp.mean(x, axis=-1, keepdims=True)
    var = jnp.mean((x - mean) ** 2, axis=-1, keepdims=True)
    xn = (x - mean) / jnp.sqrt(var + LN_EPS) * gamma + beta
    h = jnp.dot(xn.astype(matmul_dtype), w1.astype(matmul_dtype),
                preferred_element_type=jnp.float32) + b1
    y = jnp.dot(h.astype(matmul_dtype), w2.astype(matmul_dtype),
                preferred_element_type=jnp.float32) + b2
    g = 0.5 * y * (1.0 + lax.erf(y / jnp.sqrt(2.0)))
    return g + x


if __name__ == "__main__":
    key = jax.random.PRNGKey(0)
    kx, kg, kb, kw1, kb1, kw2, kb2 = jax.random.split(key, 7)

    # Small shapes consistent with the module: PATCH_SEQUENCE = (448//128)^2 + 1 = 10.
    batch, seq = 2, 10
    N = batch * seq
    D = EMBEDING_DEPTH

    # Deterministic synthetic parameters (shapes per nn.Module __init__).
    gamma = jax.random.normal(kg, (D,), jnp.float32) * 0.1 + 1.0
    beta = jax.random.normal(kb, (D,), jnp.float32) * 0.1
    w1 = jax.random.normal(kw1, (D, HIDDEN), jnp.float32) * (1.0 / math.sqrt(D))
    b1 = jax.random.normal(kb1, (HIDDEN,), jnp.float32) * 0.01
    w2 = jax.random.normal(kw2, (HIDDEN, D), jnp.float32) * (1.0 / math.sqrt(HIDDEN))
    b2 = jax.random.normal(kb2, (D,), jnp.float32) * 0.01

    x3 = jax.random.normal(kx, (batch, seq, D), jnp.float32)
    x = x3.reshape(N, D)

    out = mlp_forward(x, gamma, beta, w1, b1, w2, b2)
    out = jax.block_until_ready(out)
    assert out.shape == (N, D)

    # Tight check against a reference with the same bf16 matmul inputs / f32 accum.
    ref_bf16 = mlp_reference(x, gamma, beta, w1, b1, w2, b2, matmul_dtype=jnp.bfloat16)
    assert jnp.allclose(out, ref_bf16, atol=2e-3, rtol=2e-3), "mismatch vs bf16-matmul reference"

    # Sanity check against the pure-f32 reference (bf16 matmul inputs => looser tol).
    ref_f32 = mlp_reference(x, gamma, beta, w1, b1, w2, b2, matmul_dtype=jnp.float32)
    assert jnp.allclose(out, ref_f32, atol=6e-2, rtol=6e-2), "mismatch vs f32 reference"

    # bf16 activation carry (review: halves HBM activation traffic on v6e).
    out_bf = mlp_forward(x.astype(jnp.bfloat16), gamma, beta, w1, b1, w2, b2)
    out_bf = jax.block_until_ready(out_bf)
    assert out_bf.dtype == jnp.bfloat16 and out_bf.shape == (N, D)
    assert jnp.allclose(out_bf.astype(jnp.float32), ref_f32, atol=3e-1, rtol=3e-1), \
        "mismatch vs f32 reference (bf16 activations)"

    # Reshape back to (batch, seq, D) to match the module's in/out shape.
    _ = out.reshape(batch, seq, D)
    print("KERNEL_OK")
</pallas_src>

<mosaic_0001>
module attributes {stable_mosaic.version = 11 : i64} {
  func.func @mlp_kernel(%arg0: i32, %arg1: memref<128x512xf32, #tpu.memory_space<vmem>>, %arg2: memref<1x512xf32, #tpu.memory_space<vmem>>, %arg3: memref<1x512xf32, #tpu.memory_space<vmem>>, %arg4: memref<512x1024xbf16, #tpu.memory_space<vmem>>, %arg5: memref<1x1024xf32, #tpu.memory_space<vmem>>, %arg6: memref<1024x512xbf16, #tpu.memory_space<vmem>>, %arg7: memref<1x512xf32, #tpu.memory_space<vmem>>, %arg8: memref<128x512xf32, #tpu.memory_space<vmem>>) attributes {dimension_semantics = [#tpu.dimension_semantics<parallel>], iteration_bounds = array<i64: 1>, scalar_prefetch = 0 : i64, scratch_operands = 0 : i64, tpu.core_type = #tpu.core_type<tc>, window_params = [{transform_indices = @transform_0, window_bounds = array<i64: 128, 512>}, {pipeline_mode = #tpu.pipeline_mode<synchronous>, transform_indices = @transform_1, window_bounds = array<i64: 1, 512>}, {pipeline_mode = #tpu.pipeline_mode<synchronous>, transform_indices = @transform_2, window_bounds = array<i64: 1, 512>}, {pipeline_mode = #tpu.pipeline_mode<synchronous>, transform_indices = @transform_3, window_bounds = array<i64: 512, 1024>}, {pipeline_mode = #tpu.pipeline_mode<synchronous>, transform_indices = @transform_4, window_bounds = array<i64: 1, 1024>}, {pipeline_mode = #tpu.pipeline_mode<synchronous>, transform_indices = @transform_5, window_bounds = array<i64: 1024, 512>}, {pipeline_mode = #tpu.pipeline_mode<synchronous>, transform_indices = @transform_6, window_bounds = array<i64: 1, 512>}, {transform_indices = @transform_7, window_bounds = array<i64: 128, 512>}]} {
    %c0 = arith.constant 0 : index
    %c0_0 = arith.constant 0 : index
    %0 = vector.load %arg1[%c0, %c0_0] : memref<128x512xf32, #tpu.memory_space<vmem>>, vector<128x512xf32>
    %cst = arith.constant dense<0.000000e+00> : vector<128xf32>
    %1 = vector.multi_reduction <add>, %0, %cst [1] : vector<128x512xf32> to vector<128xf32>
    %2 = vector.shape_cast %1 : vector<128xf32> to vector<128x1xf32>
    %cst_1 = arith.constant 5.120000e+02 : f32
    %3 = vector.broadcast %cst_1 : f32 to vector<128x1xf32>
    %4 = arith.divf %2, %3 : vector<128x1xf32>
    %5 = vector.broadcast %4 : vector<128x1xf32> to vector<128x512xf32>
    %6 = arith.subf %0, %5 : vector<128x512xf32>
    %7 = arith.mulf %6, %6 : vector<128x512xf32>
    %cst_2 = arith.constant dense<0.000000e+00> : vector<128xf32>
    %8 = vector.multi_reduction <add>, %7, %cst_2 [1] : vector<128x512xf32> to vector<128xf32>
    %9 = vector.shape_cast %8 : vector<128xf32> to vector<128x1xf32>
    %cst_3 = arith.constant 5.120000e+02 : f32
    %10 = vector.broadcast %cst_3 : f32 to vector<128x1xf32>
    %11 = arith.divf %9, %10 : vector<128x1xf32>
    %cst_4 = arith.constant 9.99999974E-6 : f32
    %12 = vector.broadcast %cst_4 : f32 to vector<128x1xf32>
    %13 = arith.addf %11, %12 : vector<128x1xf32>
    %14 = math.rsqrt %13 : vector<128x1xf32>
    %15 = vector.broadcast %14 : vector<128x1xf32> to vector<128x512xf32>
    %16 = arith.mulf %6, %15 : vector<128x512xf32>
    %c0_5 = arith.constant 0 : index
    %c0_6 = arith.constant 0 : index
    %17 = vector.load %arg2[%c0_5, %c0_6] : memref<1x512xf32, #tpu.memory_space<vmem>>, vector<1x512xf32>
    %18 = vector.broadcast %17 : vector<1x512xf32> to vector<128x512xf32>
    %19 = arith.mulf %16, %18 : vector<128x512xf32>
    %c0_7 = arith.constant 0 : index
    %c0_8 = arith.constant 0 : index
    %20 = vector.load %arg3[%c0_7, %c0_8] : memref<1x512xf32, #tpu.memory_space<vmem>>, vector<1x512xf32>
    %21 = vector.broadcast %20 : vector<1x512xf32> to vector<128x512xf32>
    %22 = arith.addf %19, %21 : vector<128x512xf32>
    %23 = arith.truncf %22 : vector<128x512xf32> to vector<128x512xbf16>
    %c0_9 = arith.constant 0 : index
    %c0_10 = arith.constant 0 : index
    %24 = vector.load %arg4[%c0_9, %c0_10] : memref<512x1024xbf16, #tpu.memory_space<vmem>>, vector<512x1024xbf16>
    %cst_11 = arith.constant dense<0.000000e+00> : vector<128x1024xf32>
    %25 = tpu.matmul %23, %24, %cst_11 {dimension_numbers = #tpu.dot_dimension_numbers<[1], [0], [0], [1], [0, 0, 1, 1], [], []>} : vector<128x512xbf16>, vector<512x1024xbf16>, vector<128x1024xf32> -> vector<128x1024xf32>
    %c0_12 = arith.constant 0 : index
    %c0_13 = arith.constant 0 : index
    %26 = vector.load %arg5[%c0_12, %c0_13] : memref<1x1024xf32, #tpu.memory_space<vmem>>, vector<1x1024xf32>
    %27 = vector.broadcast %26 : vector<1x1024xf32> to vector<128x1024xf32>
    %28 = arith.addf %25, %27 : vector<128x1024xf32>
    %29 = arith.truncf %28 : vector<128x1024xf32> to vector<128x1024xbf16>
    %c0_14 = arith.constant 0 : index
    %c0_15 = arith.constant 0 : index
    %30 = vector.load %arg6[%c0_14, %c0_15] : memref<1024x512xbf16, #tpu.memory_space<vmem>>, vector<1024x512xbf16>
    %cst_16 = arith.constant dense<0.000000e+00> : vector<128x512xf32>
    %31 = tpu.matmul %29, %30, %cst_16 {dimension_numbers = #tpu.dot_dimension_numbers<[1], [0], [0], [1], [0, 0, 1, 1], [], []>} : vector<128x1024xbf16>, vector<1024x512xbf16>, vector<128x512xf32> -> vector<128x512xf32>
    %c0_17 = arith.constant 0 : index
    %c0_18 = arith.constant 0 : index
    %32 = vector.load %arg7[%c0_17, %c0_18] : memref<1x512xf32, #tpu.memory_space<vmem>>, vector<1x512xf32>
    %33 = vector.broadcast %32 : vector<1x512xf32> to vector<128x512xf32>
    %34 = arith.addf %31, %33 : vector<128x512xf32>
    %cst_19 = arith.constant 5.000000e-01 : f32
    %35 = vector.broadcast %cst_19 : f32 to vector<128x512xf32>
    %36 = arith.mulf %35, %34 : vector<128x512xf32>
    %cst_20 = arith.constant 0.707106769 : f32
    %37 = vector.broadcast %cst_20 : f32 to vector<128x512xf32>
    %38 = arith.mulf %34, %37 : vector<128x512xf32>
    %39 = math.erf %38 : vector<128x512xf32>
    %cst_21 = arith.constant 1.000000e+00 : f32
    %40 = vector.broadcast %cst_21 : f32 to vector<128x512xf32>
    %41 = arith.addf %40, %39 : vector<128x512xf32>
    %42 = arith.mulf %36, %41 : vector<128x512xf32>
    %43 = arith.addf %42, %0 : vector<128x512xf32>
    %c0_22 = arith.constant 0 : index
    %c0_23 = arith.constant 0 : index
    %44 = vector.load %arg8[%c0_22, %c0_23] : memref<128x512xf32, #tpu.memory_space<vmem>>, vector<128x512xf32>
    tpu.vector_store %arg8[%c0_22, %c0_23], %43 {strides = array<i32>} : memref<128x512xf32, #tpu.memory_space<vmem>>, vector<128x512xf32>,
    return
  }
  func.func @transform_0(%arg0: i32) -> (i32, i32) {
    %c0_i32 = arith.constant 0 : i32
    %c0_i32_0 = arith.constant 0 : i32
    return %arg0, %c0_i32 : i32, i32
  }
  func.func @transform_1(%arg0: i32) -> (i32, i32) {
    %c0_i32 = arith.constant 0 : i32
    %c0_i32_0 = arith.constant 0 : i32
    %c0_i32_1 = arith.constant 0 : i32
    return %c0_i32, %c0_i32_0 : i32, i32
  }
  func.func @transform_2(%arg0: i32) -> (i32, i32) {
    %c0_i32 = arith.constant 0 : i32
    %c0_i32_0 = arith.constant 0 : i32
    %c0_i32_1 = arith.constant 0 : i32
    return %c0_i32, %c0_i32_0 : i32, i32
  }
  func.func @transform_3(%arg0: i32) -> (i32, i32) {
    %c0_i32 = arith.constant 0 : i32
    %c0_i32_0 = arith.constant 0 : i32
    %c0_i32_1 = arith.constant 0 : i32
    return %c0_i32, %c0_i32_0 : i32, i32
  }
  func.func @transform_4(%arg0: i32) -> (i32, i32) {
    %c0_i32 = arith.constant 0 : i32
    %c0_i32_0 = arith.constant 0 : i32
    %c0_i32_1 = arith.constant 0 : i32
    return %c0_i32, %c0_i32_0 : i32, i32
  }
  func.func @transform_5(%arg0: i32) -> (i32, i32) {
    %c0_i32 = arith.constant 0 : i32
    %c0_i32_0 = arith.constant 0 : i32
    %c0_i32_1 = arith.constant 0 : i32
    return %c0_i32, %c0_i32_0 : i32, i32
  }
  func.func @transform_6(%arg0: i32) -> (i32, i32) {
    %c0_i32 = arith.constant 0 : i32
    %c0_i32_0 = arith.constant 0 : i32
    %c0_i32_1 = arith.constant 0 : i32
    return %c0_i32, %c0_i32_0 : i32, i32
  }
  func.func @transform_7(%arg0: i32) -> (i32, i32) {
    %c0_i32 = arith.constant 0 : i32
    %c0_i32_0 = arith.constant 0 : i32
    return %arg0, %c0_i32 : i32, i32
  }
}

</mosaic_0001>

<bundles_post_ra>
// kernel: tpu_custom_call.1
= control target key start
LH: loop header
LB: loop body
LE: loop exit
PB: predicated region body
PF: predicated region fallthrough
CT: control target
= control target key end

     0   :  { %12 = vsyncpa [#allocation3], 0  ;;  %s10209_s0 = inlined_call_operand.hbm [shape: f32[20,512], index: 0, kind: input, shape index: {}]   ;;  %s10210_s1 = inlined_call_operand.hbm [shape: f32[1,512], index: 1, kind: input, shape index: {}]   ;;  %s10211_s2 = inlined_call_operand.vmem [shape: f32[1,512], index: 2, kind: input, shape index: {}]   ;;  %s10212_s3 = inlined_call_operand.hbm [shape: bf16[512,1024], index: 3, kind: input, shape index: {}]   ;;  %s10213_s4 = inlined_call_operand.vmem [shape: f32[1,1024], index: 4, kind: input, shape index: {}]   ;;  %s10214_s5 = inlined_call_operand.hbm [shape: bf16[1024,512], index: 5, kind: input, shape index: {}]   ;;  %s10215_s6 = inlined_call_operand.vmem [shape: f32[1,512], index: 6, kind: input, shape index: {}]   ;;  %s10216_s7 = inlined_call_operand.hbm [shape: f32[20,512], index: 7, kind: output, shape index: {}]  }
   0x1   :  { %13 = vsyncpa [#allocation6], 0 }
   0x2   :  { %14 = vsyncpa [#allocation9], 0 }
   0x3   :  { %15 = vsyncpa [#allocation4], 0 }
   0x4   :  { %20 = vsyncadd [#allocation3], 6656  ;;  %s8048_s24 = smov [#allocation5]   ;;  %s8049_s26 = smov [#allocation2]  }
   0x5   :  { %s34_s25 = sshll.u32 %s8048_s24, 4  ;;  %s21_s27 = sshll.u32 %s8049_s26, 4  ;;  %s35_s25 = int_to_ptr.vmem [resolvable:$true] %s34_s25  ;;  %s8097_s27 = int_to_ptr.vmem [resolvable:$true] %s21_s27 }
   0x6   :  { %s7930_s30 = scalar_lea.hbm %s10210_s1, 64 }
   0x7   :  { %p7931_p0 = scmp.ne.s32.totalorder %s10210_s1, %s7930_s30  ;;  %p7934_p1 = scmp.lt.u32.totalorder %s7930_s30, %s10210_s1 }
   0x9   :  { %p7936_p2 = pnand %p7934_p1, %p7931_p0 }
   0xb   :  { %7939 = shalt.err (!%p7936_p2)
}
   0xc   :  { %s7940_s12 = scalar_lea.vmem %s35_s25, 64  ;;  %p7945_p4 = scmp.lt.s32.totalorder %s35_s25, %s35_s25 }
   0xd   :  { %p7941_p3 = scmp.ne.s32.totalorder %s35_s25, %s7940_s12  ;;  %p7946_p5 = scmp.lt.s32.totalorder %s7940_s12, %s7940_s12 }
   0xf   :  { %p7947_p6 = por %p7946_p5, %p7945_p4 }
  0x11   :  { %p7948_p7 = pnand %p7947_p6, %p7941_p3 }
  0x13   :  { %7951 = shalt.err (!%p7948_p7)
}
  0x14   :  { %37 = dma.hbm_to_vmem [thread:$0]  %s10210_s1, 64, %s35_s25, [#allocation6]  }
  0x15   :  { %s7952_s17 = scalar_lea.hbm %s10209_s0, 1536 }
  0x16   :  { %p7953_p8 = scmp.ne.s32.totalorder %s10209_s0, %s7952_s17  ;;  %p7956_p9 = scmp.lt.u32.totalorder %s7952_s17, %s10209_s0 }
  0x18   :  { %p7958_p10 = pnand %p7956_p9, %p7953_p8 }
  0x1a   :  { %7961 = shalt.err (!%p7958_p10)
}
  0x1b   :  { %s7962_s22 = scalar_lea.vmem %s8097_s27, 1536  ;;  %s7966_s1 = scalar_lea.vmem %s8097_s27, 8192 }
  0x1c   :  { %p7963_p11 = scmp.ne.s32.totalorder %s8097_s27, %s7962_s22  ;;  %p7967_p12 = scmp.lt.s32.totalorder %s8097_s27, %s8097_s27 }
  0x1d   :  { %p7968_p13 = scmp.lt.s32.totalorder %s7966_s1, %s7962_s22 }
  0x1f   :  { %p7969_p0 = por %p7968_p13, %p7967_p12 }
  0x21   :  { %p7970_p1 = pnand %p7969_p0, %p7963_p11 }
  0x23   :  { %7973 = shalt.err (!%p7970_p1)
}
  0x24   :  { %s8050_s23 = smov 512   ;;  %s8051_s24 = smov 32  }
  0x25   :  { %27 = dma.hbm_to_vmem [thread:$0]  %s10209_s0, 1536, %s8097_s27, [#allocation3], %s8050_s23, %s8050_s23, %s8051_s24  }
  0x26   :  { %s8052_s28 = smov [#allocation7]   ;;  %s8053_s30 = smov [#allocation8]  }
  0x27   :  { %s45_s29 = sshll.u32 %s8052_s28, 4  ;;  %s59_s8 = sshll.u32 %s8053_s30, 4  ;;  %s46_s29 = int_to_ptr.vmem [resolvable:$true] %s45_s29  ;;  %s8132_s8 = int_to_ptr.vmem [resolvable:$true] %s59_s8 }
  0x28   :  { %s7974_s11 = scalar_lea.hbm %s10212_s3, 32768 }
  0x29   :  { %p7975_p2 = scmp.ne.s32.totalorder %s10212_s3, %s7974_s11  ;;  %p7978_p3 = scmp.lt.u32.totalorder %s7974_s11, %s10212_s3 }
  0x2b   :  { %p7980_p4 = pnand %p7978_p3, %p7975_p2 }
  0x2d   :  { %7983 = shalt.err (!%p7980_p4)
}
  0x2e   :  { %s7984_s0 = scalar_lea.vmem %s46_s29, 32768  ;;  %p7989_p6 = scmp.lt.s32.totalorder %s46_s29, %s46_s29 }
  0x2f   :  { %p7985_p5 = scmp.ne.s32.totalorder %s46_s29, %s7984_s0  ;;  %p7990_p7 = scmp.lt.s32.totalorder %s7984_s0, %s7984_s0 }
  0x31   :  { %p7991_p8 = por %p7990_p7, %p7989_p6 }
  0x33   :  { %p7992_p9 = pnand %p7991_p8, %p7985_p5 }
  0x35   :  { %7995 = shalt.err (!%p7992_p9)
}
  0x36   :  { %51 = dma.hbm_to_vmem [thread:$0]  %s10212_s3, 32768, %s46_s29, [#allocation6], %s8050_s23, %s8050_s23, %s8051_s24  }
  0x37   :  { %s7996_s19 = scalar_lea.hbm %s10214_s5, 32768 }
  0x38   :  { %p7997_p10 = scmp.ne.s32.totalorder %s10214_s5, %s7996_s19  ;;  %p8000_p11 = scmp.lt.u32.totalorder %s7996_s19, %s10214_s5 }
  0x3a   :  { %p8002_p12 = pnand %p8000_p11, %p7997_p10 }
  0x3c   :  { %8005 = shalt.err (!%p8002_p12)
}
  0x3d   :  { %s8006_s25 = scalar_lea.vmem %s8132_s8, 32768  ;;  %p8011_p0 = scmp.lt.s32.totalorder %s8132_s8, %s8132_s8 }
  0x3e   :  { %p8007_p13 = scmp.ne.s32.totalorder %s8132_s8, %s8006_s25  ;;  %p8012_p1 = scmp.lt.s32.totalorder %s8006_s25, %s8006_s25 }
  0x40   :  { %p8013_p2 = por %p8012_p1, %p8011_p0 }
  0x42   :  { %p8014_p3 = pnand %p8013_p2, %p8007_p13 }
  0x44   :  { %8017 = shalt.err (!%p8014_p3)
}
  0x45   :  { %s8054_s3 = smov 256   ;;  %s8055_s26 = smov 16  }
  0x46   :  { %65 = dma.hbm_to_vmem [thread:$0]  %s10214_s5, 32768, %s8132_s8, [#allocation9], %s8054_s3, %s8054_s3, %s8055_s26  }
  0x47   :  { %8040 = dma.done.wait [#allocation3], 8192  }
  0x48   :  { %8041 = vsyncadd [#allocation3], 4294959104 }
  0x49   :  { %8042 = dma.done.wait [#allocation6], 32832  }
  0x4a   :  { %8043 = vsyncadd [#allocation6], 4294934464 }
  0x4b   :  { %8044 = dma.done.wait [#allocation9], 32768  }
  0x4c   :  { %8045 = vsyncadd [#allocation9], 4294934528  ;;  %v8166_v0 = vld [vmem:[#allocation2] sm:$0xff]  ;;  %v8168_v1 = vld [vmem:[#allocation2 + $0x8] sm:$0xff] }
  0x4d   :  { %v8170_v2 = vld [vmem:[#allocation2 + $0x10] sm:$0xff]  ;;  %v144_v3 = vadd.f32 %v8168_v1, %v8166_v0  ;;  %v8174_v4 = vld [vmem:[#allocation2 + $0x40] sm:$0xff]  ;;  %v8176_v5 = vld [vmem:[#allocation2 + $0x48] sm:$0xff] }
  0x4e   :  { %v8178_v6 = vld [vmem:[#allocation2 + $0x18] sm:$0xff]  ;;  %v8180_v7 = vld [vmem:[#allocation2 + $0x50] sm:$0xff]  ;;  %v154_v8 = vadd.f32 %v8176_v5, %v8174_v4  ;;  %v8184_v9 = vld [vmem:[#allocation2 + $0x20] sm:$0xff] }
  0x4f   :  { %v145_v10 = vadd.f32 %v144_v3, %v8170_v2  ;;  %v8187_v11 = vld [vmem:[#allocation2 + $0x58] sm:$0xff]  ;;  %v8189_v12 = vld [vmem:[#allocation2 + $0x28] sm:$0xff]  ;;  %v86_v13 = vld [vmem:[#allocation2 + $0x30] sm:$0xff] }
  0x50   :  { %v155_v14 = vadd.f32 %v154_v8, %v8180_v7  ;;  %v149_v15 = vadd.f32 %v8189_v12, %v8184_v9  ;;  %v8194_v16 = vld [vmem:[#allocation2 + $0x60] sm:$0xff]  ;;  %v8196_v17 = vld [vmem:[#allocation2 + $0x68] sm:$0xff]  ;;  %v94_v18 = vld [vmem:[#allocation2 + $0x70] sm:$0xff] }
  0x51   :  { %v146_v19 = vadd.f32 %v145_v10, %v8178_v6  ;;  %v8199_v20 = vld [vmem:[#allocation2 + $0x38] sm:$0xff]  ;;  %v159_v21 = vadd.f32 %v8196_v17, %v8194_v16  ;;  %v96_v22 = vld [vmem:[#allocation2 + $0x80] sm:$0xff]  ;;  %v97_v23 = vld [vmem:[#allocation2 + $0x88] sm:$0xff] }
  0x52   :  { %v156_v24 = vadd.f32 %v155_v14, %v8187_v11  ;;  %v150_v25 = vadd.f32 %v149_v15, %v86_v13  ;;  %v95_v26 = vld [vmem:[#allocation2 + $0x78] sm:$0xff]  ;;  %v98_v27 = vld [vmem:[#allocation2 + $0x90] sm:$0xff]  ;;  %v164_v28 = vadd.f32 %v97_v23, %v96_v22  ;;  %v8204_v29 = vld [vmem:[#allocation2 + $0xa0] sm:$0xff] }
  0x53   :  { %147 = vadd.xlane.f32.xlu0 %v146_v19  ;;  %v160_v30 = vadd.f32 %v159_v21, %v94_v18  ;;  %v99_v31 = vld [vmem:[#allocation2 + $0x98] sm:$0xff]  ;;  %v8206_v32 = vld [vmem:[#allocation2 + $0xa8] sm:$0xff]  ;;  %v102_v33 = vld [vmem:[#allocation2 + $0xb0] sm:$0xff] }
  0x54   :  { %157 = vadd.xlane.f32.xlu1 %v156_v24  ;;  %v151_v34 = vadd.f32 %v150_v25, %v8199_v20  ;;  %v165_v35 = vadd.f32 %v164_v28, %v98_v27  ;;  %v169_v36 = vadd.f32 %v8206_v32, %v8204_v29  ;;  %v104_v37 = vld [vmem:[#allocation2 + $0xc0] sm:$0xff]  ;;  %v105_v38 = vld [vmem:[#allocation2 + $0xc8] sm:$0xff]  ;;  %v106_v39 = vld [vmem:[#allocation2 + $0xd0] sm:$0xff] }
  0x55   :  { %v161_v40 = vadd.f32 %v160_v30, %v95_v26  ;;  %v103_v41 = vld [vmem:[#allocation2 + $0xb8] sm:$0xff]  ;;  %v174_v42 = vadd.f32 %v105_v38, %v104_v37  ;;  %v108_v43 = vld [vmem:[#allocation2 + $0xe0] sm:$0xff]  ;;  %v109_v44 = vld [vmem:[#allocation2 + $0xe8] sm:$0xff] }
  0x56   :  { %v170_v45 = vadd.f32 %v169_v36, %v102_v33  ;;  %v110_v46 = vld [vmem:[#allocation2 + $0xf0] sm:$0xff]  ;;  %v179_v47 = vadd.f32 %v109_v44, %v108_v43  ;;  %v112_v48 = vld [vmem:[#allocation2 + $0x100] sm:$0xff]  ;;  %v166_v49 = vadd.f32 %v165_v35, %v99_v31  ;;  %v107_v50 = vld [vmem:[#allocation2 + $0xd8] sm:$0xff] }
  0x57   :  { %152 = vadd.xlane.f32.xlu0 %v151_v34  ;;  %v175_v51 = vadd.f32 %v174_v42, %v106_v39  ;;  %v111_v52 = vld [vmem:[#allocation2 + $0xf8] sm:$0xff]  ;;  %v113_v53 = vld [vmem:[#allocation2 + $0x108] sm:$0xff]  ;;  %v114_v56 = vld [vmem:[#allocation2 + $0x110] sm:$0xff] }
  0x58   :  { %162 = vadd.xlane.f32.xlu1 %v161_v40  ;;  %v171_v54 = vadd.f32 %v170_v45, %v103_v41  ;;  %v180_v55 = vadd.f32 %v179_v47, %v110_v46  ;;  %v184_v57 = vadd.f32 %v113_v53, %v112_v48  ;;  %v116_v58 = vld [vmem:[#allocation2 + $0x120] sm:$0xff]  ;;  %v117_v59 = vld [vmem:[#allocation2 + $0x128] sm:$0xff]  ;;  %v118_v60 = vld [vmem:[#allocation2 + $0x130] sm:$0xff] }
  0x59   :  { %v189_v61 = vadd.f32 %v117_v59, %v116_v58  ;;  %v120_v62 = vld [vmem:[#allocation2 + $0x140] sm:$0xff]  ;;  %v121_v63 = vld [vmem:[#allocation2 + $0x148] sm:$0xff]  ;;  %v176_v8 = vadd.f32 %v175_v51, %v107_v50  ;;  %v115_v10 = vld [vmem:[#allocation2 + $0x118] sm:$0xff] }
  0x5a   :  { %v124_v3 = vld [vmem:[#allocation2 + $0x160] sm:$0xff]  ;;  %v185_v13 = vadd.f32 %v184_v57, %v114_v56  ;;  %v119_v14 = vld [vmem:[#allocation2 + $0x138] sm:$0xff]  ;;  %v194_v15 = vadd.f32 %v121_v63, %v120_v62  ;;  %v125_v18 = vld [vmem:[#allocation2 + $0x168] sm:$0xff]  ;;  %v181_v19 = vadd.f32 %v180_v55, %v111_v52 }
  0x5b   :  { %167 = vadd.xlane.f32.xlu0 %v166_v49  ;;  %v190_v21 = vadd.f32 %v189_v61, %v118_v60  ;;  %v122_v22 = vld [vmem:[#allocation2 + $0x150] sm:$0xff]  ;;  %v199_v23 = vadd.f32 %v125_v18, %v124_v3  ;;  %v128_v24 = vld [vmem:[#allocation2 + $0x180] sm:$0xff]  ;;  %v129_v25 = vld [vmem:[#allocation2 + $0x188] sm:$0xff] }
  0x5c   :  { %172 = vadd.xlane.f32.xlu1 %v171_v54  ;;  %v126_v26 = vld [vmem:[#allocation2 + $0x170] sm:$0xff]  ;;  %v132_v27 = vld [vmem:[#allocation2 + $0x1a0] sm:$0xff]  ;;  %v133_v28 = vld [vmem:[#allocation2 + $0x1a8] sm:$0xff]  ;;  %v186_v31 = vadd.f32 %v185_v13, %v115_v10  ;;  %v195_v33 = vadd.f32 %v194_v15, %v122_v22  ;;  %v204_v36 = vadd.f32 %v129_v25, %v128_v24 }
  0x5d   :  { %v123_v30 = vld [vmem:[#allocation2 + $0x158] sm:$0xff]  ;;  %v130_v35 = vld [vmem:[#allocation2 + $0x190] sm:$0xff]  ;;  %v191_v38 = vadd.f32 %v190_v21, %v119_v14  ;;  %v200_v39 = vadd.f32 %v199_v23, %v126_v26  ;;  %v209_v40 = vadd.f32 %v133_v28, %v132_v27  ;;  %v136_v41 = vld [vmem:[#allocation2 + $0x1c0] sm:$0xff] }
  0x5e   :  { %v127_v34 = vld [vmem:[#allocation2 + $0x178] sm:$0xff]  ;;  %v134_v37 = vld [vmem:[#allocation2 + $0x1b0] sm:$0xff]  ;;  %v137_v42 = vld [vmem:[#allocation2 + $0x1c8] sm:$0xff]  ;;  %v196_v47 = vadd.f32 %v195_v33, %v123_v30  ;;  %v205_v48 = vadd.f32 %v204_v36, %v130_v35 }
  0x5f   :  { %177 = vadd.xlane.f32.xlu0 %v176_v8  ;;  %v140_v43 = vld [vmem:[#allocation2 + $0x1e0] sm:$0xff]  ;;  %v141_v44 = vld [vmem:[#allocation2 + $0x1e8] sm:$0xff]  ;;  %v131_v45 = vld [vmem:[#allocation2 + $0x198] sm:$0xff]  ;;  %v214_v50 = vadd.f32 %v137_v42, %v136_v41  ;;  %v201_v52 = vadd.f32 %v200_v39, %v127_v34  ;;  %v210_v53 = vadd.f32 %v209_v40, %v134_v37 }
  0x60   :  { %182 = vadd.xlane.f32.xlu1 %v181_v19  ;;  %v138_v46 = vld [vmem:[#allocation2 + $0x1d0] sm:$0xff]  ;;  %v135_v49 = vld [vmem:[#allocation2 + $0x1b8] sm:$0xff]  ;;  %v219_v54 = vadd.f32 %v141_v44, %v140_v43  ;;  %v206_v56 = vadd.f32 %v205_v48, %v131_v45  ;;  %v765_v63 = vld [vmem:[#allocation7] sm:$0xff] }
  0x61   :  { %v142_v51 = vld [vmem:[#allocation2 + $0x1f0] sm:$0xff]  ;;  %v139_v55 = vld [vmem:[#allocation2 + $0x1d8] sm:$0xff]  ;;  %v215_v57 = vadd.f32 %v214_v50, %v138_v46  ;;  %v211_v59 = vadd.f32 %v210_v53, %v135_v49  ;;  %v769_v3 = vld [vmem:[#allocation7 + $0x20] sm:$0xff] }
  0x62   :  { %v143_v58 = vld [vmem:[#allocation2 + $0x1f8] sm:$0xff]  ;;  %v220_v60 = vadd.f32 %v219_v54, %v142_v51  ;;  %v766_v8 = vld [vmem:[#allocation7 + $0x8] sm:$0xff]  ;;  %v6241_v10 = vcombine.high %v765_v63, %v769_v3  ;;  %v6240_v13 = vcombine.low %v765_v63, %v769_v3  ;;  %v773_v15 = vld [vmem:[#allocation7 + $0x40] sm:$0xff] }
  0x63   :  { %187 = vadd.xlane.f32.xlu0 %v186_v31  ;;  %v216_v61 = vadd.f32 %v215_v57, %v139_v55  ;;  %v770_v14 = vld [vmem:[#allocation7 + $0x28] sm:$0xff]  ;;  %v777_v18 = vld [vmem:[#allocation7 + $0x60] sm:$0xff] }
  0x64   :  { %192 = vadd.xlane.f32.xlu1 %v191_v38  ;;  %v221_v62 = vadd.f32 %v220_v60, %v143_v58  ;;  %v6243_v19 = vcombine.high %v766_v8, %v770_v14  ;;  %v6242_v21 = vcombine.low %v766_v8, %v770_v14  ;;  %v6249_v22 = vcombine.high %v773_v15, %v777_v18  ;;  %v774_v23 = vld [vmem:[#allocation7 + $0x48] sm:$0xff]  ;;  %v781_v25 = vld [vmem:[#allocation7 + $0x80] sm:$0xff] }
  0x65   :  { %v778_v24 = vld [vmem:[#allocation7 + $0x68] sm:$0xff]  ;;  %2343 = vmatprep.subr.bf16.mxu0 %v6241_v10  ;;  %v785_v27 = vld [vmem:[#allocation7 + $0xa0] sm:$0xff]  ;;  %v6248_v31 = vcombine.low %v773_v15, %v777_v18 }
  0x66   :  { %v6251_v26 = vcombine.high %v774_v23, %v778_v24  ;;  %v782_v28 = vld [vmem:[#allocation7 + $0x88] sm:$0xff]  ;;  %2344 = vmatpush1.bf16.msra.mxu0 %v6240_v13  ;;  %2569 = vmatprep.subr.bf16.mxu1 %v6243_v19  ;;  %v6250_v33 = vcombine.low %v774_v23, %v778_v24  ;;  %v6257_v34 = vcombine.high %v781_v25, %v785_v27  ;;  %v789_v36 = vld [vmem:[#allocation7 + $0xc0] sm:$0xff] }
  0x67   :  { %197 = vadd.xlane.f32.xlu0 %v196_v47  ;;  %v786_v30 = vld [vmem:[#allocation7 + $0xa8] sm:$0xff]  ;;  %2570 = vmatpush1.bf16.msra.mxu1 %v6242_v21  ;;  %v793_v37 = vld [vmem:[#allocation7 + $0xe0] sm:$0xff]  ;;  %v6256_v40 = vcombine.low %v781_v25, %v785_v27 }
  0x68   :  { %202 = vadd.xlane.f32.xlu1 %v201_v52  ;;  %2345 = vmatprep.subr.bf16.mxu0 %v6249_v22  ;;  %v6259_v35 = vcombine.high %v782_v28, %v786_v30  ;;  %v790_v38 = vld [vmem:[#allocation7 + $0xc8] sm:$0xff]  ;;  %v6258_v41 = vcombine.low %v782_v28, %v786_v30  ;;  %v6265_v42 = vcombine.high %v789_v36, %v793_v37  ;;  %v797_v44 = vld [vmem:[#allocation7 + $0x100] sm:$0xff] }
  0x69   :  { %2571 = vmatprep.subr.bf16.mxu1 %v6251_v26  ;;  %v794_v39 = vld [vmem:[#allocation7 + $0xe8] sm:$0xff]  ;;  %v801_v45 = vld [vmem:[#allocation7 + $0x120] sm:$0xff]  ;;  %v6264_v48 = vcombine.low %v789_v36, %v793_v37 }
  0x6a   :  { %2346 = vmatpush1.bf16.msra.mxu0 %v6248_v31  ;;  %v6267_v43 = vcombine.high %v790_v38, %v794_v39  ;;  %v798_v46 = vld [vmem:[#allocation7 + $0x108] sm:$0xff]  ;;  %v805_v49 = vld [vmem:[#allocation7 + $0x140] sm:$0xff]  ;;  %v6266_v51 = vcombine.low %v790_v38, %v794_v39  ;;  %v6273_v52 = vcombine.high %v797_v44, %v801_v45 }
  0x6b   :  { %207 = vadd.xlane.f32.xlu0 %v206_v56  ;;  %2572 = vmatpush1.bf16.msra.mxu1 %v6250_v33  ;;  %v802_v47 = vld [vmem:[#allocation7 + $0x128] sm:$0xff]  ;;  %v809_v50 = vld [vmem:[#allocation7 + $0x160] sm:$0xff]  ;;  %v6272_v56 = vcombine.low %v797_v44, %v801_v45 }
  0x6c   :  { %212 = vadd.xlane.f32.xlu1 %v211_v59  ;;  %2347 = vmatprep.subr.bf16.mxu0 %v6257_v34  ;;  %v806_v53 = vld [vmem:[#allocation7 + $0x148] sm:$0xff]  ;;  %v6275_v55 = vcombine.high %v798_v46, %v802_v47  ;;  %v813_v57 = vld [vmem:[#allocation7 + $0x180] sm:$0xff]  ;;  %v6274_v59 = vcombine.low %v798_v46, %v802_v47  ;;  %v6281_v60 = vcombine.high %v805_v49, %v809_v50 }
  0x6d   :  { %2573 = vmatprep.subr.bf16.mxu1 %v6259_v35  ;;  %v810_v54 = vld [vmem:[#allocation7 + $0x168] sm:$0xff]  ;;  %v817_v58 = vld [vmem:[#allocation7 + $0x1a0] sm:$0xff]  ;;  %v6280_v3 = vcombine.low %v805_v49, %v809_v50 }
  0x6e   :  { %2348 = vmatpush1.bf16.msra.mxu0 %v6256_v40  ;;  %v6283_v63 = vcombine.high %v806_v53, %v810_v54  ;;  %v821_v8 = vld [vmem:[#allocation7 + $0x1c0] sm:$0xff]  ;;  %v6282_v13 = vcombine.low %v806_v53, %v810_v54  ;;  %v6289_v14 = vcombine.high %v813_v57, %v817_v58  ;;  %v822_v15 = vld [vmem:[#allocation7 + $0x1c8] sm:$0xff]  ;;  %v6288_v21 = vcombine.low %v813_v57, %v817_v58 }
  0x6f   :  { %217 = vadd.xlane.f32.xlu0 %v216_v61  ;;  %2574 = vmatpush1.bf16.msra.mxu1 %v6258_v41  ;;  %v814_v61 = vld [vmem:[#allocation7 + $0x188] sm:$0xff]  ;;  %v825_v10 = vld [vmem:[#allocation7 + $0x1e0] sm:$0xff] }
  0x70   :  { %222 = vadd.xlane.f32.xlu1 %v221_v62  ;;  %2349 = vmatprep.subr.bf16.mxu0 %v6265_v42  ;;  %v818_v62 = vld [vmem:[#allocation7 + $0x1a8] sm:$0xff]  ;;  %v829_v22 = vld [vmem:[#allocation7 + $0x200] sm:$0xff]  ;;  %v6297_v25 = vcombine.high %v821_v8, %v825_v10  ;;  %v6296_v30 = vcombine.low %v821_v8, %v825_v10 }
  0x71   :  { %2575 = vmatprep.subr.bf16.mxu1 %v6267_v43  ;;  %v826_v18 = vld [vmem:[#allocation7 + $0x1e8] sm:$0xff]  ;;  %v6291_v19 = vcombine.high %v814_v61, %v818_v62  ;;  %v833_v23 = vld [vmem:[#allocation7 + $0x220] sm:$0xff]  ;;  %v6290_v24 = vcombine.low %v814_v61, %v818_v62 }
  0x72   :  { %2350 = vmatpush1.bf16.msra.mxu0 %v6264_v48  ;;  %v830_v26 = vld [vmem:[#allocation7 + $0x208] sm:$0xff]  ;;  %v6299_v28 = vcombine.high %v822_v15, %v826_v18  ;;  %v8211_v31 = vld [vmem:[#allocation7 + $0x240] sm:$0xff]  ;;  %v6298_v34 = vcombine.low %v822_v15, %v826_v18  ;;  %v6305_v35 = vcombine.high %v829_v22, %v833_v23  ;;  %v6304_v37 = vcombine.low %v829_v22, %v833_v23 }
  0x73   :  { %2576 = vmatpush1.bf16.msra.mxu1 %v6266_v51  ;;  %2351 = vmatprep.subr.bf16.mxu0 %v6273_v52  ;;  %v834_v27 = vld [vmem:[#allocation7 + $0x228] sm:$0xff]  ;;  %v8213_v33 = vld [vmem:[#allocation7 + $0x260] sm:$0xff] }
  0x74   :  { %2577 = vmatprep.subr.bf16.mxu1 %v6275_v55  ;;  %v6307_v36 = vcombine.high %v830_v26, %v834_v27  ;;  %v6306_v38 = vcombine.low %v830_v26, %v834_v27  ;;  %v6313_v39 = vcombine.high %v8211_v31, %v8213_v33  ;;  %v7818_v15 = vld [vmem:[#allocation2 + $0x80] sm:$0xff] }
  0x76   :  { %2352 = vmatpush1.bf16.msra.mxu0 %v6272_v56 }
  0x77   :  { %2578 = vmatpush1.bf16.msra.mxu1 %v6274_v59  ;;  %2353 = vmatprep.subr.bf16.mxu0 %v6281_v60 }
  0x78   :  { %2579 = vmatprep.subr.bf16.mxu1 %v6283_v63 }
  0x7a   :  { %2354 = vmatpush1.bf16.msra.mxu0 %v6280_v3 }
  0x7b   :  { %2580 = vmatpush1.bf16.msra.mxu1 %v6282_v13  ;;  %2355 = vmatprep.subr.bf16.mxu0 %v6289_v14 }
  0x7c   :  { %2581 = vmatprep.subr.bf16.mxu1 %v6291_v19  ;;  %v7819_v19 = vld [vmem:[#allocation2 + $0x88] sm:$0xff] }
  0x7e   :  { %2356 = vmatpush1.bf16.msra.mxu0 %v6288_v21 }
  0x7f   :  { %2582 = vmatpush1.bf16.msra.mxu1 %v6290_v24  ;;  %2357 = vmatprep.subr.bf16.mxu0 %v6297_v25 }
  0x80   :  { %2583 = vmatprep.subr.bf16.mxu1 %v6299_v28 }
  0x82   :  { %2358 = vmatpush1.bf16.msra.mxu0 %v6296_v30 }
  0x83   :  { %2584 = vmatpush1.bf16.msra.mxu1 %v6298_v34  ;;  %2359 = vmatprep.subr.bf16.mxu0 %v6305_v35  ;;  %v7820_v35 = vld [vmem:[#allocation2 + $0x70] sm:$0xff] }
  0x84   :  { %2585 = vmatprep.subr.bf16.mxu1 %v6307_v36 }
  0x86   :  { %2360 = vmatpush1.bf16.msra.mxu0 %v6304_v37  ;;  %v7821_v37 = vld [vmem:[#allocation2 + $0x78] sm:$0xff] }
  0x87   :  { %2586 = vmatpush1.bf16.msra.mxu1 %v6306_v38  ;;  %2361 = vmatprep.subr.bf16.mxu0 %v6313_v39 }
  0xe0   :  { %v148_v40 = vpop.xlane.xlu0 %147 }
  0xe1   :  { %v225_v41 = vmul.f32 0.001953125, %v148_v40  ;;  %v158_v42 = vpop.xlane.xlu1 %157  ;;  %v7822_v40 = vld [vmem:[#allocation2 + $0x90] sm:$0xff] }
  0xe2   :  { %v227_v43 = vmul.f32 0.001953125, %v158_v42  ;;  %v7823_v42 = vld [vmem:[#allocation2 + $0xc0] sm:$0xff] }
  0xe3   :  { %v8218_v44 = vsub.f32 %v8166_v0, %v225_v41  ;;  %v8221_v45 = vsub.f32 %v8168_v1, %v225_v41  ;;  %v8224_v46 = vsub.f32 %v8170_v2, %v225_v41  ;;  %v8227_v47 = vsub.f32 %v8178_v6, %v225_v41 }
  0xe4   :  { %v8230_v48 = vsub.f32 %v8174_v4, %v227_v43  ;;  %v8233_v49 = vsub.f32 %v8176_v5, %v227_v43  ;;  %v153_v50 = vpop.xlane.xlu0 %152  ;;  %v8236_v51 = vsub.f32 %v8180_v7, %v227_v43  ;;  %v8239_v0 = vsub.f32 %v8187_v11, %v227_v43 }
  0xe5   :  { %v226_v1 = vmul.f32 0.001953125, %v153_v50  ;;  %v163_v52 = vpop.xlane.xlu1 %162  ;;  %v305_v2 = vmul.f32 %v8218_v44, %v8218_v44  ;;  %v306_v6 = vmul.f32 %v8221_v45, %v8221_v45  ;;  %v307_v4 = vmul.f32 %v8224_v46, %v8224_v46  ;;  %v7824_v50 = vld [vmem:[#allocation2 + $0xc8] sm:$0xff] }
  0xe6   :  { %10353 = vst [vmem:[#allocation15_spill] sm:$0xff] %v8236_v51  ;;  %v228_v5 = vmul.f32 0.001953125, %v163_v52  ;;  %v308_v53 = vmul.f32 %v8227_v47, %v8227_v47  ;;  %v313_v7 = vmul.f32 %v8230_v48, %v8230_v48  ;;  %v314_v11 = vmul.f32 %v8233_v49, %v8233_v49 }
  0xe7   :  { %v8254_v54 = vsub.f32 %v8184_v9, %v226_v1  ;;  %v8257_v55 = vsub.f32 %v8189_v12, %v226_v1  ;;  %v369_v56 = vadd.f32 %v306_v6, %v305_v2  ;;  %v315_v57 = vmul.f32 %v8236_v51, %v8236_v51  ;;  %v7817_v12 = vld [vmem:[#allocation2 + $0x30] sm:$0xff]  ;;  %v7825_v6 = vld [vmem:[#allocation2 + $0xe0] sm:$0xff] }
  0xe8   :  { %v8262_v58 = vsub.f32 %v8194_v16, %v228_v5  ;;  %v8265_v59 = vsub.f32 %v8196_v17, %v228_v5  ;;  %v168_v60 = vpop.xlane.xlu0 %167  ;;  %v316_v61 = vmul.f32 %v8239_v0, %v8239_v0  ;;  %v379_v62 = vadd.f32 %v314_v11, %v313_v7 }
  0xe9   :  { %v229_v9 = vmul.f32 0.001953125, %v168_v60  ;;  %v173_v63 = vpop.xlane.xlu1 %172  ;;  %v370_v3 = vadd.f32 %v369_v56, %v307_v4  ;;  %v8269_v8 = vsub.f32 %v7817_v12, %v226_v1  ;;  %v8272_v10 = vsub.f32 %v8199_v20, %v226_v1 }
  0xea   :  { %v8274_v13 = vmul.f32 0.001953125, %v173_v63  ;;  %v380_v16 = vadd.f32 %v379_v62, %v315_v57  ;;  %v309_v17 = vmul.f32 %v8254_v54, %v8254_v54  ;;  %v310_v14 = vmul.f32 %v8257_v55, %v8257_v55  ;;  %v7827_v62 = vld [vmem:[#allocation2 + $0x98] sm:$0xff] }
  0xeb   :  { %v8280_v18 = vsub.f32 %v7818_v15, %v229_v9  ;;  %v8282_v21 = vsub.f32 %v7819_v19, %v229_v9  ;;  %v371_v22 = vadd.f32 %v370_v3, %v308_v53  ;;  %v311_v20 = vmul.f32 %v8269_v8, %v8269_v8  ;;  %v7828_v15 = vld [vmem:[#allocation2 + $0x100] sm:$0xff] }
  0xec   :  { %v8288_v23 = vsub.f32 %v8204_v29, %v8274_v13  ;;  %v8292_v24 = vsub.f32 %v8206_v32, %v8274_v13  ;;  %v178_v25 = vpop.xlane.xlu0 %177  ;;  %v381_v26 = vadd.f32 %v380_v16, %v316_v61  ;;  %v312_v27 = vmul.f32 %v8272_v10, %v8272_v10 }
  0xed   :  { %v8296_v28 = vmul.f32 0.001953125, %v178_v25  ;;  %372 = vadd.xlane.f32.xlu0 %v371_v22  ;;  %v183_v30 = vpop.xlane.xlu1 %182  ;;  %v374_v34 = vadd.f32 %v310_v14, %v309_v17  ;;  %v8298_v36 = vsub.f32 %v7820_v35, %v228_v5  ;;  %v8300_v29 = vsub.f32 %v7821_v37, %v228_v5  ;;  %v7826_v5 = vld [vmem:[#allocation2 + $0xe8] sm:$0xff]  ;;  %v7830_v25 = vld [vmem:[#allocation2 + $0xb0] sm:$0xff] }
  0xee   :  { %v8302_v38 = vmul.f32 0.001953125, %v183_v30  ;;  %v317_v32 = vmul.f32 %v8262_v58, %v8262_v58  ;;  %v318_v39 = vmul.f32 %v8265_v59, %v8265_v59  ;;  %v8308_v41 = vsub.f32 %v7822_v40, %v229_v9  ;;  %v7829_v22 = vld [vmem:[#allocation2 + $0x108] sm:$0xff] }
  0xef   :  { %10354 = vst [vmem:[#allocation16_spill] sm:$0xff] %v8298_v36  ;;  %v8311_v43 = vsub.f32 %v7823_v42, %v8296_v28  ;;  %v8314_v1 = vsub.f32 %v7824_v50, %v8296_v28  ;;  %v375_v52 = vadd.f32 %v374_v34, %v311_v20  ;;  %v319_v2 = vmul.f32 %v8298_v36, %v8298_v36  ;;  %v7832_v34 = vld [vmem:[#allocation2 + $0x128] sm:$0xff]  ;;  %v7833_v50 = vld [vmem:[#allocation2 + $0xb8] sm:$0xff] }
  0xf0   :  { %10355 = vst [vmem:[#allocation17_spill] sm:$0xff] %v8308_v41  ;;  %v8319_v4 = vsub.f32 %v7825_v6, %v8302_v38  ;;  %v8322_v53 = vsub.f32 %v7826_v5, %v8302_v38  ;;  %v188_v7 = vpop.xlane.xlu0 %187  ;;  %v320_v11 = vmul.f32 %v8300_v29, %v8300_v29  ;;  %v384_v56 = vadd.f32 %v318_v39, %v317_v32 }
  0xf1   :  { %v8326_v57 = vmul.f32 0.001953125, %v188_v7  ;;  %382 = vadd.xlane.f32.xlu0 %v381_v26  ;;  %v376_v60 = vadd.f32 %v375_v52, %v312_v27  ;;  %v193_v61 = vpop.xlane.xlu1 %192  ;;  %v8328_v63 = vsub.f32 %v7827_v62, %v229_v9  ;;  %v321_v3 = vmul.f32 %v8280_v18, %v8280_v18  ;;  %v7831_v27 = vld [vmem:[#allocation2 + $0x120] sm:$0xff]  ;;  %v7836_v62 = vld [vmem:[#allocation2 + $0x148] sm:$0xff] }
  0xf2   :  { %v8332_v12 = vmul.f32 0.001953125, %v193_v61  ;;  %v385_v16 = vadd.f32 %v384_v56, %v319_v2  ;;  %v322_v17 = vmul.f32 %v8282_v21, %v8282_v21  ;;  %v323_v14 = vmul.f32 %v8308_v41, %v8308_v41  ;;  %v7834_v56 = vld [vmem:[#allocation2 + $0xd0] sm:$0xff]  ;;  %v7835_v61 = vld [vmem:[#allocation2 + $0x140] sm:$0xff] }
  0xf3   :  { %10356 = vst [vmem:[#allocation18_spill] sm:$0xff] %v8328_v63  ;;  %v8339_v19 = vsub.f32 %v7828_v15, %v8326_v57  ;;  %v8342_v9 = vsub.f32 %v7829_v22, %v8326_v57  ;;  %377 = vadd.xlane.f32.xlu1 %v376_v60  ;;  %v324_v20 = vmul.f32 %v8328_v63, %v8328_v63  ;;  %v7837_v15 = vld [vmem:[#allocation2 + $0x160] sm:$0xff] }
  0xf4   :  { %v8347_v26 = vsub.f32 %v7830_v25, %v8274_v13  ;;  %v8350_v30 = vsub.f32 %v7831_v27, %v8332_v12  ;;  %v8353_v35 = vsub.f32 %v7832_v34, %v8332_v12  ;;  %v198_v37 = vpop.xlane.xlu0 %197  ;;  %v386_v32 = vadd.f32 %v385_v16, %v320_v11  ;;  %v7838_v25 = vld [vmem:[#allocation2 + $0x168] sm:$0xff] }
  0xf5   :  { %10357 = vst [vmem:[#allocation19_spill] sm:$0xff] %v8339_v19  ;;  %10358 = vst [vmem:[#allocation20_spill] sm:$0xff] %v8342_v9  ;;  %v389_v39 = vadd.f32 %v322_v17, %v321_v3  ;;  %v8355_v40 = vmul.f32 0.001953125, %v198_v37  ;;  %v203_v42 = vpop.xlane.xlu1 %202  ;;  %v8358_v52 = vsub.f32 %v7833_v50, %v8274_v13  ;;  %v325_v2 = vmul.f32 %v8288_v23, %v8288_v23  ;;  %v7839_v37 = vld [vmem:[#allocation2 + $0xd8] sm:$0xff] }
  0xf6   :  { %10359 = vst [vmem:[#allocation21_spill] sm:$0xff] %v8347_v26  ;;  %10360 = vst [vmem:[#allocation22_spill] sm:$0xff] %v8350_v30  ;;  %v326_v6 = vmul.f32 %v8292_v24, %v8292_v24  ;;  %v8364_v7 = vmul.f32 0.001953125, %v203_v42  ;;  %v327_v11 = vmul.f32 %v8347_v26, %v8347_v26  ;;  %v8369_v60 = vsub.f32 %v7834_v56, %v8296_v28 }
  0xf7   :  { %10361 = vst [vmem:[#allocation23_spill] sm:$0xff] %v8353_v35  ;;  %10362 = vst [vmem:[#allocation24_spill] sm:$0xff] %v8358_v52  ;;  %v390_v5 = vadd.f32 %v389_v39, %v323_v14  ;;  %v8372_v13 = vsub.f32 %v7835_v61, %v8355_v40  ;;  %v8375_v3 = vsub.f32 %v7836_v62, %v8355_v40  ;;  %387 = vadd.xlane.f32.xlu1 %v386_v32 }
  0xf8   :  { %10363 = vst [vmem:[#allocation25_spill] sm:$0xff] %v8369_v60  ;;  %v328_v16 = vmul.f32 %v8358_v52, %v8358_v52  ;;  %v394_v17 = vadd.f32 %v326_v6, %v325_v2  ;;  %v8380_v22 = vsub.f32 %v7837_v15, %v8364_v7  ;;  %v8383_v27 = vsub.f32 %v7838_v25, %v8364_v7  ;;  %v208_v34 = vpop.xlane.xlu0 %207 }
  0xf9   :  { %10364 = vst [vmem:[#allocation26_spill] sm:$0xff] %v8372_v13  ;;  %10365 = vst [vmem:[#allocation27_spill] sm:$0xff] %v8375_v3  ;;  %v391_v14 = vadd.f32 %v390_v5, %v324_v20  ;;  %v8386_v39 = vsub.f32 %v7839_v37, %v8296_v28  ;;  %v8388_v42 = vmul.f32 0.001953125, %v208_v34  ;;  %v329_v50 = vmul.f32 %v8311_v43, %v8311_v43  ;;  %v213_v2 = vpop.xlane.xlu1 %212  ;;  %v7840_v28 = vld [vmem:[#allocation2 + $0xf0] sm:$0xff]  ;;  %v7843_v34 = vld [vmem:[#allocation2 + $0x1a0] sm:$0xff] }
  0xfa   :  { %10366 = vst [vmem:[#allocation28_spill] sm:$0xff] %v8380_v22  ;;  %10367 = vst [vmem:[#allocation29_spill] sm:$0xff] %v8383_v27  ;;  %v395_v32 = vadd.f32 %v394_v17, %v327_v11  ;;  %v330_v20 = vmul.f32 %v8314_v1, %v8314_v1  ;;  %v331_v6 = vmul.f32 %v8369_v60, %v8369_v60  ;;  %v8398_v56 = vmul.f32 0.001953125, %v213_v2  ;;  %v7841_v11 = vld [vmem:[#allocation2 + $0x180] sm:$0xff]  ;;  %v7842_v17 = vld [vmem:[#allocation2 + $0x188] sm:$0xff] }
  0xfb   :  { %10368 = vst [vmem:[#allocation30_spill] sm:$0xff] %v8386_v39  ;;  %392 = vadd.xlane.f32.xlu0 %v391_v14  ;;  %v332_v5 = vmul.f32 %v8386_v39, %v8386_v39  ;;  %v8401_v61 = vsub.f32 %v7840_v28, %v8302_v38  ;;  %v8404_v62 = vsub.f32 %v7841_v11, %v8388_v42  ;;  %v7844_v2 = vld [vmem:[#allocation2 + $0x1a8] sm:$0xff]  ;;  %v7845_v39 = vld [vmem:[#allocation2 + $0xf8] sm:$0xff] }
  0xfc   :  { %v8407_v15 = vsub.f32 %v7842_v17, %v8388_v42  ;;  %v396_v14 = vadd.f32 %v395_v32, %v328_v16  ;;  %v399_v25 = vadd.f32 %v330_v20, %v329_v50  ;;  %v8410_v37 = vsub.f32 %v7843_v34, %v8398_v56  ;;  %v218_v28 = vpop.xlane.xlu0 %217 }
  0xfd   :  { %10369 = vst [vmem:[#allocation31_spill] sm:$0xff] %v8401_v61  ;;  %10370 = vst [vmem:[#allocation32_spill] sm:$0xff] %v8404_v62  ;;  %v8413_v60 = vsub.f32 %v7844_v2, %v8398_v56  ;;  %v8416_v26 = vsub.f32 %v7845_v39, %v8302_v38  ;;  %v333_v11 = vmul.f32 %v8319_v4, %v8319_v4  ;;  %v8420_v16 = vmul.f32 0.001953125, %v218_v28  ;;  %v223_v20 = vpop.xlane.xlu1 %222  ;;  %v7846_v2 = vld [vmem:[#allocation2 + $0x110] sm:$0xff]  ;;  %v7847_v39 = vld [vmem:[#allocation2 + $0x118] sm:$0xff] }
  0xfe   :  { %10371 = vst [vmem:[#allocation33_spill] sm:$0xff] %v8407_v15  ;;  %10372 = vst [vmem:[#allocation34_spill] sm:$0xff] %v8410_v37  ;;  %397 = vadd.xlane.f32.xlu1 %v396_v14  ;;  %v400_v17 = vadd.f32 %v399_v25, %v331_v6  ;;  %v334_v32 = vmul.f32 %v8322_v53, %v8322_v53  ;;  %v335_v50 = vmul.f32 %v8401_v61, %v8401_v61  ;;  %v7848_v28 = vld [vmem:[#allocation2 + $0x1c0] sm:$0xff]  ;;  %v7849_v61 = vld [vmem:[#allocation2 + $0x1c8] sm:$0xff] }
  0xff   :  { %10373 = vst [vmem:[#allocation35_spill] sm:$0xff] %v8413_v60  ;;  %10374 = vst [vmem:[#allocation36_spill] sm:$0xff] %v8416_v26  ;;  %v336_v34 = vmul.f32 %v8416_v26, %v8416_v26  ;;  %v8429_v38 = vsub.f32 %v7846_v2, %v8326_v57  ;;  %v8432_v14 = vsub.f32 %v7847_v39, %v8326_v57  ;;  %v8448_v63 = vmul.f32 0.001953125, %v223_v20  ;;  %v7853_v20 = vld [vmem:[#allocation2 + $0x1e8] sm:$0xff] }
 0x100   :  { %v337_v6 = vmul.f32 %v8339_v19, %v8339_v19  ;;  %v401_v25 = vadd.f32 %v400_v17, %v332_v5  ;;  %v8437_v41 = vsub.f32 %v7848_v28, %v8420_v16  ;;  %v8440_v52 = vsub.f32 %v7849_v61, %v8420_v16  ;;  %v7850_v17 = vld [vmem:[#allocation2 + $0x130] sm:$0xff]  ;;  %v7851_v61 = vld [vmem:[#allocation2 + $0x138] sm:$0xff]  ;;  %v8711_v19 = vld [vmem:[#allocation7 + $0x620] sm:$0xff] }
 0x101   :  { %10375 = vst [vmem:[#allocation37_spill] sm:$0xff] %v8429_v38  ;;  %10376 = vst [vmem:[#allocation38_spill] sm:$0xff] %v8432_v14  ;;  %v404_v26 = vadd.f32 %v334_v32, %v333_v11  ;;  %v338_v2 = vmul.f32 %v8342_v9, %v8342_v9  ;;  %v339_v57 = vmul.f32 %v8429_v38, %v8429_v38  ;;  %v7852_v38 = vld [vmem:[#allocation2 + $0x1e0] sm:$0xff]  ;;  %v8687_v9 = vld [vmem:[#allocation7 + $0x5a8] sm:$0xff] }
 0x102   :  { %10377 = vst [vmem:[#allocation39_spill] sm:$0xff] %v8437_v41  ;;  %10378 = vst [vmem:[#allocation40_spill] sm:$0xff] %v8440_v52  ;;  %v340_v39 = vmul.f32 %v8432_v14, %v8432_v14  ;;  %402 = vadd.xlane.f32.xlu0 %v401_v25  ;;  %v8451_v28 = vsub.f32 %v7850_v17, %v8332_v12  ;;  %v8454_v11 = vsub.f32 %v7851_v61, %v8332_v12  ;;  %v7854_v61 = vld [vmem:[#allocation2 + $0x150] sm:$0xff]  ;;  %v7855_v14 = vld [vmem:[#allocation2 + $0x158] sm:$0xff] }
 0x103   :  { %v405_v5 = vadd.f32 %v404_v26, %v335_v50  ;;  %v341_v32 = vmul.f32 %v8350_v30, %v8350_v30  ;;  %v409_v36 = vadd.f32 %v338_v2, %v337_v6  ;;  %v8459_v51 = vsub.f32 %v7852_v38, %v8448_v63  ;;  %10414 = vst [vmem:[#allocation76_spill] sm:$0xff] %v8687_v9  ;;  %v8771_v9 = vld [vmem:[#allocation7 + $0x6e8] sm:$0xff] }
 0x104   :  { %10379 = vst [vmem:[#allocation41_spill] sm:$0xff] %v8451_v28  ;;  %10380 = vst [vmem:[#allocation42_spill] sm:$0xff] %v8454_v11  ;;  %v8462_v25 = vsub.f32 %v7853_v20, %v8448_v63  ;;  %v342_v26 = vmul.f32 %v8353_v35, %v8353_v35  ;;  %v343_v12 = vmul.f32 %v8451_v28, %v8451_v28  ;;  %v7856_v28 = vld [vmem:[#allocation2 + $0x170] sm:$0xff] }
 0x105   :  { %10381 = vst [vmem:[#allocation43_spill] sm:$0xff] %v8459_v51  ;;  %v406_v50 = vadd.f32 %v405_v5, %v336_v34  ;;  %v344_v17 = vmul.f32 %v8454_v11, %v8454_v11  ;;  %v8471_v6 = vsub.f32 %v7854_v61, %v8355_v40  ;;  %v410_v38 = vadd.f32 %v409_v36, %v339_v57  ;;  %v7857_v36 = vld [vmem:[#allocation2 + $0x178] sm:$0xff] }
 0x106   :  { %10382 = vst [vmem:[#allocation44_spill] sm:$0xff] %v8462_v25  ;;  %v414_v2 = vadd.f32 %v342_v26, %v341_v32  ;;  %v8474_v20 = vsub.f32 %v7855_v14, %v8355_v40  ;;  %v345_v30 = vmul.f32 %v8372_v13, %v8372_v13  ;;  %v346_v34 = vmul.f32 %v8375_v3, %v8375_v3  ;;  %v8673_v13 = vld [vmem:[#allocation7 + $0x568] sm:$0xff]  ;;  %v8677_v3 = vld [vmem:[#allocation7 + $0x5a0] sm:$0xff] }
 0x107   :  { %10383 = vst [vmem:[#allocation45_spill] sm:$0xff] %v8471_v6  ;;  %407 = vadd.xlane.f32.xlu1 %v406_v50  ;;  %v347_v5 = vmul.f32 %v8471_v6, %v8471_v6  ;;  %v8483_v61 = vsub.f32 %v7856_v28, %v8364_v7  ;;  %v8486_v57 = vsub.f32 %v7857_v36, %v8364_v7  ;;  %10411 = vst [vmem:[#allocation73_spill] sm:$0xff] %v8673_v13  ;;  %v8725_v13 = vld [vmem:[#allocation7 + $0x640] sm:$0xff] }
 0x108   :  { %10384 = vst [vmem:[#allocation46_spill] sm:$0xff] %v8474_v20  ;;  %v411_v40 = vadd.f32 %v410_v38, %v340_v39  ;;  %v415_v14 = vadd.f32 %v414_v2, %v343_v12  ;;  %v348_v32 = vmul.f32 %v8474_v20, %v8474_v20  ;;  %v349_v26 = vmul.f32 %v8380_v22, %v8380_v22  ;;  %v7858_v39 = vld [vmem:[#allocation2 + $0x190] sm:$0xff]  ;;  %v7859_v38 = vld [vmem:[#allocation2 + $0x198] sm:$0xff]  ;;  %v8661_v22 = vld [vmem:[#allocation7 + $0x560] sm:$0xff] }
 0x109   :  { %10385 = vst [vmem:[#allocation47_spill] sm:$0xff] %v8483_v61  ;;  %10386 = vst [vmem:[#allocation48_spill] sm:$0xff] %v8486_v57  ;;  %v419_v50 = vadd.f32 %v346_v34, %v345_v30  ;;  %v350_v6 = vmul.f32 %v8383_v27, %v8383_v27  ;;  %v351_v28 = vmul.f32 %v8483_v61, %v8483_v61  ;;  %v7860_v20 = vld [vmem:[#allocation2 + $0x1b0] sm:$0xff] }
 0x10a   :  { %v352_v11 = vmul.f32 %v8486_v57, %v8486_v57  ;;  %412 = vadd.xlane.f32.xlu0 %v411_v40  ;;  %v416_v7 = vadd.f32 %v415_v14, %v344_v17  ;;  %v8499_v12 = vsub.f32 %v7858_v39, %v8388_v42  ;;  %v8502_v2 = vsub.f32 %v7859_v38, %v8388_v42  ;;  %v7861_v14 = vld [vmem:[#allocation2 + $0x1b8] sm:$0xff] }
 0x10b   :  { %v353_v30 = vmul.f32 %v8404_v62, %v8404_v62  ;;  %v420_v34 = vadd.f32 %v419_v50, %v347_v5  ;;  %v424_v36 = vadd.f32 %v350_v6, %v349_v26  ;;  %v354_v61 = vmul.f32 %v8407_v15, %v8407_v15  ;;  %v8647_v62 = vld [vmem:[#allocation7 + $0x520] sm:$0xff]  ;;  %v8651_v15 = vld [vmem:[#allocation7 + $0x528] sm:$0xff]  ;;  %10409 = vst [vmem:[#allocation71_spill] sm:$0xff] %v8661_v22 }
 0x10c   :  { %10387 = vst [vmem:[#allocation49_spill] sm:$0xff] %v8499_v12  ;;  %10388 = vst [vmem:[#allocation50_spill] sm:$0xff] %v8502_v2  ;;  %v8509_v40 = vsub.f32 %v7860_v20, %v8398_v56  ;;  %417 = vadd.xlane.f32.xlu1 %v416_v7  ;;  %v355_v17 = vmul.f32 %v8499_v12, %v8499_v12  ;;  %v356_v42 = vmul.f32 %v8502_v2, %v8502_v2  ;;  %v7862_v12 = vld [vmem:[#allocation2 + $0x1d0] sm:$0xff]  ;;  %v8747_v22 = vld [vmem:[#allocation7 + $0x6a0] sm:$0xff] }
 0x10d   :  { %v8516_v39 = vsub.f32 %v7861_v14, %v8398_v56  ;;  %v357_v6 = vmul.f32 %v8410_v37, %v8410_v37  ;;  %v421_v5 = vadd.f32 %v420_v34, %v348_v32  ;;  %v425_v26 = vadd.f32 %v424_v36, %v351_v28  ;;  %v7863_v56 = vld [vmem:[#allocation2 + $0x1d8] sm:$0xff]  ;;  %10405 = vst [vmem:[#allocation67_spill] sm:$0xff] %v8647_v62  ;;  %v8701_v62 = vld [vmem:[#allocation7 + $0x5c8] sm:$0xff] }
 0x10e   :  { %10389 = vst [vmem:[#allocation51_spill] sm:$0xff] %v8509_v40  ;;  %v429_v50 = vadd.f32 %v354_v61, %v353_v30  ;;  %v358_v20 = vmul.f32 %v8413_v60, %v8413_v60  ;;  %v359_v7 = vmul.f32 %v8509_v40, %v8509_v40  ;;  %v8527_v2 = vsub.f32 %v7862_v12, %v8420_v16  ;;  %v7864_v40 = vld [vmem:[#allocation2 + $0x1f0] sm:$0xff] }
 0x10f   :  { %10390 = vst [vmem:[#allocation52_spill] sm:$0xff] %v8516_v39  ;;  %v360_v38 = vmul.f32 %v8516_v39, %v8516_v39  ;;  %v8530_v14 = vsub.f32 %v7863_v56, %v8420_v16  ;;  %422 = vadd.xlane.f32.xlu0 %v421_v5  ;;  %v426_v32 = vadd.f32 %v425_v26, %v352_v11  ;;  %v838_v5 = vld [vmem:[#allocation7 + $0x248] sm:$0xff]  ;;  %v7865_v26 = vld [vmem:[#allocation2 + $0x1f8] sm:$0xff]  ;;  %v845_v56 = vld [vmem:[#allocation7 + $0x280] sm:$0xff] }
 0x110   :  { %10391 = vst [vmem:[#allocation53_spill] sm:$0xff] %v8527_v2  ;;  %v430_v61 = vadd.f32 %v429_v50, %v355_v17  ;;  %v434_v28 = vadd.f32 %v358_v20, %v357_v6  ;;  %v361_v30 = vmul.f32 %v8437_v41, %v8437_v41  ;;  %v362_v34 = vmul.f32 %v8440_v52, %v8440_v52  ;;  %v842_v11 = vld [vmem:[#allocation7 + $0x268] sm:$0xff] }
 0x111   :  { %10392 = vst [vmem:[#allocation54_spill] sm:$0xff] %v8530_v14  ;;  %v363_v36 = vmul.f32 %v8527_v2, %v8527_v2  ;;  %v364_v12 = vmul.f32 %v8530_v14, %v8530_v14  ;;  %v8541_v16 = vsub.f32 %v7864_v40, %v8448_v63  ;;  %427 = vadd.xlane.f32.xlu1 %v426_v32  ;;  %v849_v2 = vld [vmem:[#allocation7 + $0x2a0] sm:$0xff]  ;;  %v846_v39 = vld [vmem:[#allocation7 + $0x288] sm:$0xff]  ;;  %10407 = vst [vmem:[#allocation69_spill] sm:$0xff] %v8651_v15 }
 0x112   :  { %v431_v17 = vadd.f32 %v430_v61, %v356_v42  ;;  %v435_v6 = vadd.f32 %v434_v28, %v359_v7  ;;  %v8544_v50 = vsub.f32 %v7865_v26, %v8448_v63  ;;  %v365_v20 = vmul.f32 %v8459_v51, %v8459_v51  ;;  %v850_v7 = vld [vmem:[#allocation7 + $0x2a8] sm:$0xff]  ;;  %v853_v32 = vld [vmem:[#allocation7 + $0x2c0] sm:$0xff]  ;;  %10413 = vst [vmem:[#allocation75_spill] sm:$0xff] %v8677_v3 }
 0x113   :  { %10393 = vst [vmem:[#allocation55_spill] sm:$0xff] %v8541_v16  ;;  %v439_v14 = vadd.f32 %v362_v34, %v361_v30  ;;  %v366_v40 = vmul.f32 %v8462_v25, %v8462_v25  ;;  %v367_v57 = vmul.f32 %v8541_v16, %v8541_v16  ;;  %v6312_v42 = vcombine.low %v8211_v31, %v8213_v33  ;;  %v857_v63 = vld [vmem:[#allocation7 + $0x2e0] sm:$0xff]  ;;  %v854_v52 = vld [vmem:[#allocation7 + $0x2c8] sm:$0xff] }
 0x114   :  { %10394 = vst [vmem:[#allocation56_spill] sm:$0xff] %v8544_v50  ;;  %432 = vadd.xlane.f32.xlu0 %v431_v17  ;;  %v436_v61 = vadd.f32 %v435_v6, %v360_v38  ;;  %v368_v28 = vmul.f32 %v8544_v50, %v8544_v50  ;;  %v6315_v26 = vcombine.high %v838_v5, %v842_v11  ;;  %v858_v16 = vld [vmem:[#allocation7 + $0x2e8] sm:$0xff]  ;;  %v861_v17 = vld [vmem:[#allocation7 + $0x300] sm:$0xff]  ;;  %10417 = vst [vmem:[#allocation79_spill] sm:$0xff] %v8701_v62 }
 0x115   :  { %v6314_v51 = vcombine.low %v838_v5, %v842_v11  ;;  %v440_v30 = vadd.f32 %v439_v14, %v363_v36  ;;  %v444_v34 = vadd.f32 %v366_v40, %v365_v20  ;;  %2362 = vmatpush1.bf16.msra.mxu0 %v6312_v42  ;;  %v6321_v25 = vcombine.high %v845_v56, %v849_v2  ;;  %v865_v6 = vld [vmem:[#allocation7 + $0x320] sm:$0xff]  ;;  %v866_v11 = vld [vmem:[#allocation7 + $0x328] sm:$0xff] }
 0x116   :  { %v6320_v41 = vcombine.low %v845_v56, %v849_v2  ;;  %437 = vadd.xlane.f32.xlu1 %v436_v61  ;;  %2587 = vmatprep.subr.bf16.mxu1 %v6315_v26  ;;  %v6323_v31 = vcombine.high %v846_v39, %v850_v7  ;;  %v6329_v33 = vcombine.high %v853_v32, %v857_v63  ;;  %v862_v2 = vld [vmem:[#allocation7 + $0x308] sm:$0xff]  ;;  %v881_v42 = vld [vmem:[#allocation7 + $0x3a0] sm:$0xff] }
 0x117   :  { %v441_v37 = vadd.f32 %v440_v30, %v364_v12  ;;  %v445_v60 = vadd.f32 %v444_v34, %v367_v57  ;;  %2588 = vmatpush1.bf16.msra.mxu1 %v6314_v51  ;;  %2363 = vmatprep.subr.bf16.mxu0 %v6321_v25  ;;  %v6322_v38 = vcombine.low %v846_v39, %v850_v7  ;;  %v869_v12 = vld [vmem:[#allocation7 + $0x340] sm:$0xff]  ;;  %v870_v39 = vld [vmem:[#allocation7 + $0x348] sm:$0xff] }
 0x118   :  { %2589 = vmatprep.subr.bf16.mxu1 %v6323_v31  ;;  %v6331_v5 = vcombine.high %v854_v52, %v858_v16  ;;  %v6328_v36 = vcombine.low %v853_v32, %v857_v63  ;;  %v6337_v20 = vcombine.high %v861_v17, %v865_v6  ;;  %v6330_v56 = vcombine.low %v854_v52, %v858_v16  ;;  %v873_v57 = vld [vmem:[#allocation7 + $0x360] sm:$0xff]  ;;  %v874_v40 = vld [vmem:[#allocation7 + $0x368] sm:$0xff] }
 0x119   :  { %442 = vadd.xlane.f32.xlu0 %v441_v37  ;;  %v446_v14 = vadd.f32 %v445_v60, %v368_v28  ;;  %2364 = vmatpush1.bf16.msra.mxu0 %v6320_v41  ;;  %v6339_v51 = vcombine.high %v862_v2, %v866_v11  ;;  %v6336_v25 = vcombine.low %v861_v17, %v865_v6  ;;  %v877_v60 = vld [vmem:[#allocation7 + $0x380] sm:$0xff]  ;;  %v878_v63 = vld [vmem:[#allocation7 + $0x388] sm:$0xff] }
 0x11a   :  { %2365 = vmatprep.subr.bf16.mxu0 %v6329_v33  ;;  %v6345_v37 = vcombine.high %v869_v12, %v873_v57  ;;  %v6338_v41 = vcombine.low %v862_v2, %v866_v11  ;;  %v6347_v7 = vcombine.high %v870_v39, %v874_v40  ;;  %v6344_v32 = vcombine.low %v869_v12, %v873_v57  ;;  %v882_v52 = vld [vmem:[#allocation7 + $0x3a8] sm:$0xff]  ;;  %v885_v28 = vld [vmem:[#allocation7 + $0x3c0] sm:$0xff] }
 0x11b   :  { %447 = vadd.xlane.f32.xlu1 %v446_v14  ;;  %2590 = vmatpush1.bf16.msra.mxu1 %v6322_v38  ;;  %v6353_v16 = vcombine.high %v877_v60, %v881_v42  ;;  %v6346_v61 = vcombine.low %v870_v39, %v874_v40  ;;  %v889_v26 = vld [vmem:[#allocation7 + $0x3e0] sm:$0xff]  ;;  %v6355_v30 = vcombine.high %v878_v63, %v882_v52  ;;  %v8560_v33 = vld [vmem:[#allocation7 + $0x408] sm:$0xff]  ;;  %v561_v40 = vld [vmem:[#allocation5] sm:$0xf] }
 0x11c   :  { %2591 = vmatprep.subr.bf16.mxu1 %v6331_v5  ;;  %v8556_v34 = vld [vmem:[#allocation7 + $0x400] sm:$0xff]  ;;  %v6352_v38 = vcombine.low %v877_v60, %v881_v42  ;;  %v886_v17 = vld [vmem:[#allocation7 + $0x3c8] sm:$0xff]  ;;  %v6361_v14 = vcombine.high %v885_v28, %v889_v26  ;;  %v6354_v11 = vcombine.low %v878_v63, %v882_v52  ;;  %v647_v60 = vld [vmem:[%s10211_s2] sm:$0xf]  ;;  %10420 = vst [vmem:[#allocation82_spill] sm:$0xff] %v8711_v19 }
 0x11d   :  { %2366 = vmatpush1.bf16.msra.mxu0 %v6328_v36  ;;  %v8558_v31 = vld [vmem:[#allocation7 + $0x420] sm:$0xff]  ;;  %v890_v6 = vld [vmem:[#allocation7 + $0x3e8] sm:$0xff]  ;;  %10423 = vst [vmem:[#allocation85_spill] sm:$0xff] %v8725_v13  ;;  %10428 = vst [vmem:[#allocation90_spill] sm:$0xff] %v8747_v22 }
 0x11e   :  { %2367 = vmatprep.subr.bf16.mxu0 %v6337_v20  ;;  %v8562_v5 = vld [vmem:[#allocation7 + $0x428] sm:$0xff]  ;;  %v6363_v20 = vcombine.high %v886_v17, %v890_v6  ;;  %v6369_v12 = vcombine.high %v8556_v34, %v8558_v31  ;;  %v6362_v57 = vcombine.low %v886_v17, %v890_v6  ;;  %v8583_v42 = vld [vmem:[#allocation7 + $0x440] sm:$0xff] }
 0x11f   :  { %2592 = vmatpush1.bf16.msra.mxu1 %v6330_v56  ;;  %v6360_v56 = vcombine.low %v885_v28, %v889_v26  ;;  %v8591_v63 = vld [vmem:[#allocation7 + $0x460] sm:$0xff]  ;;  %v8593_v52 = vld [vmem:[#allocation7 + $0x448] sm:$0xff] }
 0x120   :  { %2593 = vmatprep.subr.bf16.mxu1 %v6339_v51  ;;  %v6371_v51 = vcombine.high %v8560_v33, %v8562_v5  ;;  %v8599_v28 = vld [vmem:[#allocation7 + $0x4a0] sm:$0xff]  ;;  %v8601_v26 = vld [vmem:[#allocation7 + $0x488] sm:$0xff] }
 0x121   :  { %2368 = vmatpush1.bf16.msra.mxu0 %v6336_v25  ;;  %v563_v25 = vlaneseq  ;;  %v8659_v50 = vld [vmem:[#allocation7 + $0x540] sm:$0xff]  ;;  %v8733_v3 = vld [vmem:[#allocation7 + $0x648] sm:$0xff] }
 0x122   :  { %2369 = vmatprep.subr.bf16.mxu0 %v6345_v37  ;;  %10408 = vst [vmem:[#allocation70_spill] sm:$0xff] %v8659_v50  ;;  %v8709_v15 = vld [vmem:[#allocation7 + $0x600] sm:$0xff]  ;;  %10425 = vst [vmem:[#allocation87_spill] sm:$0xff] %v8733_v3  ;;  %v8761_v62 = vld [vmem:[#allocation7 + $0x6c8] sm:$0xff] }
 0x123   :  { %2594 = vmatpush1.bf16.msra.mxu1 %v6338_v41  ;;  %v8572_v39 = vshrl.u32 %v563_v25, 7  ;;  %10419 = vst [vmem:[#allocation81_spill] sm:$0xff] %v8709_v15  ;;  %v8785_v13 = vld [vmem:[#allocation7 + $0x740] sm:$0xff]  ;;  %v8799_v22 = vld [vmem:[#allocation7 + $0x768] sm:$0xff] }
 0x124   :  { %2595 = vmatprep.subr.bf16.mxu1 %v6347_v7  ;;  %10437 = vst [vmem:[#allocation99_spill] sm:$0xff] %v8785_v13  ;;  %v8795_v19 = vld [vmem:[#allocation7 + $0x760] sm:$0xff] }
 0x125   :  { %2370 = vmatpush1.bf16.msra.mxu0 %v6344_v32  ;;  %10395 = vst [vmem:[#allocation57_spill] sm:$0xff] %v8572_v39  ;;  %v8575_v37 = vsub.s32 1, %v8572_v39  ;;  %v8578_v41 = vsub.s32 0, %v8572_v39  ;;  %v8586_v7 = vsub.s32 3, %v8572_v39  ;;  %v8589_v32 = vsub.s32 2, %v8572_v39  ;;  %10438 = vst [vmem:[#allocation100_spill] sm:$0xff] %v8795_v19 }
 0x126   :  { %2371 = vmatprep.subr.bf16.mxu0 %v6353_v16  ;;  %v8595_v16 = vld [vmem:[#allocation7 + $0x468] sm:$0xff] }
 0x127   :  { %2596 = vmatpush1.bf16.msra.mxu1 %v6346_v61  ;;  %10396 = vst [vmem:[#allocation58_spill] sm:$0xff] %v8575_v37  ;;  %10397 = vst [vmem:[#allocation59_spill] sm:$0xff] %v8578_v41  ;;  %v8597_v61 = vld [vmem:[#allocation7 + $0x480] sm:$0xff]  ;;  %v8610_v17 = vrot.slane %v561_v40, %v8578_v41  ;;  %v8613_v6 = vrot.slane %v647_v60, %v8578_v41  ;;  %v8631_v25 = vrot.slane %v647_v60, %v8586_v7 }
 0x128   :  { %2597 = vmatprep.subr.bf16.mxu1 %v6355_v30  ;;  %10398 = vst [vmem:[#allocation60_spill] sm:$0xff] %v8586_v7  ;;  %10399 = vst [vmem:[#allocation61_spill] sm:$0xff] %v8589_v32  ;;  %v8604_v30 = vrot.slane %v561_v40, %v8575_v37  ;;  %v8634_v2 = vrot.slane %v561_v40, %v8589_v32  ;;  %v8637_v36 = vrot.slane %v647_v60, %v8589_v32  ;;  %v8675_v41 = vld [vmem:[#allocation7 + $0x580] sm:$0xff]  ;;  %v8685_v32 = vld [vmem:[#allocation7 + $0x588] sm:$0xff] }
 0x129   :  { %2372 = vmatpush1.bf16.msra.mxu0 %v6352_v38  ;;  %v8607_v38 = vrot.slane %v647_v60, %v8575_v37  ;;  %10412 = vst [vmem:[#allocation74_spill] sm:$0xff] %v8675_v41  ;;  %v8689_v37 = vld [vmem:[#allocation7 + $0x5c0] sm:$0xff] }
 0x12a   :  { %2373 = vmatprep.subr.bf16.mxu0 %v6361_v14  ;;  %v8615_v14 = vld [vmem:[#allocation7 + $0x4a8] sm:$0xff]  ;;  %10415 = vst [vmem:[#allocation77_spill] sm:$0xff] %v8689_v37  ;;  %v8737_v41 = vld [vmem:[#allocation7 + $0x680] sm:$0xff] }
 0x12b   :  { %2598 = vmatpush1.bf16.msra.mxu1 %v6354_v11  ;;  %v8617_v11 = vld [vmem:[#allocation7 + $0x4c0] sm:$0xff]  ;;  %10427 = vst [vmem:[#allocation89_spill] sm:$0xff] %v8737_v41 }
 0x12c   :  { %2599 = vmatprep.subr.bf16.mxu1 %v6363_v20  ;;  %10400 = vst [vmem:[#allocation62_spill] sm:$0xff] %v8617_v11  ;;  %v8619_v20 = vld [vmem:[#allocation7 + $0x4e0] sm:$0xff] }
 0x12d   :  { %2374 = vmatpush1.bf16.msra.mxu0 %v6360_v56  ;;  %10401 = vst [vmem:[#allocation63_spill] sm:$0xff] %v8619_v20  ;;  %v8621_v56 = vld [vmem:[#allocation7 + $0x4c8] sm:$0xff] }
 0x12e   :  { %2456 = vmatprep.subr.bf16.mxu0 %v6369_v12  ;;  %10402 = vst [vmem:[#allocation64_spill] sm:$0xff] %v8621_v56  ;;  %v8623_v12 = vld [vmem:[#allocation7 + $0x4e8] sm:$0xff] }
 0x12f   :  { %2600 = vmatpush1.bf16.msra.mxu1 %v6362_v57  ;;  %10403 = vst [vmem:[#allocation65_spill] sm:$0xff] %v8623_v12  ;;  %v8625_v57 = vld [vmem:[#allocation7 + $0x500] sm:$0xff] }
 0x130   :  { %2682 = vmatprep.subr.bf16.mxu1 %v6371_v51  ;;  %10404 = vst [vmem:[#allocation66_spill] sm:$0xff] %v8625_v57  ;;  %v8628_v51 = vrot.slane %v561_v40, %v8586_v7  ;;  %v8649_v40 = vld [vmem:[#allocation7 + $0x508] sm:$0xff] }
 0x131   :  { %10406 = vst [vmem:[#allocation68_spill] sm:$0xff] %v8649_v40  ;;  %v8663_v7 = vld [vmem:[#allocation7 + $0x548] sm:$0xff] }
 0x132   :  { %10410 = vst [vmem:[#allocation72_spill] sm:$0xff] %v8663_v7  ;;  %v8703_v57 = vld [vmem:[#allocation7 + $0x5e8] sm:$0xff]  ;;  %v8727_v7 = vld [vmem:[#allocation7 + $0x660] sm:$0xff] }
 0x133   :  { %10418 = vst [vmem:[#allocation80_spill] sm:$0xff] %v8703_v57  ;;  %v8713_v40 = vld [vmem:[#allocation7 + $0x608] sm:$0xff]  ;;  %10424 = vst [vmem:[#allocation86_spill] sm:$0xff] %v8727_v7  ;;  %v8757_v57 = vld [vmem:[#allocation7 + $0x6c0] sm:$0xff] }
 0x134   :  { %10421 = vst [vmem:[#allocation83_spill] sm:$0xff] %v8713_v40  ;;  %10431 = vst [vmem:[#allocation93_spill] sm:$0xff] %v8757_v57  ;;  %v8775_v40 = vld [vmem:[#allocation7 + $0x720] sm:$0xff]  ;;  %v8781_v7 = vld [vmem:[#allocation7 + $0x708] sm:$0xff] }
 0x135   :  { %10434 = vst [vmem:[#allocation96_spill] sm:$0xff] %v8775_v40  ;;  %10435 = vst [vmem:[#allocation97_spill] sm:$0xff] %v8781_v7  ;;  %v8813_v57 = vld [vmem:[#allocation7 + $0x780] sm:$0xff]  ;;  %v8827_v7 = vld [vmem:[#allocation7 + $0x7a8] sm:$0xff] }
 0x136   :  { %10440 = vst [vmem:[#allocation102_spill] sm:$0xff] %v8827_v7 }
 0x17a   :  { %v373_v39 = vpop.xlane.xlu0 %372 }
 0x17b   :  { %v449_v60 = vmul.f32 0.001953125, %v373_v39  ;;  %v8699_v39 = vld [vmem:[#allocation7 + $0x5e0] sm:$0xff] }
 0x17c   :  { %10416 = vst [vmem:[#allocation78_spill] sm:$0xff] %v8699_v39  ;;  %v8751_v39 = vld [vmem:[#allocation7 + $0x6a8] sm:$0xff] }
 0x17d   :  { %v465_v35 = vadd.f32 1e-05, %v449_v60  ;;  %v8723_v60 = vld [vmem:[#allocation7 + $0x628] sm:$0xff]  ;;  %10430 = vst [vmem:[#allocation92_spill] sm:$0xff] %v8751_v39 }
 0x17e   :  { %v383_v20 = vpop.xlane.xlu0 %382  ;;  %10422 = vst [vmem:[#allocation84_spill] sm:$0xff] %v8723_v60  ;;  %v8773_v60 = vld [vmem:[#allocation7 + $0x700] sm:$0xff] }
 0x17f   :  { %7657 = vrsqrt.f32 %v465_v35  ;;  %v451_v12 = vmul.f32 0.001953125, %v383_v20  ;;  %v8735_v20 = vld [vmem:[#allocation7 + $0x668] sm:$0xff]  ;;  %10433 = vst [vmem:[#allocation95_spill] sm:$0xff] %v8773_v60 }
 0x180   :  { %v378_v27 = vpop.xlane.xlu1 %377  ;;  %10426 = vst [vmem:[#allocation88_spill] sm:$0xff] %v8735_v20  ;;  %v8749_v35 = vld [vmem:[#allocation7 + $0x688] sm:$0xff] }
 0x181   :  { %v450_v50 = vmul.f32 0.001953125, %v378_v27  ;;  %v467_v56 = vadd.f32 1e-05, %v451_v12  ;;  %10429 = vst [vmem:[#allocation91_spill] sm:$0xff] %v8749_v35  ;;  %v8759_v27 = vld [vmem:[#allocation7 + $0x6e0] sm:$0xff] }
 0x182   :  { %10432 = vst [vmem:[#allocation94_spill] sm:$0xff] %v8759_v27  ;;  %v8815_v35 = vld [vmem:[#allocation7 + $0x7a0] sm:$0xff] }
 0x183   :  { %v466_v37 = vadd.f32 1e-05, %v450_v50  ;;  %7659 = vrsqrt.f32 %v467_v56  ;;  %v8783_v56 = vld [vmem:[#allocation7 + $0x728] sm:$0xff]  ;;  %10439 = vst [vmem:[#allocation101_spill] sm:$0xff] %v8815_v35 }
 0x184   :  { %v388_v12 = vpop.xlane.xlu1 %387  ;;  %10436 = vst [vmem:[#allocation98_spill] sm:$0xff] %v8783_v56  ;;  %v8797_v50 = vld [vmem:[#allocation7 + $0x748] sm:$0xff] }
 0x185   :  { %7661 = vrsqrt.f32 %v466_v37  ;;  %v452_v15 = vmul.f32 0.001953125, %v388_v12  ;;  %v8825_v56 = vld [vmem:[#allocation7 + $0x788] sm:$0xff] }
 0x187   :  { %v468_v41 = vadd.f32 1e-05, %v452_v15 }
 0x188   :  { %v393_v3 = vpop.xlane.xlu0 %392 }
 0x189   :  { %v453_v39 = vmul.f32 0.001953125, %v393_v3  ;;  %v7658_v11 = vpop.eup %7657  ;;  %7663 = vrsqrt.f32 %v468_v41 }
 0x18a   :  { %v498_v40 = vmul.f32 %v7658_v11, %v8221_v45  ;;  %v497_v15 = vmul.f32 %v7658_v11, %v8218_v44  ;;  %v500_v41 = vmul.f32 %v7658_v11, %v8227_v47 }
 0x18b   :  { %v469_v12 = vadd.f32 1e-05, %v453_v39  ;;  %v398_v27 = vpop.xlane.xlu1 %397  ;;  %v499_v39 = vmul.f32 %v7658_v11, %v8224_v46 }
 0x18c   :  { %v454_v60 = vmul.f32 0.001953125, %v398_v27  ;;  %v584_v45 = vmul.f32 %v8604_v30, %v498_v40  ;;  %v583_v44 = vmul.f32 %v8610_v17, %v497_v15  ;;  %v586_v37 = vmul.f32 %v8628_v51, %v500_v41 }
 0x18d   :  { %7665 = vrsqrt.f32 %v469_v12  ;;  %v8838_v19 = vpop.eup %7659  ;;  %v585_v3 = vmul.f32 %v8634_v2, %v499_v39 }
 0x18e   :  { %v470_v13 = vadd.f32 1e-05, %v454_v60  ;;  %v670_v46 = vadd.f32 %v8607_v38, %v584_v45  ;;  %v506_v11 = vmul.f32 %v8838_v19, %v8233_v49  ;;  %v505_v40 = vmul.f32 %v8838_v19, %v8230_v48 }
 0x18f   :  { %v403_v20 = vpop.xlane.xlu0 %402  ;;  %v7662_v12 = vpop.eup %7661  ;;  %v669_v41 = vadd.f32 %v8613_v6, %v583_v44  ;;  %v8854_v27 = vadd.f32 %v8637_v36, %v585_v3  ;;  %v672_v47 = vadd.f32 %v8631_v25, %v586_v37 }
 0x190   :  { %7667 = vrsqrt.f32 %v470_v13  ;;  %v455_v15 = vmul.f32 0.001953125, %v403_v20  ;;  %v502_v39 = vmul.f32 %v7662_v12, %v8257_v55  ;;  %v501_v45 = vmul.f32 %v7662_v12, %v8254_v54 }
 0x191   :  { %v592_v49 = vmul.f32 %v8604_v30, %v506_v11  ;;  %v591_v35 = vmul.f32 %v8610_v17, %v505_v40  ;;  %v504_v60 = vmul.f32 %v7662_v12, %v8272_v10  ;;  %v503_v13 = vmul.f32 %v7662_v12, %v8269_v8 }
 0x192   :  { %v471_v48 = vadd.f32 1e-05, %v455_v15  ;;  %v588_v44 = vmul.f32 %v8604_v30, %v502_v39  ;;  %v587_v3 = vmul.f32 %v8610_v17, %v501_v45  ;;  %v8868_v54 = vmul.f32 %v8838_v19, %v8239_v0 }
 0x193   :  { %v678_v55 = vadd.f32 %v8607_v38, %v592_v49  ;;  %v8870_v11 = vpop.eup %7663  ;;  %v590_v40 = vmul.f32 %v8628_v51, %v504_v60  ;;  %v589_v10 = vmul.f32 %v8634_v2, %v503_v13  ;;  %v677_v49 = vadd.f32 %v8613_v6, %v591_v35 }
 0x194   :  { %v408_v20 = vpop.xlane.xlu1 %407  ;;  %7669 = vrsqrt.f32 %v471_v48  ;;  %v674_v8 = vadd.f32 %v8607_v38, %v588_v44  ;;  %v673_v12 = vadd.f32 %v8613_v6, %v587_v3  ;;  %v510_v15 = vmul.f32 %v8870_v11, %v8265_v59 }
 0x195   :  { %v456_v37 = vmul.f32 0.001953125, %v408_v20  ;;  %v509_v39 = vmul.f32 %v8870_v11, %v8262_v58  ;;  %v676_v48 = vadd.f32 %v8631_v25, %v590_v40  ;;  %v675_v60 = vadd.f32 %v8637_v36, %v589_v10 }
 0x196   :  { %v8885_v44 = vpack.c.bf16 %v674_v8, %v670_v46  ;;  %v8887_v3 = vpack.c.bf16 %v673_v12, %v669_v41  ;;  %v596_v59 = vmul.f32 %v8604_v30, %v510_v15 }
 0x197   :  { %v472_v0 = vadd.f32 1e-05, %v456_v37  ;;  %v413_v45 = vpop.xlane.xlu0 %412  ;;  %v8883_v20 = vpop.eup %7665  ;;  %v595_v58 = vmul.f32 %v8610_v17, %v509_v39  ;;  %v8898_v41 = vpack.c.bf16 %v676_v48, %v672_v47  ;;  %v10441_v39 = vcombine.low %v8556_v34, %v8558_v31 }
 0x198   :  { %v457_v13 = vmul.f32 0.001953125, %v413_v45  ;;  %v514_v35 = vmul.f32 %v8883_v20, %v8282_v21  ;;  %v513_v37 = vmul.f32 %v8883_v20, %v8280_v18  ;;  %2375 = vmatprep.mubr.bf16.mxu0 %v8885_v44  ;;  %2601 = vmatprep.mubr.bf16.mxu1 %v8885_v44  ;;  %v682_v46 = vadd.f32 %v8607_v38, %v596_v59 }
 0x199   :  { %7671 = vrsqrt.f32 %v472_v0  ;;  %v418_v7 = vpop.xlane.xlu1 %417  ;;  %2376 = vmatmul.mubr.bf16.vlgmr.msra.gmra.mrb[0].mxu0 %v8887_v3  ;;  %2602 = vmatmul.mubr.bf16.vlgmr.msra.gmra.mrb[0].mxu1 %v8887_v3  ;;  %v681_v21 = vadd.f32 %v8613_v6, %v595_v58  ;;  %v10442_v47 = vcombine.low %v8560_v33, %v8562_v5  ;;  %v10444_v59 = vcombine.high %v8593_v52, %v8595_v16 }
 0x19a   :  { %v473_v40 = vadd.f32 1e-05, %v457_v13  ;;  %v458_v10 = vmul.f32 0.001953125, %v418_v7  ;;  %v8900_v8 = vpop.eup %7667  ;;  %v600_v18 = vmul.f32 %v8604_v30, %v514_v35  ;;  %v599_v7 = vmul.f32 %v8610_v17, %v513_v37  ;;  %2457 = vmatpush1.bf16.msra.mxu0 %v10441_v39 }
 0x19b   :  { %2683 = vmatpush1.bf16.msra.mxu1 %v10442_v47  ;;  %v8913_v0 = vpack.c.bf16 %v682_v46, %v678_v55  ;;  %v518_v45 = vmul.f32 %v8900_v8, %v8292_v24  ;;  %v10443_v13 = vcombine.high %v8583_v42, %v8591_v63  ;;  %v8923_v34 = vpack.c.bf16 %v681_v21, %v677_v49 }
 0x19c   :  { %7673 = vrsqrt.f32 %v473_v40  ;;  %v474_v12 = vadd.f32 1e-05, %v458_v10  ;;  %v423_v15 = vpop.xlane.xlu0 %422  ;;  %2684 = vmatprep.subr.bf16.mxu1 %v10444_v59  ;;  %v517_v31 = vmul.f32 %v8900_v8, %v8288_v23  ;;  %v512_v33 = vmul.f32 %v8870_v11, %v8300_v29 }
 0x19d   :  { %v459_v48 = vmul.f32 0.001953125, %v423_v15  ;;  %2458 = vmatprep.subr.bf16.mxu0 %v10443_v13  ;;  %2385 = vmatprep.mubr.bf16.mxu0 %v8913_v0  ;;  %v604_v24 = vmul.f32 %v8604_v30, %v518_v45  ;;  %v686_v55 = vadd.f32 %v8607_v38, %v600_v18  ;;  %v8934_v58 = vpack.c.bf16 %v675_v60, %v8854_v27 }
 0x19e   :  { %7675 = vrsqrt.f32 %v474_v12  ;;  %v428_v5 = vpop.xlane.xlu1 %427  ;;  %2611 = vmatprep.mubr.bf16.mxu1 %v8913_v0  ;;  %v8936_v49 = vpop.eup %7669  ;;  %v603_v37 = vmul.f32 %v8610_v17, %v517_v31  ;;  %v685_v29 = vadd.f32 %v8613_v6, %v599_v7  ;;  %v10445_v10 = vcombine.low %v8583_v42, %v8591_v63 }
 0x19f   :  { %v475_v35 = vadd.f32 1e-05, %v459_v48  ;;  %v460_v23 = vmul.f32 0.001953125, %v428_v5  ;;  %v10446_v46 = vcombine.low %v8593_v52, %v8595_v16  ;;  %v690_v27 = vadd.f32 %v8607_v38, %v604_v24 }
 0x1a0   :  { %2459 = vmatpush1.bf16.msra.mxu0 %v10445_v10  ;;  %v522_v60 = vmul.f32 %v8936_v49, %v8314_v1  ;;  %v521_v21 = vmul.f32 %v8936_v49, %v8311_v43  ;;  %v10447_v12 = vcombine.high %v8597_v61, %v8599_v28  ;;  %v10448_v42 = vcombine.high %v8601_v26, %v8615_v14 }
 0x1a1   :  { %v433_v40 = vpop.xlane.xlu0 %432  ;;  %2685 = vmatpush1.bf16.msra.mxu1 %v10446_v46  ;;  %7677 = vrsqrt.f32 %v475_v35  ;;  %v476_v18 = vadd.f32 1e-05, %v460_v23  ;;  %v689_v63 = vadd.f32 %v8613_v6, %v603_v37  ;;  %v8958_v16 = vpack.c.bf16 %v690_v27, %v686_v55  ;;  %2386 = vmatmul.mubr.bf16.gmra.mrb[4].mxu0 %v8923_v34  ;;  %v10452_v23 = vld [vmem:[#allocation63_spill] sm:$0xff]  ;;  %v10457_v27 = vld [vmem:[#allocation20_spill] sm:$0xff] }
 0x1a2   :  { %v461_v7 = vmul.f32 0.001953125, %v433_v40  ;;  %2460 = vmatprep.subr.bf16.mxu0 %v10447_v12  ;;  %2686 = vmatprep.subr.bf16.mxu1 %v10448_v42  ;;  %v608_v1 = vmul.f32 %v8604_v30, %v522_v60  ;;  %v607_v43 = vmul.f32 %v8610_v17, %v521_v21  ;;  %v594_v15 = vmul.f32 %v8628_v51, %v8868_v54  ;;  %v10458_v21 = vld [vmem:[#allocation19_spill] sm:$0xff] }
 0x1a3   :  { %v438_v52 = vpop.xlane.xlu1 %437  ;;  %v8964_v39 = vpop.eup %7671  ;;  %7679 = vrsqrt.f32 %v476_v18  ;;  %2612 = vmatmul.mubr.bf16.gmra.mrb[4].mxu1 %v8923_v34  ;;  %v598_v48 = vmul.f32 %v8628_v51, %v512_v33  ;;  %v10449_v13 = vcombine.low %v8597_v61, %v8599_v28  ;;  %2395 = vmatprep.mubr.bf16.mxu0 %v8958_v16  ;;  %v8973_v59 = vpack.c.bf16 %v689_v63, %v685_v29  ;;  %v10455_v29 = vld [vmem:[#allocation65_spill] sm:$0xff] }
 0x1a4   :  { %v477_v47 = vadd.f32 1e-05, %v461_v7  ;;  %v462_v45 = vmul.f32 0.001953125, %v438_v52  ;;  %v526_v54 = vmul.f32 %v8964_v39, %v8322_v53  ;;  %v525_v31 = vmul.f32 %v8964_v39, %v8319_v4  ;;  %2621 = vmatprep.mubr.bf16.mxu1 %v8958_v16  ;;  %v10451_v53 = vld [vmem:[#allocation62_spill] sm:$0xff]  ;;  %v10454_v4 = vld [vmem:[#allocation64_spill] sm:$0xff] }
 0x1a5   :  { %2461 = vmatpush1.bf16.msra.mxu0 %v10449_v13  ;;  %v10450_v33 = vcombine.low %v8601_v26, %v8615_v14  ;;  %v694_v61 = vadd.f32 %v8607_v38, %v608_v1  ;;  %v693_v28 = vadd.f32 %v8613_v6, %v607_v43  ;;  %v10453_v37 = vcombine.high %v10451_v53, %v10452_v23  ;;  %v10460_v43 = vld [vmem:[#allocation15_spill] sm:$0xff] }
 0x1a6   :  { %7681 = vrsqrt.f32 %v477_v47  ;;  %v478_v5 = vadd.f32 1e-05, %v462_v45  ;;  %v443_v24 = vpop.xlane.xlu0 %442  ;;  %v8985_v55 = vpop.eup %7673  ;;  %v10456_v40 = vcombine.high %v10454_v4, %v10455_v29  ;;  %v612_v10 = vmul.f32 %v8604_v30, %v526_v54  ;;  %v10462_v45 = vld [vmem:[#allocation66_spill] sm:$0xff]  ;;  %v10463_v13 = vld [vmem:[#allocation67_spill] sm:$0xff] }
 0x1a7   :  { %2687 = vmatpush1.bf16.msra.mxu1 %v10450_v33  ;;  %v463_v35 = vmul.f32 0.001953125, %v443_v24  ;;  %2462 = vmatprep.subr.bf16.mxu0 %v10453_v37  ;;  %v611_v26 = vmul.f32 %v8610_v17, %v525_v31  ;;  %v680_v14 = vadd.f32 %v8631_v25, %v594_v15  ;;  %v530_v60 = vmul.f32 %v8985_v55, %v10457_v27  ;;  %v10465_v54 = vld [vmem:[#allocation23_spill] sm:$0xff]  ;;  %v10466_v24 = vld [vmem:[#allocation22_spill] sm:$0xff] }
 0x1a8   :  { %2688 = vmatprep.subr.bf16.mxu1 %v10456_v40  ;;  %7683 = vrsqrt.f32 %v478_v5  ;;  %v448_v46 = vpop.xlane.xlu1 %447  ;;  %v529_v18 = vmul.f32 %v8985_v55, %v10458_v21  ;;  %v684_v7 = vadd.f32 %v8631_v25, %v598_v48  ;;  %v9001_v12 = vpop.eup %7675  ;;  %v10459_v52 = vcombine.low %v10451_v53, %v10452_v23  ;;  %v10467_v53 = vld [vmem:[#allocation68_spill] sm:$0xff]  ;;  %v10472_v21 = vld [vmem:[#allocation26_spill] sm:$0xff] }
 0x1a9   :  { %v479_v42 = vadd.f32 1e-05, %v463_v35  ;;  %v464_v63 = vmul.f32 0.001953125, %v448_v46  ;;  %v698_v1 = vadd.f32 %v8607_v38, %v612_v10  ;;  %v507_v15 = vmul.f32 %v8838_v19, %v10460_v43  ;;  %v10468_v19 = vld [vmem:[#allocation69_spill] sm:$0xff]  ;;  %2396 = vmatmul.mubr.bf16.gmra.mrb[8].mxu0 %v8973_v59 }
 0x1aa   :  { %2463 = vmatpush1.bf16.msra.mxu0 %v10459_v52  ;;  %v10461_v47 = vcombine.low %v10454_v4, %v10455_v29  ;;  %v10464_v48 = vcombine.high %v10462_v45, %v10463_v13  ;;  %v534_v31 = vmul.f32 %v9001_v12, %v10465_v54  ;;  %v616_v5 = vmul.f32 %v8604_v30, %v530_v60  ;;  %v10478_v54 = vld [vmem:[#allocation73_spill] sm:$0xff] }
 0x1ab   :  { %v533_v33 = vmul.f32 %v9001_v12, %v10466_v24  ;;  %7685 = vrsqrt.f32 %v479_v42  ;;  %v480_v35 = vadd.f32 1e-05, %v464_v63  ;;  %v10469_v23 = vcombine.high %v10467_v53, %v10468_v19  ;;  %v9026_v29 = vpop.eup %7677  ;;  %2622 = vmatmul.mubr.bf16.gmra.mrb[8].mxu1 %v8973_v59  ;;  %v10480_v24 = vld [vmem:[#allocation29_spill] sm:$0xff] }
 0x1ac   :  { %2689 = vmatpush1.bf16.msra.mxu1 %v10461_v47  ;;  %2464 = vmatprep.subr.bf16.mxu0 %v10464_v48  ;;  %v9023_v37 = vpack.c.bf16 %v698_v1, %v694_v61  ;;  %v697_v4 = vadd.f32 %v8613_v6, %v611_v26  ;;  %v620_v40 = vmul.f32 %v8604_v30, %v534_v31  ;;  %v10471_v26 = vld [vmem:[#allocation27_spill] sm:$0xff]  ;;  %v10474_v47 = vld [vmem:[#allocation70_spill] sm:$0xff]  ;;  %v10477_v48 = vld [vmem:[#allocation72_spill] sm:$0xff] }
 0x1ad   :  { %2690 = vmatprep.subr.bf16.mxu1 %v10469_v23  ;;  %v702_v10 = vadd.f32 %v8607_v38, %v616_v5  ;;  %v615_v46 = vmul.f32 %v8610_v17, %v529_v18  ;;  %7687 = vrsqrt.f32 %v480_v35  ;;  %v10470_v27 = vcombine.low %v10462_v45, %v10463_v13  ;;  %v9042_v63 = vpop.eup %7679  ;;  %v10475_v45 = vld [vmem:[#allocation71_spill] sm:$0xff] }
 0x1ae   :  { %2405 = vmatprep.mubr.bf16.mxu0 %v9023_v37  ;;  %v619_v61 = vmul.f32 %v8610_v17, %v533_v33  ;;  %v538_v60 = vmul.f32 %v9026_v29, %v10471_v26  ;;  %v537_v42 = vmul.f32 %v9026_v29, %v10472_v21  ;;  %2631 = vmatprep.mubr.bf16.mxu1 %v9023_v37  ;;  %v10484_v26 = vld [vmem:[#allocation33_spill] sm:$0xff] }
 0x1af   :  { %2465 = vmatpush1.bf16.msra.mxu0 %v10470_v27  ;;  %v10473_v18 = vcombine.low %v10467_v53, %v10468_v19  ;;  %v706_v52 = vadd.f32 %v8607_v38, %v620_v40  ;;  %v701_v1 = vadd.f32 %v8613_v6, %v615_v46  ;;  %v9050_v43 = vpack.c.bf16 %v684_v7, %v680_v14  ;;  %v10482_v7 = vld [vmem:[#allocation28_spill] sm:$0xff] }
 0x1b0   :  { %v10476_v13 = vcombine.high %v10474_v47, %v10475_v45  ;;  %v10479_v31 = vcombine.high %v10477_v48, %v10478_v54  ;;  %v705_v5 = vadd.f32 %v8613_v6, %v619_v61  ;;  %v542_v33 = vmul.f32 %v9042_v63, %v10480_v24  ;;  %v9062_v53 = vpop.eup %7681  ;;  %v10493_v24 = vld [vmem:[#allocation35_spill] sm:$0xff] }
 0x1b1   :  { %2691 = vmatpush1.bf16.msra.mxu1 %v10473_v18  ;;  %v624_v35 = vmul.f32 %v8604_v30, %v538_v60  ;;  %v9064_v19 = vpack.c.bf16 %v697_v4, %v693_v28  ;;  %v9066_v14 = vpack.c.bf16 %v706_v52, %v702_v10  ;;  %v541_v23 = vmul.f32 %v9042_v63, %v10482_v7  ;;  %v10485_v28 = vld [vmem:[#allocation16_spill] sm:$0xff]  ;;  %v10488_v18 = vld [vmem:[#allocation75_spill] sm:$0xff] }
 0x1b2   :  { %2466 = vmatprep.subr.bf16.mxu0 %v10476_v13  ;;  %2692 = vmatprep.subr.bf16.mxu1 %v10479_v31  ;;  %v623_v40 = vmul.f32 %v8610_v17, %v537_v42  ;;  %v10483_v46 = vcombine.low %v10474_v47, %v10475_v45  ;;  %v9074_v27 = vpack.c.bf16 %v705_v5, %v701_v1  ;;  %v9081_v10 = vpop.eup %7683  ;;  %v10487_v42 = vld [vmem:[#allocation74_spill] sm:$0xff]  ;;  %v10490_v45 = vld [vmem:[#allocation32_spill] sm:$0xff] }
 0x1b3   :  { %10481 = vst [vmem:[#allocation62_spill] sm:$0xff] %v9066_v14  ;;  %v628_v61 = vmul.f32 %v8604_v30, %v542_v33  ;;  %v546_v60 = vmul.f32 %v9062_v53, %v10484_v26  ;;  %v511_v4 = vmul.f32 %v8870_v11, %v10485_v28  ;;  %v10486_v21 = vcombine.low %v10477_v48, %v10478_v54  ;;  %v10491_v31 = vld [vmem:[#allocation76_spill] sm:$0xff]  ;;  %v10494_v33 = vld [vmem:[#allocation34_spill] sm:$0xff] }
 0x1b4   :  { %2467 = vmatpush1.bf16.msra.mxu0 %v10483_v46  ;;  %v10489_v52 = vcombine.high %v10487_v42, %v10488_v18  ;;  %v710_v1 = vadd.f32 %v8607_v38, %v624_v35  ;;  %v627_v47 = vmul.f32 %v8610_v17, %v541_v23  ;;  %v545_v13 = vmul.f32 %v9062_v53, %v10490_v45 }
 0x1b5   :  { %2693 = vmatpush1.bf16.msra.mxu1 %v10486_v21  ;;  %v10492_v11 = vcombine.high %v8685_v32, %v10491_v31  ;;  %v714_v5 = vadd.f32 %v8607_v38, %v628_v61  ;;  %v550_v48 = vmul.f32 %v9081_v10, %v10493_v24  ;;  %v632_v54 = vmul.f32 %v8604_v30, %v546_v60  ;;  %v9107_v26 = vpop.eup %7685 }
 0x1b6   :  { %2468 = vmatprep.subr.bf16.mxu0 %v10489_v52  ;;  %v549_v7 = vmul.f32 %v9081_v10, %v10494_v33  ;;  %2406 = vmatmul.mubr.bf16.gmra.mrb[12].mxu0 %v9064_v19  ;;  %v709_v35 = vadd.f32 %v8613_v6, %v623_v40  ;;  %v713_v23 = vadd.f32 %v8613_v6, %v627_v47  ;;  %v10498_v47 = vld [vmem:[#allocation78_spill] sm:$0xff] }
 0x1b7   :  { %2694 = vmatprep.subr.bf16.mxu1 %v10492_v11  ;;  %2632 = vmatmul.mubr.bf16.gmra.mrb[12].mxu1 %v9064_v19  ;;  %v593_v46 = vmul.f32 %v8634_v2, %v507_v15  ;;  %v10495_v61 = vcombine.low %v10487_v42, %v10488_v18  ;;  %v9113_v60 = vpack.c.bf16 %v714_v5, %v710_v1  ;;  %v9125_v18 = vpop.eup %7687  ;;  %v10497_v1 = vld [vmem:[#allocation77_spill] sm:$0xff]  ;;  %v10500_v11 = vld [vmem:[#allocation79_spill] sm:$0xff] }
 0x1b8   :  { %2415 = vmatprep.mubr.bf16.mxu0 %v9066_v14  ;;  %v636_v28 = vmul.f32 %v8604_v30, %v550_v48  ;;  %v631_v21 = vmul.f32 %v8610_v17, %v545_v13  ;;  %2641 = vmatprep.mubr.bf16.mxu1 %v9066_v14  ;;  %v10496_v40 = vcombine.low %v8685_v32, %v10491_v31  ;;  %v10501_v13 = vld [vmem:[#allocation80_spill] sm:$0xff]  ;;  %v10504_v48 = vld [vmem:[#allocation39_spill] sm:$0xff] }
 0x1b9   :  { %2469 = vmatpush1.bf16.msra.mxu0 %v10495_v61  ;;  %v9121_v15 = vpack.c.bf16 %v713_v23, %v709_v35  ;;  %v718_v52 = vadd.f32 %v8607_v38, %v632_v54  ;;  %v635_v42 = vmul.f32 %v8610_v17, %v549_v7  ;;  %v10499_v45 = vcombine.high %v10497_v1, %v10498_v47  ;;  %v10503_v32 = vld [vmem:[#allocation40_spill] sm:$0xff]  ;;  %v10506_v23 = vld [vmem:[#allocation43_spill] sm:$0xff] }
 0x1ba   :  { %2695 = vmatpush1.bf16.msra.mxu1 %v10496_v40  ;;  %v10502_v5 = vcombine.high %v10500_v11, %v10501_v13  ;;  %v722_v24 = vadd.f32 %v8607_v38, %v636_v28  ;;  %v554_v31 = vmul.f32 %v9107_v26, %v10503_v32  ;;  %v553_v54 = vmul.f32 %v9107_v26, %v10504_v48  ;;  %v10505_v7 = vld [vmem:[#allocation44_spill] sm:$0xff] }
 0x1bb   :  { %2470 = vmatprep.subr.bf16.mxu0 %v10499_v45  ;;  %v721_v33 = vadd.f32 %v8613_v6, %v635_v42  ;;  %v558_v35 = vmul.f32 %v9125_v18, %v10505_v7  ;;  %v557_v61 = vmul.f32 %v9125_v18, %v10506_v23  ;;  %v597_v40 = vmul.f32 %v8634_v2, %v511_v4  ;;  %v10509_v7 = vld [vmem:[#allocation81_spill] sm:$0xff]  ;;  %v10510_v23 = vld [vmem:[#allocation82_spill] sm:$0xff] }
 0x1bc   :  { %2696 = vmatprep.subr.bf16.mxu1 %v10502_v5  ;;  %v10507_v45 = vcombine.low %v10497_v1, %v10498_v47  ;;  %v717_v28 = vadd.f32 %v8613_v6, %v631_v21  ;;  %v640_v5 = vmul.f32 %v8604_v30, %v554_v31  ;;  %v639_v32 = vmul.f32 %v8610_v17, %v553_v54  ;;  %v10512_v47 = vld [vmem:[#allocation83_spill] sm:$0xff]  ;;  %v10513_v31 = vld [vmem:[#allocation84_spill] sm:$0xff] }
 0x1bd   :  { %v679_v42 = vadd.f32 %v8637_v36, %v593_v46  ;;  %v10508_v48 = vcombine.low %v10500_v11, %v10501_v13  ;;  %v10511_v14 = vcombine.high %v10509_v7, %v10510_v23  ;;  %v9157_v4 = vpack.c.bf16 %v722_v24, %v718_v52  ;;  %v10515_v13 = vld [vmem:[#allocation18_spill] sm:$0xff] }
 0x1be   :  { %2471 = vmatpush1.bf16.msra.mxu0 %v10507_v45  ;;  %v644_v1 = vmul.f32 %v8604_v30, %v558_v35  ;;  %v643_v21 = vmul.f32 %v8610_v17, %v557_v61  ;;  %v10514_v45 = vcombine.high %v10512_v47, %v10513_v31  ;;  %v9164_v54 = vpack.c.bf16 %v721_v33, %v717_v28  ;;  %v10518_v61 = vld [vmem:[#allocation17_spill] sm:$0xff] }
 0x1bf   :  { %2697 = vmatpush1.bf16.msra.mxu1 %v10508_v48  ;;  %2472 = vmatprep.subr.bf16.mxu0 %v10511_v14  ;;  %v726_v46 = vadd.f32 %v8607_v38, %v640_v5  ;;  %v683_v11 = vadd.f32 %v8637_v36, %v597_v40  ;;  %v516_v48 = vmul.f32 %v8883_v20, %v10515_v13  ;;  %v10516_v14 = vld [vmem:[#allocation24_spill] sm:$0xff]  ;;  %v10526_v13 = vld [vmem:[#allocation21_spill] sm:$0xff] }
 0x1c0   :  { %2698 = vmatprep.subr.bf16.mxu1 %v10514_v45  ;;  %2416 = vmatmul.mubr.bf16.gmra.mrb[16].mxu0 %v9074_v27  ;;  %v730_v30 = vadd.f32 %v8607_v38, %v644_v1  ;;  %v9174_v17 = vadd.f32 %v8613_v6, %v639_v32  ;;  %v520_v52 = vmul.f32 %v8900_v8, %v10516_v14  ;;  %v10523_v1 = vld [vmem:[#allocation87_spill] sm:$0xff]  ;;  %v10524_v45 = vld [vmem:[#allocation88_spill] sm:$0xff]  ;;  %v10529_v14 = vld [vmem:[#allocation25_spill] sm:$0xff] }
 0x1c1   :  { %2642 = vmatmul.mubr.bf16.gmra.mrb[16].mxu1 %v9074_v27  ;;  %v10517_v24 = vcombine.low %v10509_v7, %v10510_v23  ;;  %2425 = vmatprep.mubr.bf16.mxu0 %v9113_v60  ;;  %v9182_v33 = vpack.c.bf16 %v683_v11, %v679_v42  ;;  %v602_v35 = vmul.f32 %v8628_v51, %v516_v48  ;;  %v10520_v42 = vld [vmem:[#allocation85_spill] sm:$0xff]  ;;  %v10521_v7 = vld [vmem:[#allocation86_spill] sm:$0xff]  ;;  %v10528_v48 = vld [vmem:[#allocation36_spill] sm:$0xff] }
 0x1c2   :  { %v515_v40 = vmul.f32 %v8883_v20, %v10518_v61  ;;  %2651 = vmatprep.mubr.bf16.mxu1 %v9113_v60  ;;  %v10519_v38 = vcombine.low %v10512_v47, %v10513_v31  ;;  %v9191_v28 = vpack.c.bf16 %v730_v30, %v726_v46  ;;  %v9194_v5 = vadd.f32 %v8613_v6, %v643_v21  ;;  %v10527_v21 = vld [vmem:[#allocation30_spill] sm:$0xff]  ;;  %v10531_v61 = vld [vmem:[#allocation31_spill] sm:$0xff] }
 0x1c3   :  { %2473 = vmatpush1.bf16.msra.mxu0 %v10517_v24  ;;  %v606_v32 = vmul.f32 %v8628_v51, %v520_v52  ;;  %v10522_v23 = vcombine.high %v10520_v42, %v10521_v7  ;;  %v10525_v20 = vcombine.high %v10523_v1, %v10524_v45  ;;  %v688_v11 = vadd.f32 %v8631_v25, %v602_v35 }
 0x1c4   :  { %2699 = vmatpush1.bf16.msra.mxu1 %v10519_v38  ;;  %v519_v47 = vmul.f32 %v8900_v8, %v10526_v13  ;;  %v601_v31 = vmul.f32 %v8634_v2, %v515_v40  ;;  %v524_v46 = vmul.f32 %v8936_v49, %v10527_v21  ;;  %v528_v30 = vmul.f32 %v8964_v39, %v10528_v48  ;;  %v10532_v38 = vld [vmem:[#allocation38_spill] sm:$0xff]  ;;  %v10538_v21 = vld [vmem:[#allocation92_spill] sm:$0xff] }
 0x1c5   :  { %2474 = vmatprep.subr.bf16.mxu0 %v10522_v23  ;;  %2700 = vmatprep.subr.bf16.mxu1 %v10525_v20  ;;  %v692_v6 = vadd.f32 %v8631_v25, %v606_v32  ;;  %v523_v52 = vmul.f32 %v8936_v49, %v10529_v14  ;;  %v10530_v24 = vcombine.low %v10520_v42, %v10521_v7  ;;  %v10534_v20 = vld [vmem:[#allocation89_spill] sm:$0xff]  ;;  %v10535_v49 = vld [vmem:[#allocation90_spill] sm:$0xff] }
 0x1c6   :  { %v605_v35 = vmul.f32 %v8634_v2, %v519_v47  ;;  %v687_v8 = vadd.f32 %v8637_v36, %v601_v31  ;;  %v527_v40 = vmul.f32 %v8964_v39, %v10531_v61  ;;  %v532_v32 = vmul.f32 %v8985_v55, %v10532_v38  ;;  %v10537_v31 = vld [vmem:[#allocation91_spill] sm:$0xff] }
 0x1c7   :  { %2475 = vmatpush1.bf16.msra.mxu0 %v10530_v24  ;;  %v10533_v23 = vcombine.low %v10523_v1, %v10524_v45  ;;  %v10536_v13 = vcombine.high %v10534_v20, %v10535_v49  ;;  %v9229_v42 = vpack.c.bf16 %v692_v6, %v688_v11  ;;  %v610_v7 = vmul.f32 %v8628_v51, %v524_v46  ;;  %v10540_v45 = vld [vmem:[#allocation42_spill] sm:$0xff] }
 0x1c8   :  { %v614_v47 = vmul.f32 %v8628_v51, %v528_v30  ;;  %v10539_v39 = vcombine.high %v10537_v31, %v10538_v21  ;;  %v691_v48 = vadd.f32 %v8637_v36, %v605_v35  ;;  %v609_v14 = vmul.f32 %v8634_v2, %v523_v52  ;;  %2426 = vmatmul.mubr.bf16.gmra.mrb[20].mxu0 %v9121_v15 }
 0x1c9   :  { %2701 = vmatpush1.bf16.msra.mxu1 %v10533_v23  ;;  %2476 = vmatprep.subr.bf16.mxu0 %v10536_v13  ;;  %v613_v1 = vmul.f32 %v8634_v2, %v527_v40  ;;  %v536_v24 = vmul.f32 %v9001_v12, %v10540_v45  ;;  %v696_v11 = vadd.f32 %v8631_v25, %v610_v7  ;;  %v10550_v45 = vld [vmem:[#allocation48_spill] sm:$0xff] }
 0x1ca   :  { %2702 = vmatprep.subr.bf16.mxu1 %v10539_v39  ;;  %2652 = vmatmul.mubr.bf16.gmra.mrb[20].mxu1 %v9121_v15  ;;  %v700_v6 = vadd.f32 %v8631_v25, %v614_v47  ;;  %v618_v46 = vmul.f32 %v8628_v51, %v532_v32  ;;  %v10541_v30 = vcombine.low %v10534_v20, %v10535_v49  ;;  %v10543_v20 = vld [vmem:[#allocation93_spill] sm:$0xff]  ;;  %v10544_v49 = vld [vmem:[#allocation94_spill] sm:$0xff] }
 0x1cb   :  { %2435 = vmatprep.mubr.bf16.mxu0 %v9157_v4  ;;  %v9250_v52 = vpack.c.bf16 %v691_v48, %v687_v8  ;;  %v695_v35 = vadd.f32 %v8637_v36, %v609_v14  ;;  %v699_v61 = vadd.f32 %v8637_v36, %v613_v1  ;;  %2661 = vmatprep.mubr.bf16.mxu1 %v9157_v4  ;;  %v10547_v47 = vld [vmem:[#allocation37_spill] sm:$0xff]  ;;  %v10549_v14 = vld [vmem:[#allocation46_spill] sm:$0xff] }
 0x1cc   :  { %2477 = vmatpush1.bf16.msra.mxu0 %v10541_v30  ;;  %v10542_v40 = vcombine.low %v10537_v31, %v10538_v21  ;;  %v9258_v38 = vpack.c.bf16 %v700_v6, %v696_v11  ;;  %v622_v32 = vmul.f32 %v8628_v51, %v536_v24  ;;  %v704_v23 = vadd.f32 %v8631_v25, %v618_v46  ;;  %v10548_v21 = vld [vmem:[#allocation41_spill] sm:$0xff] }
 0x1cd   :  { %v10545_v8 = vcombine.high %v10543_v20, %v10544_v49  ;;  %v10546_v13 = vcombine.high %v8761_v62, %v8771_v9  ;;  %v9268_v7 = vpack.c.bf16 %v699_v61, %v695_v35  ;;  %v531_v31 = vmul.f32 %v8985_v55, %v10547_v47  ;;  %v10551_v11 = vld [vmem:[#allocation45_spill] sm:$0xff]  ;;  %v10554_v61 = vld [vmem:[#allocation50_spill] sm:$0xff] }
 0x1ce   :  { %2703 = vmatpush1.bf16.msra.mxu1 %v10542_v40  ;;  %v535_v39 = vmul.f32 %v9001_v12, %v10548_v21  ;;  %v708_v48 = vadd.f32 %v8631_v25, %v622_v32  ;;  %v540_v1 = vmul.f32 %v9026_v29, %v10549_v14  ;;  %v544_v24 = vmul.f32 %v9042_v63, %v10550_v45  ;;  %v10553_v12 = vld [vmem:[#allocation47_spill] sm:$0xff]  ;;  %v10560_v21 = vld [vmem:[#allocation98_spill] sm:$0xff] }
 0x1cf   :  { %2478 = vmatprep.subr.bf16.mxu0 %v10545_v8  ;;  %2704 = vmatprep.subr.bf16.mxu1 %v10546_v13  ;;  %v539_v6 = vmul.f32 %v9026_v29, %v10551_v11  ;;  %v10552_v46 = vcombine.low %v10543_v20, %v10544_v49  ;;  %v617_v55 = vmul.f32 %v8634_v2, %v531_v31  ;;  %v10556_v8 = vld [vmem:[#allocation95_spill] sm:$0xff]  ;;  %v10557_v29 = vld [vmem:[#allocation96_spill] sm:$0xff]  ;;  %v10559_v31 = vld [vmem:[#allocation97_spill] sm:$0xff] }
 0x1d0   :  { %v621_v30 = vmul.f32 %v8634_v2, %v535_v39  ;;  %v543_v35 = vmul.f32 %v9042_v63, %v10553_v12  ;;  %v548_v40 = vmul.f32 %v9062_v53, %v10554_v61  ;;  %v10555_v32 = vcombine.low %v8761_v62, %v8771_v9  ;;  %2436 = vmatmul.mubr.bf16.gmra.mrb[24].mxu0 %v9164_v54  ;;  %v1017_v12 = vld [vmem:[#allocation7 + $0x7e0] sm:$0xff] }
 0x1d1   :  { %2479 = vmatpush1.bf16.msra.mxu0 %v10552_v46  ;;  %v10558_v13 = vcombine.high %v10556_v8, %v10557_v29  ;;  %v9296_v20 = vpack.c.bf16 %v708_v48, %v704_v23  ;;  %v626_v49 = vmul.f32 %v8628_v51, %v540_v1  ;;  %v630_v47 = vmul.f32 %v8628_v51, %v544_v24  ;;  %v10562_v1 = vld [vmem:[#allocation52_spill] sm:$0xff] }
 0x1d2   :  { %2705 = vmatpush1.bf16.msra.mxu1 %v10555_v32  ;;  %v10561_v63 = vcombine.high %v10559_v31, %v10560_v21  ;;  %v703_v39 = vadd.f32 %v8637_v36, %v617_v55  ;;  %v707_v14 = vadd.f32 %v8637_v36, %v621_v30  ;;  %v625_v9 = vmul.f32 %v8634_v2, %v539_v6  ;;  %v1013_v30 = vld [vmem:[#allocation7 + $0x7c0] sm:$0xff] }
 0x1d3   :  { %2480 = vmatprep.subr.bf16.mxu0 %v10558_v13  ;;  %v629_v62 = vmul.f32 %v8634_v2, %v543_v35  ;;  %2662 = vmatmul.mubr.bf16.gmra.mrb[24].mxu1 %v9164_v54  ;;  %v712_v23 = vadd.f32 %v8631_v25, %v626_v49  ;;  %v716_v48 = vadd.f32 %v8631_v25, %v630_v47 }
 0x1d4   :  { %2706 = vmatprep.subr.bf16.mxu1 %v10561_v63  ;;  %v552_v45 = vmul.f32 %v9081_v10, %v10562_v1  ;;  %v10563_v24 = vcombine.low %v10556_v8, %v10557_v29  ;;  %2445 = vmatprep.mubr.bf16.mxu0 %v9191_v28  ;;  %v9317_v11 = vpack.c.bf16 %v707_v14, %v703_v39  ;;  %v10565_v8 = vld [vmem:[#allocation99_spill] sm:$0xff]  ;;  %v10566_v29 = vld [vmem:[#allocation100_spill] sm:$0xff] }
 0x1d5   :  { %v711_v6 = vadd.f32 %v8637_v36, %v625_v9  ;;  %v715_v46 = vadd.f32 %v8637_v36, %v629_v62  ;;  %2671 = vmatprep.mubr.bf16.mxu1 %v9191_v28  ;;  %v10564_v55 = vcombine.low %v10559_v31, %v10560_v21  ;;  %v9325_v35 = vpack.c.bf16 %v716_v48, %v712_v23  ;;  %v10569_v31 = vld [vmem:[#allocation49_spill] sm:$0xff]  ;;  %v10570_v63 = vld [vmem:[#allocation51_spill] sm:$0xff]  ;;  %v1014_v14 = vld [vmem:[#allocation7 + $0x7c8] sm:$0xff] }
 0x1d6   :  { %2481 = vmatpush1.bf16.msra.mxu0 %v10563_v24  ;;  %v634_v61 = vmul.f32 %v8628_v51, %v548_v40  ;;  %v638_v32 = vmul.f32 %v8628_v51, %v552_v45  ;;  %v10567_v13 = vcombine.high %v10565_v8, %v10566_v29  ;;  %v10568_v49 = vcombine.high %v8797_v50, %v8799_v22  ;;  %v1018_v40 = vld [vmem:[#allocation7 + $0x7e8] sm:$0xff]  ;;  %v10571_v23 = vld [vmem:[#allocation54_spill] sm:$0xff] }
 0x1d7   :  { %2707 = vmatpush1.bf16.msra.mxu1 %v10564_v55  ;;  %v9335_v47 = vpack.c.bf16 %v715_v46, %v711_v6  ;;  %v547_v21 = vmul.f32 %v9062_v53, %v10569_v31  ;;  %v551_v39 = vmul.f32 %v9081_v10, %v10570_v63  ;;  %v556_v48 = vmul.f32 %v9107_v26, %v10571_v23  ;;  %v10572_v1 = vld [vmem:[#allocation56_spill] sm:$0xff]  ;;  %v771_v63 = vld [vmem:[#allocation7 + $0x30] sm:$0xff] }
 0x1d8   :  { %2482 = vmatprep.subr.bf16.mxu0 %v10567_v13  ;;  %2708 = vmatprep.subr.bf16.mxu1 %v10568_v49  ;;  %v720_v9 = vadd.f32 %v8631_v25, %v634_v61  ;;  %v724_v62 = vadd.f32 %v8631_v25, %v638_v32  ;;  %v560_v45 = vmul.f32 %v9125_v18, %v10572_v1  ;;  %v10575_v61 = vld [vmem:[#allocation101_spill] sm:$0xff] }
 0x1d9   :  { %v10573_v24 = vcombine.low %v10565_v8, %v10566_v29  ;;  %v9352_v53 = vpack.c.bf16 %v9194_v5, %v9174_v17  ;;  %v6488_v10 = vcombine.low %v1013_v30, %v1017_v12  ;;  %v633_v6 = vmul.f32 %v8634_v2, %v547_v21  ;;  %v10577_v5 = vld [vmem:[#allocation102_spill] sm:$0xff]  ;;  %v767_v21 = vld [vmem:[#allocation7 + $0x10] sm:$0xff] }
 0x1da   :  { %v637_v46 = vmul.f32 %v8634_v2, %v551_v39  ;;  %v10574_v55 = vcombine.low %v8797_v50, %v8799_v22  ;;  %v10576_v32 = vcombine.high %v8813_v57, %v10575_v61  ;;  %v9362_v13 = vpack.c.bf16 %v724_v62, %v720_v9  ;;  %v768_v39 = vld [vmem:[#allocation7 + $0x18] sm:$0xff]  ;;  %v10579_v23 = vld [vmem:[#allocation53_spill] sm:$0xff] }
 0x1db   :  { %2483 = vmatpush1.bf16.msra.mxu0 %v10573_v24  ;;  %v642_v8 = vmul.f32 %v8628_v51, %v556_v48  ;;  %v646_v17 = vmul.f32 %v8628_v51, %v560_v45  ;;  %v10578_v29 = vcombine.high %v8825_v56, %v10577_v5  ;;  %v6489_v49 = vcombine.high %v1013_v30, %v1017_v12  ;;  %v772_v9 = vld [vmem:[#allocation7 + $0x38] sm:$0xff]  ;;  %v10581_v45 = vld [vmem:[#allocation55_spill] sm:$0xff] }
 0x1dc   :  { %2709 = vmatpush1.bf16.msra.mxu1 %v10574_v55  ;;  %2484 = vmatprep.subr.bf16.mxu0 %v10576_v32  ;;  %v6491_v31 = vcombine.high %v1014_v14, %v1018_v40  ;;  %v719_v22 = vadd.f32 %v8637_v36, %v633_v6  ;;  %v723_v50 = vadd.f32 %v8637_v36, %v637_v46  ;;  %v779_v55 = vld [vmem:[#allocation7 + $0x70] sm:$0xff]  ;;  %v780_v32 = vld [vmem:[#allocation7 + $0x78] sm:$0xff] }
 0x1dd   :  { %2710 = vmatprep.subr.bf16.mxu1 %v10578_v29  ;;  %2446 = vmatmul.mubr.bf16.gmra.mrb[28].mxu0 %v9352_v53  ;;  %v728_v51 = vadd.f32 %v8631_v25, %v642_v8  ;;  %v732_v62 = vadd.f32 %v8631_v25, %v646_v17  ;;  %v555_v30 = vmul.f32 %v9107_v26, %v10579_v23  ;;  %v783_v29 = vld [vmem:[#allocation7 + $0x90] sm:$0xff]  ;;  %v796_v23 = vld [vmem:[#allocation7 + $0xf8] sm:$0xff] }
 0x1de   :  { %2672 = vmatmul.mubr.bf16.gmra.mrb[28].mxu1 %v9352_v53  ;;  %v10580_v12 = vcombine.low %v8813_v57, %v10575_v61  ;;  %2488 = vmatprep.mubr.bf16.mxu0 %v8898_v41  ;;  %v6490_v48 = vcombine.low %v1014_v14, %v1018_v40  ;;  %v9381_v1 = vpack.c.bf16 %v723_v50, %v719_v22  ;;  %v775_v40 = vld [vmem:[#allocation7 + $0x50] sm:$0xff] }
 0x1df   :  { %v559_v24 = vmul.f32 %v9125_v18, %v10581_v45  ;;  %v10582_v6 = vcombine.low %v8825_v56, %v10577_v5  ;;  %2714 = vmatprep.mubr.bf16.mxu1 %v8898_v41  ;;  %v6245_v25 = vcombine.high %v767_v21, %v771_v63  ;;  %v9389_v26 = vpack.c.bf16 %v732_v62, %v728_v51  ;;  %v776_v56 = vld [vmem:[#allocation7 + $0x58] sm:$0xff]  ;;  %v803_v45 = vld [vmem:[#allocation7 + $0x130] sm:$0xff] }
 0x1e0   :  { %2485 = vmatpush1.bf16.msra.mxu0 %v10580_v12  ;;  %v641_v57 = vmul.f32 %v8634_v2, %v555_v30  ;;  %v6247_v46 = vcombine.high %v768_v39, %v772_v9  ;;  %v6244_v61 = vcombine.low %v767_v21, %v771_v63  ;;  %v6246_v17 = vcombine.low %v768_v39, %v772_v9  ;;  %v784_v21 = vld [vmem:[#allocation7 + $0x98] sm:$0xff]  ;;  %v791_v39 = vld [vmem:[#allocation7 + $0xd0] sm:$0xff] }
 0x1e1   :  { %2711 = vmatpush1.bf16.msra.mxu1 %v10582_v6  ;;  %2486 = vmatprep.subr.bf16.mxu0 %v6489_v49  ;;  %v645_v14 = vmul.f32 %v8634_v2, %v559_v24  ;;  %v6253_v5 = vcombine.high %v775_v40, %v779_v55  ;;  %v787_v49 = vld [vmem:[#allocation7 + $0xb0] sm:$0xff]  ;;  %v6255_v2 = vcombine.high %v776_v56, %v780_v32  ;;  %v788_v63 = vld [vmem:[#allocation7 + $0xb8] sm:$0xff] }
 0x1e2   :  { %2712 = vmatprep.subr.bf16.mxu1 %v6491_v31  ;;  %v727_v18 = vadd.f32 %v8637_v36, %v641_v57  ;;  %v6254_v22 = vcombine.low %v776_v56, %v780_v32  ;;  %v6263_v50 = vcombine.high %v784_v21, %v788_v63  ;;  %v795_v9 = vld [vmem:[#allocation7 + $0xf0] sm:$0xff]  ;;  %v6260_v51 = vcombine.low %v783_v29, %v787_v49  ;;  %v792_v62 = vld [vmem:[#allocation7 + $0xd8] sm:$0xff] }
 0x1e3   :  { %v731_v8 = vadd.f32 %v8637_v36, %v645_v14  ;;  %v6261_v36 = vcombine.high %v783_v29, %v787_v49  ;;  %v6262_v30 = vcombine.low %v784_v21, %v788_v63  ;;  %v6269_v12 = vcombine.high %v791_v39, %v795_v9  ;;  %v804_v57 = vld [vmem:[#allocation7 + $0x138] sm:$0xff]  ;;  %v819_v29 = vld [vmem:[#allocation7 + $0x1b0] sm:$0xff] }
 0x1e4   :  { %2487 = vmatpush1.bf16.msra.mxu0 %v6488_v10  ;;  %v6252_v10 = vcombine.low %v775_v40, %v779_v55  ;;  %v6271_v24 = vcombine.high %v792_v62, %v796_v23  ;;  %v6268_v6 = vcombine.low %v791_v39, %v795_v9  ;;  %v6270_v14 = vcombine.low %v792_v62, %v796_v23  ;;  %v807_v55 = vld [vmem:[#allocation7 + $0x150] sm:$0xff]  ;;  %v808_v56 = vld [vmem:[#allocation7 + $0x158] sm:$0xff] }
 0x1e5   :  { %2713 = vmatpush1.bf16.msra.mxu1 %v6490_v48  ;;  %2795 = vmatprep.subr.bf16.mxu0 %v6245_v25  ;;  %v9395_v31 = vpack.c.bf16 %v731_v8, %v727_v18  ;;  %v799_v48 = vld [vmem:[#allocation7 + $0x110] sm:$0xff]  ;;  %v800_v25 = vld [vmem:[#allocation7 + $0x118] sm:$0xff] }
 0x1e6   :  { %3021 = vmatprep.subr.bf16.mxu1 %v6247_v46  ;;  %v6277_v46 = vcombine.high %v799_v48, %v803_v45  ;;  %v6279_v40 = vcombine.high %v800_v25, %v804_v57  ;;  %v811_v18 = vld [vmem:[#allocation7 + $0x170] sm:$0xff]  ;;  %v812_v32 = vld [vmem:[#allocation7 + $0x178] sm:$0xff]  ;;  %v6278_v8 = vcombine.low %v800_v25, %v804_v57 }
 0x1e7   :  { %2489 = vmatmul.mubr.bf16.vlgmr.msra.gmra.mrb[0].mxu0 %v8934_v58  ;;  %v6287_v49 = vcombine.high %v808_v56, %v812_v32  ;;  %v820_v21 = vld [vmem:[#allocation7 + $0x1b8] sm:$0xff]  ;;  %v827_v39 = vld [vmem:[#allocation7 + $0x1f0] sm:$0xff] }
 0x1e8   :  { %2715 = vmatmul.mubr.bf16.vlgmr.msra.gmra.mrb[0].mxu1 %v8934_v58  ;;  %2796 = vmatpush1.bf16.msra.mxu0 %v6244_v61  ;;  %v6276_v61 = vcombine.low %v799_v48, %v803_v45  ;;  %v828_v62 = vld [vmem:[#allocation7 + $0x1f8] sm:$0xff]  ;;  %v835_v48 = vld [vmem:[#allocation7 + $0x230] sm:$0xff] }
 0x1e9   :  { %2498 = vmatprep.mubr.bf16.mxu0 %v9050_v43  ;;  %2724 = vmatprep.mubr.bf16.mxu1 %v9050_v43  ;;  %v836_v25 = vld [vmem:[#allocation7 + $0x238] sm:$0xff] }
 0x1ea   :  { %3022 = vmatpush1.bf16.msra.mxu1 %v6246_v17  ;;  %2797 = vmatprep.subr.bf16.mxu0 %v6253_v5  ;;  %v6285_v17 = vcombine.high %v807_v55, %v811_v18  ;;  %v815_v5 = vld [vmem:[#allocation7 + $0x190] sm:$0xff] }
 0x1eb   :  { %3023 = vmatprep.subr.bf16.mxu1 %v6255_v2  ;;  %v6284_v2 = vcombine.low %v807_v55, %v811_v18  ;;  %v6293_v63 = vcombine.high %v815_v5, %v819_v29  ;;  %v6292_v9 = vcombine.low %v815_v5, %v819_v29  ;;  %v843_v55 = vld [vmem:[#allocation7 + $0x270] sm:$0xff] }
 0x1ec   :  { %2798 = vmatpush1.bf16.msra.mxu0 %v6252_v10  ;;  %v816_v10 = vld [vmem:[#allocation7 + $0x198] sm:$0xff]  ;;  %v851_v5 = vld [vmem:[#allocation7 + $0x2b0] sm:$0xff] }
 0x1ed   :  { %2799 = vmatprep.subr.bf16.mxu0 %v6261_v36  ;;  %v6286_v36 = vcombine.low %v808_v56, %v812_v32  ;;  %v6294_v23 = vcombine.low %v816_v10, %v820_v21  ;;  %v844_v56 = vld [vmem:[#allocation7 + $0x278] sm:$0xff] }
 0x1ee   :  { %3024 = vmatpush1.bf16.msra.mxu1 %v6254_v22  ;;  %v6295_v22 = vcombine.high %v816_v10, %v820_v21  ;;  %v852_v10 = vld [vmem:[#allocation7 + $0x2b8] sm:$0xff] }
 0x1ef   :  { %2499 = vmatmul.mubr.bf16.gmra.mrb[4].mxu0 %v9182_v33  ;;  %3025 = vmatprep.subr.bf16.mxu1 %v6263_v50  ;;  %v823_v50 = vld [vmem:[#allocation7 + $0x1d0] sm:$0xff] }
 0x1f0   :  { %2725 = vmatmul.mubr.bf16.gmra.mrb[4].mxu1 %v9182_v33  ;;  %2800 = vmatpush1.bf16.msra.mxu0 %v6260_v51  ;;  %v824_v51 = vld [vmem:[#allocation7 + $0x1d8] sm:$0xff] }
 0x1f1   :  { %2508 = vmatprep.mubr.bf16.mxu0 %v9229_v42  ;;  %2734 = vmatprep.mubr.bf16.mxu1 %v9229_v42  ;;  %v6303_v45 = vcombine.high %v824_v51, %v828_v62 }
 0x1f2   :  { %3026 = vmatpush1.bf16.msra.mxu1 %v6262_v30  ;;  %2801 = vmatprep.subr.bf16.mxu0 %v6269_v12  ;;  %v6301_v30 = vcombine.high %v823_v50, %v827_v39  ;;  %v831_v12 = vld [vmem:[#allocation7 + $0x210] sm:$0xff] }
 0x1f3   :  { %3027 = vmatprep.subr.bf16.mxu1 %v6271_v24  ;;  %v6300_v24 = vcombine.low %v823_v50, %v827_v39  ;;  %v6309_v57 = vcombine.high %v831_v12, %v835_v48  ;;  %v6308_v18 = vcombine.low %v831_v12, %v835_v48  ;;  %v859_v50 = vld [vmem:[#allocation7 + $0x2f0] sm:$0xff] }
 0x1f4   :  { %2802 = vmatpush1.bf16.msra.mxu0 %v6268_v6  ;;  %v832_v6 = vld [vmem:[#allocation7 + $0x218] sm:$0xff]  ;;  %v867_v12 = vld [vmem:[#allocation7 + $0x330] sm:$0xff] }
 0x1f5   :  { %2803 = vmatprep.subr.bf16.mxu0 %v6277_v46  ;;  %v6302_v46 = vcombine.low %v824_v51, %v828_v62  ;;  %v6310_v32 = vcombine.low %v832_v6, %v836_v25  ;;  %v860_v51 = vld [vmem:[#allocation7 + $0x2f8] sm:$0xff] }
 0x1f6   :  { %3028 = vmatpush1.bf16.msra.mxu1 %v6270_v14  ;;  %v6311_v14 = vcombine.high %v832_v6, %v836_v25  ;;  %v868_v6 = vld [vmem:[#allocation7 + $0x338] sm:$0xff] }
 0x1f7   :  { %2509 = vmatmul.mubr.bf16.gmra.mrb[8].mxu0 %v9250_v52  ;;  %3029 = vmatprep.subr.bf16.mxu1 %v6279_v40  ;;  %v839_v40 = vld [vmem:[#allocation7 + $0x250] sm:$0xff] }
 0x1f8   :  { %2735 = vmatmul.mubr.bf16.gmra.mrb[8].mxu1 %v9250_v52  ;;  %2804 = vmatpush1.bf16.msra.mxu0 %v6276_v61  ;;  %v840_v61 = vld [vmem:[#allocation7 + $0x258] sm:$0xff] }
 0x1f9   :  { %2518 = vmatprep.mubr.bf16.mxu0 %v9258_v38  ;;  %2744 = vmatprep.mubr.bf16.mxu1 %v9258_v38  ;;  %v6319_v29 = vcombine.high %v840_v61, %v844_v56 }
 0x1fa   :  { %3030 = vmatpush1.bf16.msra.mxu1 %v6278_v8  ;;  %2805 = vmatprep.subr.bf16.mxu0 %v6285_v17  ;;  %v6317_v8 = vcombine.high %v839_v40, %v843_v55  ;;  %v847_v17 = vld [vmem:[#allocation7 + $0x290] sm:$0xff] }
 0x1fb   :  { %3031 = vmatprep.subr.bf16.mxu1 %v6287_v49  ;;  %v6316_v49 = vcombine.low %v839_v40, %v843_v55  ;;  %v6325_v21 = vcombine.high %v847_v17, %v851_v5  ;;  %v6324_v39 = vcombine.low %v847_v17, %v851_v5  ;;  %v875_v40 = vld [vmem:[#allocation7 + $0x370] sm:$0xff] }
 0x1fc   :  { %2806 = vmatpush1.bf16.msra.mxu0 %v6284_v2  ;;  %v848_v2 = vld [vmem:[#allocation7 + $0x298] sm:$0xff]  ;;  %v883_v17 = vld [vmem:[#allocation7 + $0x3b0] sm:$0xff] }
 0x1fd   :  { %2807 = vmatprep.subr.bf16.mxu0 %v6293_v63  ;;  %v6318_v63 = vcombine.low %v840_v61, %v844_v56  ;;  %v6326_v62 = vcombine.low %v848_v2, %v852_v10  ;;  %v876_v61 = vld [vmem:[#allocation7 + $0x378] sm:$0xff] }
 0x1fe   :  { %3032 = vmatpush1.bf16.msra.mxu1 %v6286_v36  ;;  %v6327_v36 = vcombine.high %v848_v2, %v852_v10  ;;  %v884_v2 = vld [vmem:[#allocation7 + $0x3b8] sm:$0xff] }
 0x1ff   :  { %2519 = vmatmul.mubr.bf16.gmra.mrb[12].mxu0 %v9268_v7  ;;  %3033 = vmatprep.subr.bf16.mxu1 %v6295_v22  ;;  %v855_v22 = vld [vmem:[#allocation7 + $0x2d0] sm:$0xff] }
 0x200   :  { %2745 = vmatmul.mubr.bf16.gmra.mrb[12].mxu1 %v9268_v7  ;;  %2808 = vmatpush1.bf16.msra.mxu0 %v6292_v9  ;;  %v856_v9 = vld [vmem:[#allocation7 + $0x2d8] sm:$0xff] }
 0x201   :  { %2528 = vmatprep.mubr.bf16.mxu0 %v9296_v20  ;;  %2754 = vmatprep.mubr.bf16.mxu1 %v9296_v20  ;;  %v6335_v48 = vcombine.high %v856_v9, %v860_v51 }
 0x202   :  { %3034 = vmatpush1.bf16.msra.mxu1 %v6294_v23  ;;  %2809 = vmatprep.subr.bf16.mxu0 %v6301_v30  ;;  %v6333_v23 = vcombine.high %v855_v22, %v859_v50  ;;  %v863_v30 = vld [vmem:[#allocation7 + $0x310] sm:$0xff] }
 0x203   :  { %3035 = vmatprep.subr.bf16.mxu1 %v6303_v45  ;;  %v6332_v45 = vcombine.low %v855_v22, %v859_v50  ;;  %v6341_v25 = vcombine.high %v863_v30, %v867_v12  ;;  %v6340_v55 = vcombine.low %v863_v30, %v867_v12  ;;  %v891_v22 = vld [vmem:[#allocation7 + $0x3f0] sm:$0xff] }
 0x204   :  { %2810 = vmatpush1.bf16.msra.mxu0 %v6300_v24  ;;  %v864_v24 = vld [vmem:[#allocation7 + $0x318] sm:$0xff]  ;;  %v899_v30 = vld [vmem:[#allocation7 + $0x430] sm:$0xff] }
 0x205   :  { %2811 = vmatprep.subr.bf16.mxu0 %v6309_v57  ;;  %v6334_v57 = vcombine.low %v856_v9, %v860_v51  ;;  %v6342_v56 = vcombine.low %v864_v24, %v868_v6  ;;  %v892_v9 = vld [vmem:[#allocation7 + $0x3f8] sm:$0xff] }
 0x206   :  { %3036 = vmatpush1.bf16.msra.mxu1 %v6302_v46  ;;  %v6343_v46 = vcombine.high %v864_v24, %v868_v6  ;;  %v900_v24 = vld [vmem:[#allocation7 + $0x438] sm:$0xff] }
 0x207   :  { %2529 = vmatmul.mubr.bf16.gmra.mrb[16].mxu0 %v9317_v11  ;;  %3037 = vmatprep.subr.bf16.mxu1 %v6311_v14  ;;  %v871_v14 = vld [vmem:[#allocation7 + $0x350] sm:$0xff] }
 0x208   :  { %2755 = vmatmul.mubr.bf16.gmra.mrb[16].mxu1 %v9317_v11  ;;  %2812 = vmatpush1.bf16.msra.mxu0 %v6308_v18  ;;  %v872_v18 = vld [vmem:[#allocation7 + $0x358] sm:$0xff] }
 0x209   :  { %2538 = vmatprep.mubr.bf16.mxu0 %v9325_v35  ;;  %2764 = vmatprep.mubr.bf16.mxu1 %v9325_v35  ;;  %v6351_v5 = vcombine.high %v872_v18, %v876_v61 }
 0x20a   :  { %3038 = vmatpush1.bf16.msra.mxu1 %v6310_v32  ;;  %2813 = vmatprep.subr.bf16.mxu0 %v6317_v8  ;;  %v6349_v32 = vcombine.high %v871_v14, %v875_v40  ;;  %v879_v8 = vld [vmem:[#allocation7 + $0x390] sm:$0xff] }
 0x20b   :  { %3039 = vmatprep.subr.bf16.mxu1 %v6319_v29  ;;  %v6348_v29 = vcombine.low %v871_v14, %v875_v40  ;;  %v6357_v10 = vcombine.high %v879_v8, %v883_v17  ;;  %v6356_v50 = vcombine.low %v879_v8, %v883_v17  ;;  %v915_v8 = vld [vmem:[#allocation7 + $0x4b0] sm:$0xff] }
 0x20c   :  { %2814 = vmatpush1.bf16.msra.mxu0 %v6316_v49  ;;  %v880_v49 = vld [vmem:[#allocation7 + $0x398] sm:$0xff] }
 0x20d   :  { %2815 = vmatprep.subr.bf16.mxu0 %v6325_v21  ;;  %v6350_v21 = vcombine.low %v872_v18, %v876_v61  ;;  %v6358_v51 = vcombine.low %v880_v49, %v884_v2  ;;  %v908_v18 = vld [vmem:[#allocation7 + $0x478] sm:$0xff] }
 0x20e   :  { %3040 = vmatpush1.bf16.msra.mxu1 %v6318_v63  ;;  %v6359_v63 = vcombine.high %v880_v49, %v884_v2 }
 0x20f   :  { %2539 = vmatmul.mubr.bf16.gmra.mrb[20].mxu0 %v9335_v47  ;;  %3041 = vmatprep.subr.bf16.mxu1 %v6327_v36  ;;  %v887_v36 = vld [vmem:[#allocation7 + $0x3d0] sm:$0xff] }
 0x210   :  { %2765 = vmatmul.mubr.bf16.gmra.mrb[20].mxu1 %v9335_v47  ;;  %2816 = vmatpush1.bf16.msra.mxu0 %v6324_v39  ;;  %v888_v39 = vld [vmem:[#allocation7 + $0x3d8] sm:$0xff] }
 0x211   :  { %2548 = vmatprep.mubr.bf16.mxu0 %v9362_v13  ;;  %2774 = vmatprep.mubr.bf16.mxu1 %v9362_v13  ;;  %v6367_v12 = vcombine.high %v888_v39, %v892_v9 }
 0x212   :  { %3042 = vmatpush1.bf16.msra.mxu1 %v6326_v62  ;;  %2817 = vmatprep.subr.bf16.mxu0 %v6333_v23  ;;  %v6365_v62 = vcombine.high %v887_v36, %v891_v22  ;;  %v895_v23 = vld [vmem:[#allocation7 + $0x410] sm:$0xff] }
 0x213   :  { %3043 = vmatprep.subr.bf16.mxu1 %v6335_v48  ;;  %v6364_v48 = vcombine.low %v887_v36, %v891_v22  ;;  %v6373_v6 = vcombine.high %v895_v23, %v899_v30  ;;  %v6372_v40 = vcombine.low %v895_v23, %v899_v30  ;;  %v920_v22 = vld [vmem:[#allocation7 + $0x4d8] sm:$0xff] }
 0x214   :  { %2818 = vmatpush1.bf16.msra.mxu0 %v6332_v45  ;;  %v896_v45 = vld [vmem:[#allocation7 + $0x418] sm:$0xff] }
 0x215   :  { %2819 = vmatprep.subr.bf16.mxu0 %v6341_v25  ;;  %v6366_v25 = vcombine.low %v888_v39, %v892_v9  ;;  %v6375_v14 = vcombine.high %v896_v45, %v900_v24  ;;  %v928_v23 = vld [vmem:[#allocation7 + $0x518] sm:$0xff] }
 0x216   :  { %3044 = vmatpush1.bf16.msra.mxu1 %v6334_v57  ;;  %v903_v57 = vld [vmem:[#allocation7 + $0x450] sm:$0xff]  ;;  %v932_v30 = vld [vmem:[#allocation7 + $0x538] sm:$0xff] }
 0x217   :  { %2549 = vmatmul.mubr.bf16.gmra.mrb[24].mxu0 %v9381_v1  ;;  %3045 = vmatprep.subr.bf16.mxu1 %v6343_v46  ;;  %v907_v46 = vld [vmem:[#allocation7 + $0x470] sm:$0xff] }
 0x218   :  { %2775 = vmatmul.mubr.bf16.gmra.mrb[24].mxu1 %v9381_v1  ;;  %2820 = vmatpush1.bf16.msra.mxu0 %v6340_v55  ;;  %v904_v55 = vld [vmem:[#allocation7 + $0x458] sm:$0xff]  ;;  %v6381_v61 = vcombine.high %v903_v57, %v907_v46  ;;  %v6380_v17 = vcombine.low %v903_v57, %v907_v46 }
 0x219   :  { %2558 = vmatprep.mubr.bf16.mxu0 %v9389_v26  ;;  %2784 = vmatprep.mubr.bf16.mxu1 %v9389_v26  ;;  %v6382_v2 = vcombine.low %v904_v55, %v908_v18  ;;  %v936_v57 = vld [vmem:[#allocation7 + $0x558] sm:$0xff] }
 0x21a   :  { %3046 = vmatpush1.bf16.msra.mxu1 %v6342_v56  ;;  %2821 = vmatprep.subr.bf16.mxu0 %v6349_v32  ;;  %v6374_v56 = vcombine.low %v896_v45, %v900_v24  ;;  %v911_v32 = vld [vmem:[#allocation7 + $0x490] sm:$0xff]  ;;  %v940_v46 = vld [vmem:[#allocation7 + $0x578] sm:$0xff] }
 0x21b   :  { %3047 = vmatprep.subr.bf16.mxu1 %v6351_v5  ;;  %v912_v5 = vld [vmem:[#allocation7 + $0x498] sm:$0xff]  ;;  %v6389_v49 = vcombine.high %v911_v32, %v915_v8  ;;  %v6388_v36 = vcombine.low %v911_v32, %v915_v8  ;;  %v935_v45 = vld [vmem:[#allocation7 + $0x550] sm:$0xff]  ;;  %v6414_v8 = vcombine.low %v936_v57, %v940_v46 }
 0x21c   :  { %2822 = vmatpush1.bf16.msra.mxu0 %v6348_v29  ;;  %v916_v29 = vld [vmem:[#allocation7 + $0x4b8] sm:$0xff]  ;;  %v939_v24 = vld [vmem:[#allocation7 + $0x570] sm:$0xff] }
 0x21d   :  { %2823 = vmatprep.subr.bf16.mxu0 %v6357_v10  ;;  %v919_v10 = vld [vmem:[#allocation7 + $0x4d0] sm:$0xff]  ;;  %v6390_v9 = vcombine.low %v912_v5, %v916_v29 }
 0x21e   :  { %3048 = vmatpush1.bf16.msra.mxu1 %v6350_v21  ;;  %v923_v21 = vld [vmem:[#allocation7 + $0x4f0] sm:$0xff] }
 0x21f   :  { %2559 = vmatmul.mubr.bf16.gmra.mrb[28].mxu0 %v9395_v31  ;;  %3049 = vmatprep.subr.bf16.mxu1 %v6359_v63  ;;  %v6391_v63 = vcombine.high %v912_v5, %v916_v29  ;;  %v6397_v39 = vcombine.high %v919_v10, %v923_v21 }
 0x220   :  { %2785 = vmatmul.mubr.bf16.gmra.mrb[28].mxu1 %v9395_v31  ;;  %2824 = vmatpush1.bf16.msra.mxu0 %v6356_v50  ;;  %v924_v50 = vld [vmem:[#allocation7 + $0x4f8] sm:$0xff] }
 0x221   :  { %2827 = vmatprep.mubr.bf16.mxu0 %v8885_v44  ;;  %3053 = vmatprep.mubr.bf16.mxu1 %v8885_v44  ;;  %v6383_v44 = vcombine.high %v904_v55, %v908_v18  ;;  %v943_v55 = vld [vmem:[#allocation7 + $0x590] sm:$0xff]  ;;  %v6412_v18 = vcombine.low %v935_v45, %v939_v24 }
 0x222   :  { %3050 = vmatpush1.bf16.msra.mxu1 %v6358_v51  ;;  %2825 = vmatprep.subr.bf16.mxu0 %v6365_v62  ;;  %v927_v51 = vld [vmem:[#allocation7 + $0x510] sm:$0xff]  ;;  %v6396_v62 = vcombine.low %v919_v10, %v923_v21 }
 0x223   :  { %3051 = vmatprep.subr.bf16.mxu1 %v6367_v12 }
 0x224   :  { %2826 = vmatpush1.bf16.msra.mxu0 %v6364_v48  ;;  %v6398_v48 = vcombine.low %v920_v22, %v924_v50 }
 0x225   :  { %2908 = vmatprep.subr.bf16.mxu0 %v6373_v6  ;;  %v6407_v6 = vcombine.high %v928_v23, %v932_v30 }
 0x226   :  { %3052 = vmatpush1.bf16.msra.mxu1 %v6366_v25 }
 0x227   :  { %2828 = vmatmul.mubr.bf16.vlgmr.msra.gmra.mrb[32].mxu0 %v8887_v3  ;;  %3134 = vmatprep.subr.bf16.mxu1 %v6375_v14  ;;  %v6413_v14 = vcombine.high %v935_v45, %v939_v24  ;;  %v975_v24 = vld [vmem:[#allocation7 + $0x690] sm:$0xff] }
 0x228   :  { %2909 = vmatpush1.bf16.msra.mxu0 %v6372_v40  ;;  %2837 = vmatprep.mubr.bf16.mxu0 %v8913_v0  ;;  %v6406_v40 = vcombine.low %v928_v23, %v932_v30  ;;  %v968_v30 = vld [vmem:[#allocation7 + $0x658] sm:$0xff] }
 0x229   :  { %3054 = vmatmul.mubr.bf16.vlgmr.msra.gmra.mrb[32].mxu1 %v8887_v3  ;;  %2910 = vmatprep.subr.bf16.mxu0 %v6381_v61  ;;  %v931_v3 = vld [vmem:[#allocation7 + $0x530] sm:$0xff]  ;;  %v944_v61 = vld [vmem:[#allocation7 + $0x598] sm:$0xff] }
 0x22a   :  { %3063 = vmatprep.mubr.bf16.mxu1 %v8913_v0  ;;  %3135 = vmatpush1.bf16.msra.mxu1 %v6374_v56  ;;  %v6399_v0 = vcombine.high %v920_v22, %v924_v50  ;;  %v6405_v12 = vcombine.high %v927_v51, %v931_v3  ;;  %v6404_v25 = vcombine.low %v927_v51, %v931_v3  ;;  %v948_v56 = vld [vmem:[#allocation7 + $0x5b8] sm:$0xff]  ;;  %v967_v3 = vld [vmem:[#allocation7 + $0x650] sm:$0xff] }
 0x22b   :  { %3136 = vmatprep.subr.bf16.mxu1 %v6383_v44  ;;  %v951_v44 = vld [vmem:[#allocation7 + $0x5d0] sm:$0xff]  ;;  %v6423_v5 = vcombine.high %v944_v61, %v948_v56  ;;  %v6422_v21 = vcombine.low %v944_v61, %v948_v56  ;;  %v960_v50 = vld [vmem:[#allocation7 + $0x618] sm:$0xff] }
 0x22c   :  { %2911 = vmatpush1.bf16.msra.mxu0 %v6380_v17  ;;  %v955_v17 = vld [vmem:[#allocation7 + $0x5f0] sm:$0xff]  ;;  %v984_v61 = vld [vmem:[#allocation7 + $0x6d8] sm:$0xff] }
 0x22d   :  { %2912 = vmatprep.subr.bf16.mxu0 %v6389_v49  ;;  %v952_v49 = vld [vmem:[#allocation7 + $0x5d8] sm:$0xff]  ;;  %v6429_v10 = vcombine.high %v951_v44, %v955_v17  ;;  %v6428_v22 = vcombine.low %v951_v44, %v955_v17  ;;  %v991_v44 = vld [vmem:[#allocation7 + $0x710] sm:$0xff] }
 0x22e   :  { %3137 = vmatpush1.bf16.msra.mxu1 %v6382_v2  ;;  %v956_v2 = vld [vmem:[#allocation7 + $0x5f8] sm:$0xff] }
 0x22f   :  { %2838 = vmatmul.mubr.bf16.gmra.mrb[36].mxu0 %v8923_v34  ;;  %3138 = vmatprep.subr.bf16.mxu1 %v6391_v63  ;;  %v959_v63 = vld [vmem:[#allocation7 + $0x610] sm:$0xff]  ;;  %v6430_v51 = vcombine.low %v952_v49, %v956_v2  ;;  %v988_v56 = vld [vmem:[#allocation7 + $0x6f8] sm:$0xff] }
 0x230   :  { %2913 = vmatpush1.bf16.msra.mxu0 %v6388_v36  ;;  %2847 = vmatprep.mubr.bf16.mxu0 %v8958_v16  ;;  %v10583_v36 = vld [vmem:[#allocation62_spill] sm:$0xff] }
 0x231   :  { %3064 = vmatmul.mubr.bf16.gmra.mrb[36].mxu1 %v8923_v34  ;;  %2914 = vmatprep.subr.bf16.mxu0 %v6397_v39  ;;  %v947_v34 = vld [vmem:[#allocation7 + $0x5b0] sm:$0xff]  ;;  %v964_v39 = vld [vmem:[#allocation7 + $0x638] sm:$0xff] }
 0x232   :  { %3073 = vmatprep.mubr.bf16.mxu1 %v8958_v16  ;;  %3139 = vmatpush1.bf16.msra.mxu1 %v6390_v9  ;;  %v6415_v16 = vcombine.high %v936_v57, %v940_v46  ;;  %v6421_v32 = vcombine.high %v943_v55, %v947_v34  ;;  %v6420_v29 = vcombine.low %v943_v55, %v947_v34  ;;  %v976_v57 = vld [vmem:[#allocation7 + $0x698] sm:$0xff]  ;;  %v983_v55 = vld [vmem:[#allocation7 + $0x6d0] sm:$0xff] }
 0x233   :  { %3140 = vmatprep.subr.bf16.mxu1 %v6399_v0  ;;  %v971_v0 = vld [vmem:[#allocation7 + $0x670] sm:$0xff]  ;;  %v6438_v45 = vcombine.low %v960_v50, %v964_v39  ;;  %v980_v46 = vld [vmem:[#allocation7 + $0x6b8] sm:$0xff] }
 0x234   :  { %2915 = vmatpush1.bf16.msra.mxu0 %v6396_v62  ;;  %v6439_v62 = vcombine.high %v960_v50, %v964_v39  ;;  %v987_v34 = vld [vmem:[#allocation7 + $0x6f0] sm:$0xff] }
 0x235   :  { %2916 = vmatprep.subr.bf16.mxu0 %v6405_v12  ;;  %v972_v12 = vld [vmem:[#allocation7 + $0x678] sm:$0xff]  ;;  %v6460_v17 = vcombine.low %v983_v55, %v987_v34  ;;  %v1007_v39 = vld [vmem:[#allocation7 + $0x790] sm:$0xff] }
 0x236   :  { %3141 = vmatpush1.bf16.msra.mxu1 %v6398_v48  ;;  %v6445_v48 = vcombine.high %v967_v3, %v971_v0 }
 0x237   :  { %2848 = vmatmul.mubr.bf16.gmra.mrb[40].mxu0 %v8973_v59  ;;  %3142 = vmatprep.subr.bf16.mxu1 %v6407_v6  ;;  %v6447_v6 = vcombine.high %v968_v30, %v972_v12 }
 0x238   :  { %2917 = vmatpush1.bf16.msra.mxu0 %v6404_v25  ;;  %2857 = vmatprep.mubr.bf16.mxu0 %v9023_v37  ;;  %v6444_v25 = vcombine.low %v967_v3, %v971_v0  ;;  %v1012_v3 = vld [vmem:[#allocation7 + $0x7b8] sm:$0xff] }
 0x239   :  { %3074 = vmatmul.mubr.bf16.gmra.mrb[40].mxu1 %v8973_v59  ;;  %2918 = vmatprep.subr.bf16.mxu0 %v6413_v14  ;;  %v963_v59 = vld [vmem:[#allocation7 + $0x630] sm:$0xff] }
 0x23a   :  { %3083 = vmatprep.mubr.bf16.mxu1 %v9023_v37  ;;  %3143 = vmatpush1.bf16.msra.mxu1 %v6406_v40  ;;  %v6431_v37 = vcombine.high %v952_v49, %v956_v2  ;;  %v6437_v9 = vcombine.high %v959_v63, %v963_v59  ;;  %v6436_v23 = vcombine.low %v959_v63, %v963_v59 }
 0x23b   :  { %3144 = vmatprep.subr.bf16.mxu1 %v6415_v16  ;;  %v6446_v40 = vcombine.low %v968_v30, %v972_v12  ;;  %v6455_v16 = vcombine.high %v976_v57, %v980_v46  ;;  %v6462_v2 = vcombine.low %v984_v61, %v988_v56  ;;  %v1019_v30 = vld [vmem:[#allocation7 + $0x7f0] sm:$0xff] }
 0x23c   :  { %2919 = vmatpush1.bf16.msra.mxu0 %v6412_v18 }
 0x23d   :  { %2920 = vmatprep.subr.bf16.mxu0 %v6421_v32  ;;  %v6461_v32 = vcombine.high %v983_v55, %v987_v34  ;;  %v7276_v55 = vld [vmem:[#allocation8 + $0x8] ss:$16 sps:$4 sm:$0xff]   ;;  %v7284_v34 = vld [vmem:[#allocation8 + $0x2c] ss:$16 sps:$4 sm:$0xff]  }
 0x23e   :  { %3145 = vmatpush1.bf16.msra.mxu1 %v6414_v8  ;;  %v6454_v8 = vcombine.low %v976_v57, %v980_v46  ;;  %v7278_v46 = vld [vmem:[#allocation8 + $0xc] ss:$16 sps:$4 sm:$0xff]  }
 0x23f   :  { %2858 = vmatmul.mubr.bf16.gmra.mrb[44].mxu0 %v9064_v19  ;;  %3146 = vmatprep.subr.bf16.mxu1 %v6423_v5  ;;  %v992_v5 = vld [vmem:[#allocation7 + $0x718] sm:$0xff] }
 0x240   :  { %2921 = vmatpush1.bf16.msra.mxu0 %v6420_v29  ;;  %2867 = vmatprep.mubr.bf16.mxu0 %v10583_v36  ;;  %v996_v29 = vld [vmem:[#allocation7 + $0x738] sm:$0xff] }
 0x241   :  { %3084 = vmatmul.mubr.bf16.gmra.mrb[44].mxu1 %v9064_v19  ;;  %2922 = vmatprep.subr.bf16.mxu0 %v6429_v10  ;;  %v979_v19 = vld [vmem:[#allocation7 + $0x6b0] sm:$0xff]  ;;  %v6471_v63 = vcombine.high %v992_v5, %v996_v29  ;;  %v6470_v50 = vcombine.low %v992_v5, %v996_v29  ;;  %v7300_v5 = vld [vmem:[#allocation8 + $0x88] ss:$16 sps:$4 sm:$0xff]   ;;  %v7308_v29 = vld [vmem:[#allocation8 + $0xac] ss:$16 sps:$4 sm:$0xff]  }
 0x242   :  { %3093 = vmatprep.mubr.bf16.mxu1 %v10583_v36  ;;  %3147 = vmatpush1.bf16.msra.mxu1 %v6422_v21  ;;  %v6453_v14 = vcombine.high %v975_v24, %v979_v19  ;;  %v6452_v18 = vcombine.low %v975_v24, %v979_v19  ;;  %v999_v10 = vld [vmem:[#allocation7 + $0x750] sm:$0xff]  ;;  %v1004_v36 = vld [vmem:[#allocation7 + $0x778] sm:$0xff] }
 0x243   :  { %3148 = vmatprep.subr.bf16.mxu1 %v6431_v37  ;;  %v1003_v21 = vld [vmem:[#allocation7 + $0x770] sm:$0xff]  ;;  %v1000_v37 = vld [vmem:[#allocation7 + $0x758] sm:$0xff] }
 0x244   :  { %2923 = vmatpush1.bf16.msra.mxu0 %v6428_v22  ;;  %v6477_v22 = vcombine.high %v999_v10, %v1003_v21  ;;  %v1020_v24 = vld [vmem:[#allocation7 + $0x7f8] sm:$0xff] }
 0x245   :  { %2924 = vmatprep.subr.bf16.mxu0 %v6437_v9  ;;  %v6476_v9 = vcombine.low %v999_v10, %v1003_v21  ;;  %v7309_v10 = vld [vmem:[#allocation8 + $0xc0] ss:$16 sps:$4 sm:$0xff]   ;;  %v7317_v21 = vld [vmem:[#allocation8 + $0xe4] ss:$16 sps:$4 sm:$0xff]  }
 0x246   :  { %3149 = vmatpush1.bf16.msra.mxu1 %v6430_v51  ;;  %v1008_v51 = vld [vmem:[#allocation7 + $0x798] sm:$0xff] }
 0x247   :  { %2868 = vmatmul.mubr.bf16.gmra.mrb[48].mxu0 %v9074_v27  ;;  %3150 = vmatprep.subr.bf16.mxu1 %v6439_v62  ;;  %v6478_v62 = vcombine.low %v1000_v37, %v1004_v36  ;;  %v6487_v12 = vcombine.high %v1008_v51, %v1012_v3 }
 0x248   :  { %2925 = vmatpush1.bf16.msra.mxu0 %v6436_v23  ;;  %2877 = vmatprep.mubr.bf16.mxu0 %v9113_v60  ;;  %v1015_v23 = vld [vmem:[#allocation7 + $0x7d0] sm:$0xff] }
 0x249   :  { %3094 = vmatmul.mubr.bf16.gmra.mrb[48].mxu1 %v9074_v27  ;;  %2926 = vmatprep.subr.bf16.mxu0 %v6445_v48  ;;  %v995_v27 = vld [vmem:[#allocation7 + $0x730] sm:$0xff]  ;;  %v6493_v19 = vcombine.high %v1015_v23, %v1019_v30 }
 0x24a   :  { %3103 = vmatprep.mubr.bf16.mxu1 %v9113_v60  ;;  %3151 = vmatpush1.bf16.msra.mxu1 %v6438_v45  ;;  %v6463_v60 = vcombine.high %v984_v61, %v988_v56  ;;  %v6469_v49 = vcombine.high %v991_v44, %v995_v27  ;;  %v6468_v59 = vcombine.low %v991_v44, %v995_v27  ;;  %v1016_v45 = vld [vmem:[#allocation7 + $0x7d8] sm:$0xff]  ;;  %v7285_v61 = vld [vmem:[#allocation8 + $0x40] ss:$16 sps:$4 sm:$0xff]   ;;  %v7293_v56 = vld [vmem:[#allocation8 + $0x64] ss:$16 sps:$4 sm:$0xff]  }
 0x24b   :  { %3152 = vmatprep.subr.bf16.mxu1 %v6447_v6  ;;  %v6486_v6 = vcombine.low %v1008_v51, %v1012_v3  ;;  %v6494_v57 = vcombine.low %v1016_v45, %v1020_v24  ;;  %v7294_v44 = vld [vmem:[#allocation8 + $0x68] ss:$16 sps:$4 sm:$0xff]   ;;  %v7302_v27 = vld [vmem:[#allocation8 + $0x8c] ss:$16 sps:$4 sm:$0xff]   ;;  %v7333_v51 = vld [vmem:[#allocation8 + $0x140] ss:$16 sps:$4 sm:$0xff]  }
 0x24c   :  { %2927 = vmatpush1.bf16.msra.mxu0 %v6444_v25  ;;  %v7275_v25 = vld [vmem:[#allocation8 + $0x4] ss:$16 sps:$4 sm:$0xff]  }
 0x24d   :  { %2928 = vmatprep.subr.bf16.mxu0 %v6453_v14  ;;  %v7273_v14 = vld [vmem:[#allocation8] ss:$16 sps:$4 sm:$0xff]   ;;  %v7341_v3 = vld [vmem:[#allocation8 + $0x164] ss:$16 sps:$4 sm:$0xff]  }
 0x24e   :  { %3153 = vmatpush1.bf16.msra.mxu1 %v6446_v40  ;;  %v7281_v40 = vld [vmem:[#allocation8 + $0x24] ss:$16 sps:$4 sm:$0xff]  }
 0x24f   :  { %2878 = vmatmul.mubr.bf16.gmra.mrb[52].mxu0 %v9121_v15  ;;  %3154 = vmatprep.subr.bf16.mxu1 %v6455_v16  ;;  %v7282_v16 = vld [vmem:[#allocation8 + $0x28] ss:$16 sps:$4 sm:$0xff]  }
 0x250   :  { %2929 = vmatpush1.bf16.msra.mxu0 %v6452_v18  ;;  %2887 = vmatprep.mubr.bf16.mxu0 %v9157_v4  ;;  %v7290_v18 = vld [vmem:[#allocation8 + $0x4c] ss:$16 sps:$4 sm:$0xff]  }
 0x251   :  { %3104 = vmatmul.mubr.bf16.gmra.mrb[52].mxu1 %v9121_v15  ;;  %2930 = vmatprep.subr.bf16.mxu0 %v6461_v32  ;;  %v1011_v15 = vld [vmem:[#allocation7 + $0x7b0] sm:$0xff]  ;;  %v7288_v32 = vld [vmem:[#allocation8 + $0x48] ss:$16 sps:$4 sm:$0xff]  }
 0x252   :  { %3113 = vmatprep.mubr.bf16.mxu1 %v9157_v4  ;;  %3155 = vmatpush1.bf16.msra.mxu1 %v6454_v8  ;;  %v6479_v4 = vcombine.high %v1000_v37, %v1004_v36  ;;  %v6485_v0 = vcombine.high %v1007_v39, %v1011_v15  ;;  %v6484_v48 = vcombine.low %v1007_v39, %v1011_v15  ;;  %v7296_v8 = vld [vmem:[#allocation8 + $0x6c] ss:$16 sps:$4 sm:$0xff]   ;;  %v7318_v37 = vld [vmem:[#allocation8 + $0xe8] ss:$16 sps:$4 sm:$0xff]  }
 0x253   :  { %3156 = vmatprep.subr.bf16.mxu1 %v6463_v60  ;;  %v7297_v60 = vld [vmem:[#allocation8 + $0x80] ss:$16 sps:$4 sm:$0xff]   ;;  %v7326_v36 = vld [vmem:[#allocation8 + $0x10c] ss:$16 sps:$4 sm:$0xff]   ;;  %v7324_v39 = vld [vmem:[#allocation8 + $0x108] ss:$16 sps:$4 sm:$0xff]  }
 0x254   :  { %2931 = vmatpush1.bf16.msra.mxu0 %v6460_v17  ;;  %v7305_v17 = vld [vmem:[#allocation8 + $0xa4] ss:$16 sps:$4 sm:$0xff]   ;;  %v7332_v15 = vld [vmem:[#allocation8 + $0x12c] ss:$16 sps:$4 sm:$0xff]  }
 0x255   :  { %2932 = vmatprep.subr.bf16.mxu0 %v6469_v49  ;;  %v7306_v49 = vld [vmem:[#allocation8 + $0xa8] ss:$16 sps:$4 sm:$0xff]  }
 0x256   :  { %3157 = vmatpush1.bf16.msra.mxu1 %v6462_v2  ;;  %v7314_v2 = vld [vmem:[#allocation8 + $0xcc] ss:$16 sps:$4 sm:$0xff]  }
 0x257   :  { %2888 = vmatmul.mubr.bf16.gmra.mrb[56].mxu0 %v9164_v54  ;;  %3158 = vmatprep.subr.bf16.mxu1 %v6471_v63  ;;  %v7312_v63 = vld [vmem:[#allocation8 + $0xc8] ss:$16 sps:$4 sm:$0xff]  }
 0x258   :  { %2933 = vmatpush1.bf16.msra.mxu0 %v6468_v59  ;;  %2897 = vmatprep.mubr.bf16.mxu0 %v9191_v28  ;;  %v7320_v59 = vld [vmem:[#allocation8 + $0xec] ss:$16 sps:$4 sm:$0xff]  }
 0x259   :  { %3114 = vmatmul.mubr.bf16.gmra.mrb[56].mxu1 %v9164_v54  ;;  %2934 = vmatprep.subr.bf16.mxu0 %v6477_v22  ;;  %v6495_v54 = vcombine.high %v1016_v45, %v1020_v24  ;;  %v7321_v22 = vld [vmem:[#allocation8 + $0x100] ss:$16 sps:$4 sm:$0xff]   ;;  %v7348_v45 = vld [vmem:[#allocation8 + $0x188] ss:$16 sps:$4 sm:$0xff]   ;;  %v7356_v24 = vld [vmem:[#allocation8 + $0x1ac] ss:$16 sps:$4 sm:$0xff]  }
 0x25a   :  { %3123 = vmatprep.mubr.bf16.mxu1 %v9191_v28  ;;  %3159 = vmatpush1.bf16.msra.mxu1 %v6470_v50  ;;  %v6492_v28 = vcombine.low %v1015_v23, %v1019_v30  ;;  %v7329_v50 = vld [vmem:[#allocation8 + $0x124] ss:$16 sps:$4 sm:$0xff]   ;;  %v7342_v23 = vld [vmem:[#allocation8 + $0x168] ss:$16 sps:$4 sm:$0xff]   ;;  %v7350_v30 = vld [vmem:[#allocation8 + $0x18c] ss:$16 sps:$4 sm:$0xff]  }
 0x25b   :  { %3160 = vmatprep.subr.bf16.mxu1 %v6479_v4  ;;  %v7330_v4 = vld [vmem:[#allocation8 + $0x128] ss:$16 sps:$4 sm:$0xff]  }
 0x25c   :  { %2935 = vmatpush1.bf16.msra.mxu0 %v6476_v9  ;;  %v7338_v9 = vld [vmem:[#allocation8 + $0x14c] ss:$16 sps:$4 sm:$0xff]  }
 0x25d   :  { %2936 = vmatprep.subr.bf16.mxu0 %v6485_v0  ;;  %v7336_v0 = vld [vmem:[#allocation8 + $0x148] ss:$16 sps:$4 sm:$0xff]  }
 0x25e   :  { %3161 = vmatpush1.bf16.msra.mxu1 %v6478_v62  ;;  %v7344_v62 = vld [vmem:[#allocation8 + $0x16c] ss:$16 sps:$4 sm:$0xff]  }
 0x25f   :  { %2898 = vmatmul.mubr.bf16.gmra.mrb[60].mxu0 %v9352_v53  ;;  %3162 = vmatprep.subr.bf16.mxu1 %v6487_v12  ;;  %v7345_v12 = vld [vmem:[#allocation8 + $0x180] ss:$16 sps:$4 sm:$0xff]  }
 0x260   :  { %2937 = vmatpush1.bf16.msra.mxu0 %v6484_v48  ;;  %2940 = vmatprep.mubr.bf16.mxu0 %v8898_v41  ;;  %v7353_v48 = vld [vmem:[#allocation8 + $0x1a4] ss:$16 sps:$4 sm:$0xff]  }
 0x261   :  { %3124 = vmatmul.mubr.bf16.gmra.mrb[60].mxu1 %v9352_v53  ;;  %2938 = vmatprep.subr.bf16.mxu0 %v6493_v19  ;;  %v7279_v53 = vld [vmem:[#allocation8 + $0x20] ss:$16 sps:$4 sm:$0xff]   ;;  %v7354_v19 = vld [vmem:[#allocation8 + $0x1a8] ss:$16 sps:$4 sm:$0xff]  }
 0x262   :  { %3163 = vmatpush1.bf16.msra.mxu1 %v6486_v6  ;;  %3166 = vmatprep.mubr.bf16.mxu1 %v8898_v41  ;;  %v7287_v41 = vld [vmem:[#allocation8 + $0x44] ss:$16 sps:$4 sm:$0xff]   ;;  %v7362_v6 = vld [vmem:[#allocation8 + $0x1cc] ss:$16 sps:$4 sm:$0xff]  }
 0x263   :  { %3164 = vmatprep.subr.bf16.mxu1 %v6495_v54  ;;  %v7357_v54 = vld [vmem:[#allocation8 + $0x1c0] ss:$16 sps:$4 sm:$0xff]  }
 0x264   :  { %2939 = vmatpush1.bf16.msra.mxu0 %v6492_v28  ;;  %v7365_v28 = vld [vmem:[#allocation8 + $0x1e4] ss:$16 sps:$4 sm:$0xff]  }
 0x265   :  { %4869 = vmatprep.subr.bf16.mxu0 %v7275_v25  ;;  %v7360_v25 = vld [vmem:[#allocation8 + $0x1c8] ss:$16 sps:$4 sm:$0xff]  }
 0x266   :  { %3165 = vmatpush1.bf16.msra.mxu1 %v6494_v57  ;;  %v7368_v57 = vld [vmem:[#allocation8 + $0x1ec] ss:$16 sps:$4 sm:$0xff]  }
 0x267   :  { %2941 = vmatmul.mubr.bf16.vlgmr.msra.gmra.mrb[32].mxu0 %v8934_v58  ;;  %5321 = vmatprep.subr.bf16.mxu1 %v7278_v46  ;;  %v7366_v46 = vld [vmem:[#allocation8 + $0x1e8] ss:$16 sps:$4 sm:$0xff]  }
 0x268   :  { %2950 = vmatprep.mubr.bf16.mxu0 %v9050_v43  ;;  %4870 = vmatpush1.bf16.msra.mxu0 %v7273_v14  ;;  %v7374_v14 = vld [vmem:[#allocation8 + $0x20c] ss:$16 sps:$4 sm:$0xff]  }
 0x269   :  { %3167 = vmatmul.mubr.bf16.vlgmr.msra.gmra.mrb[32].mxu1 %v8934_v58  ;;  %4871 = vmatprep.subr.bf16.mxu0 %v7281_v40  ;;  %v7291_v58 = vld [vmem:[#allocation8 + $0x60] ss:$16 sps:$4 sm:$0xff]  }
 0x26a   :  { %3176 = vmatprep.mubr.bf16.mxu1 %v9050_v43  ;;  %5322 = vmatpush1.bf16.msra.mxu1 %v7276_v55  ;;  %v7299_v43 = vld [vmem:[#allocation8 + $0x84] ss:$16 sps:$4 sm:$0xff]   ;;  %v9494_v40 = vld [vmem:[%s10213_s4] sm:$0xff] }
 0x26b   :  { %5323 = vmatprep.subr.bf16.mxu1 %v7284_v34  ;;  %v10584_v55 = vld [vmem:[#allocation59_spill] sm:$0xff] }
 0x26c   :  { %4872 = vmatpush1.bf16.msra.mxu0 %v7279_v53  ;;  %v9498_v34 = vrot.slane %v9494_v40, %v10584_v55  ;;  %v10585_v53 = vld [vmem:[#allocation61_spill] sm:$0xff] }
 0x26d   :  { %4873 = vmatprep.subr.bf16.mxu0 %v7287_v41  ;;  %v9502_v41 = vrot.slane %v9494_v40, %v10585_v53 }
 0x26e   :  { %5324 = vmatpush1.bf16.msra.mxu1 %v7282_v16  ;;  %v10586_v16 = vld [vmem:[#allocation58_spill] sm:$0xff] }
 0x26f   :  { %2951 = vmatmul.mubr.bf16.gmra.mrb[36].mxu0 %v9182_v33  ;;  %5325 = vmatprep.subr.bf16.mxu1 %v7290_v18  ;;  %v9506_v18 = vrot.slane %v9494_v40, %v10586_v16 }
 0x270   :  { %2960 = vmatprep.mubr.bf16.mxu0 %v9229_v42  ;;  %4874 = vmatpush1.bf16.msra.mxu0 %v7285_v61 }
 0x271   :  { %3177 = vmatmul.mubr.bf16.gmra.mrb[36].mxu1 %v9182_v33  ;;  %4875 = vmatprep.subr.bf16.mxu0 %v7293_v56  ;;  %v7303_v33 = vld [vmem:[#allocation8 + $0xa0] ss:$16 sps:$4 sm:$0xff]  }
 0x272   :  { %3186 = vmatprep.mubr.bf16.mxu1 %v9229_v42  ;;  %5326 = vmatpush1.bf16.msra.mxu1 %v7288_v32  ;;  %v7311_v42 = vld [vmem:[#allocation8 + $0xc4] ss:$16 sps:$4 sm:$0xff]   ;;  %v10587_v32 = vld [vmem:[#allocation60_spill] sm:$0xff] }
 0x273   :  { %5327 = vmatprep.subr.bf16.mxu1 %v7296_v8  ;;  %v9510_v8 = vrot.slane %v9494_v40, %v10587_v32 }
 0x274   :  { %4876 = vmatpush1.bf16.msra.mxu0 %v7291_v58 }
 0x275   :  { %4877 = vmatprep.subr.bf16.mxu0 %v7299_v43 }
 0x276   :  { %5328 = vmatpush1.bf16.msra.mxu1 %v7294_v44 }
 0x277   :  { %2961 = vmatmul.mubr.bf16.gmra.mrb[40].mxu0 %v9250_v52  ;;  %5329 = vmatprep.subr.bf16.mxu1 %v7302_v27 }
 0x278   :  { %2970 = vmatprep.mubr.bf16.mxu0 %v9258_v38  ;;  %4878 = vmatpush1.bf16.msra.mxu0 %v7297_v60 }
 0x279   :  { %3187 = vmatmul.mubr.bf16.gmra.mrb[40].mxu1 %v9250_v52  ;;  %4879 = vmatprep.subr.bf16.mxu0 %v7305_v17  ;;  %v7315_v52 = vld [vmem:[#allocation8 + $0xe0] ss:$16 sps:$4 sm:$0xff]  }
 0x27a   :  { %3196 = vmatprep.mubr.bf16.mxu1 %v9258_v38  ;;  %5330 = vmatpush1.bf16.msra.mxu1 %v7300_v5  ;;  %v7323_v38 = vld [vmem:[#allocation8 + $0x104] ss:$16 sps:$4 sm:$0xff]  }
 0x27b   :  { %5331 = vmatprep.subr.bf16.mxu1 %v7308_v29 }
 0x27c   :  { %4880 = vmatpush1.bf16.msra.mxu0 %v7303_v33 }
 0x27d   :  { %4881 = vmatprep.subr.bf16.mxu0 %v7311_v42 }
 0x27e   :  { %5332 = vmatpush1.bf16.msra.mxu1 %v7306_v49 }
 0x27f   :  { %2971 = vmatmul.mubr.bf16.gmra.mrb[44].mxu0 %v9268_v7  ;;  %5333 = vmatprep.subr.bf16.mxu1 %v7314_v2 }
 0x280   :  { %2980 = vmatprep.mubr.bf16.mxu0 %v9296_v20  ;;  %4882 = vmatpush1.bf16.msra.mxu0 %v7309_v10 }
 0x281   :  { %3197 = vmatmul.mubr.bf16.gmra.mrb[44].mxu1 %v9268_v7  ;;  %4883 = vmatprep.subr.bf16.mxu0 %v7317_v21  ;;  %v7327_v7 = vld [vmem:[#allocation8 + $0x120] ss:$16 sps:$4 sm:$0xff]  }
 0x282   :  { %3206 = vmatprep.mubr.bf16.mxu1 %v9296_v20  ;;  %5334 = vmatpush1.bf16.msra.mxu1 %v7312_v63  ;;  %v7335_v20 = vld [vmem:[#allocation8 + $0x144] ss:$16 sps:$4 sm:$0xff]  }
 0x283   :  { %5335 = vmatprep.subr.bf16.mxu1 %v7320_v59 }
 0x284   :  { %4884 = vmatpush1.bf16.msra.mxu0 %v7315_v52  ;;  %v7369_v52 = vld [vmem:[#allocation8 + $0x200] ss:$16 sps:$4 sm:$0xff]  }
 0x285   :  { %4885 = vmatprep.subr.bf16.mxu0 %v7323_v38  ;;  %v7372_v38 = vld [vmem:[#allocation8 + $0x208] ss:$16 sps:$4 sm:$0xff]  }
 0x286   :  { %5336 = vmatpush1.bf16.msra.mxu1 %v7318_v37 }
 0x287   :  { %2981 = vmatmul.mubr.bf16.gmra.mrb[48].mxu0 %v9317_v11  ;;  %5337 = vmatprep.subr.bf16.mxu1 %v7326_v36  ;;  %v7377_v36 = vld [vmem:[#allocation8 + $0x224] ss:$16 sps:$4 sm:$0xff]  }
 0x288   :  { %2990 = vmatprep.mubr.bf16.mxu0 %v9325_v35  ;;  %4886 = vmatpush1.bf16.msra.mxu0 %v7321_v22  ;;  %v7380_v22 = vld [vmem:[#allocation8 + $0x22c] ss:$16 sps:$4 sm:$0xff]  }
 0x289   :  { %3207 = vmatmul.mubr.bf16.gmra.mrb[48].mxu1 %v9317_v11  ;;  %4887 = vmatprep.subr.bf16.mxu0 %v7329_v50  ;;  %v7339_v11 = vld [vmem:[#allocation8 + $0x160] ss:$16 sps:$4 sm:$0xff]  }
 0x28a   :  { %3216 = vmatprep.mubr.bf16.mxu1 %v9325_v35  ;;  %5338 = vmatpush1.bf16.msra.mxu1 %v7324_v39  ;;  %v7347_v35 = vld [vmem:[#allocation8 + $0x184] ss:$16 sps:$4 sm:$0xff]  }
 0x28b   :  { %5339 = vmatprep.subr.bf16.mxu1 %v7332_v15 }
 0x28c   :  { %4888 = vmatpush1.bf16.msra.mxu0 %v7327_v7 }
 0x28d   :  { %4889 = vmatprep.subr.bf16.mxu0 %v7335_v20 }
 0x28e   :  { %5340 = vmatpush1.bf16.msra.mxu1 %v7330_v4  ;;  %v7375_v4 = vld [vmem:[#allocation8 + $0x220] ss:$16 sps:$4 sm:$0xff]  }
 0x28f   :  { %2991 = vmatmul.mubr.bf16.gmra.mrb[52].mxu0 %v9335_v47  ;;  %5341 = vmatprep.subr.bf16.mxu1 %v7338_v9  ;;  %v7378_v9 = vld [vmem:[#allocation8 + $0x228] ss:$16 sps:$4 sm:$0xff]  }
 0x290   :  { %3000 = vmatprep.mubr.bf16.mxu0 %v9362_v13  ;;  %4890 = vmatpush1.bf16.msra.mxu0 %v7333_v51 }
 0x291   :  { %3217 = vmatmul.mubr.bf16.gmra.mrb[52].mxu1 %v9335_v47  ;;  %4891 = vmatprep.subr.bf16.mxu0 %v7341_v3  ;;  %v7351_v47 = vld [vmem:[#allocation8 + $0x1a0] ss:$16 sps:$4 sm:$0xff]  }
 0x292   :  { %3226 = vmatprep.mubr.bf16.mxu1 %v9362_v13  ;;  %5342 = vmatpush1.bf16.msra.mxu1 %v7336_v0  ;;  %v7359_v13 = vld [vmem:[#allocation8 + $0x1c4] ss:$16 sps:$4 sm:$0xff]  }
 0x293   :  { %5343 = vmatprep.subr.bf16.mxu1 %v7344_v62 }
 0x294   :  { %4892 = vmatpush1.bf16.msra.mxu0 %v7339_v11  ;;  %v7383_v11 = vld [vmem:[#allocation8 + $0x244] ss:$16 sps:$4 sm:$0xff]  }
 0x295   :  { %4893 = vmatprep.subr.bf16.mxu0 %v7347_v35  ;;  %v7386_v35 = vld [vmem:[#allocation8 + $0x24c] ss:$16 sps:$4 sm:$0xff]  }
 0x296   :  { %5344 = vmatpush1.bf16.msra.mxu1 %v7342_v23 }
 0x297   :  { %3001 = vmatmul.mubr.bf16.gmra.mrb[56].mxu0 %v9381_v1  ;;  %5345 = vmatprep.subr.bf16.mxu1 %v7350_v30 }
 0x298   :  { %3010 = vmatprep.mubr.bf16.mxu0 %v9389_v26  ;;  %4894 = vmatpush1.bf16.msra.mxu0 %v7345_v12 }
 0x299   :  { %3227 = vmatmul.mubr.bf16.gmra.mrb[56].mxu1 %v9381_v1  ;;  %4895 = vmatprep.subr.bf16.mxu0 %v7353_v48  ;;  %v7363_v1 = vld [vmem:[#allocation8 + $0x1e0] ss:$16 sps:$4 sm:$0xff]  }
 0x29a   :  { %3236 = vmatprep.mubr.bf16.mxu1 %v9389_v26  ;;  %5346 = vmatpush1.bf16.msra.mxu1 %v7348_v45  ;;  %v7371_v26 = vld [vmem:[#allocation8 + $0x204] ss:$16 sps:$4 sm:$0xff]  }
 0x29b   :  { %5347 = vmatprep.subr.bf16.mxu1 %v7356_v24 }
 0x29c   :  { %4896 = vmatpush1.bf16.msra.mxu0 %v7351_v47 }
 0x29d   :  { %4897 = vmatprep.subr.bf16.mxu0 %v7359_v13 }
 0x29e   :  { %5348 = vmatpush1.bf16.msra.mxu1 %v7354_v19 }
 0x29f   :  { %3011 = vmatmul.mubr.bf16.gmra.mrb[60].mxu0 %v9395_v31  ;;  %5349 = vmatprep.subr.bf16.mxu1 %v7362_v6 }
 0x2a0   :  { %4898 = vmatpush1.bf16.msra.mxu0 %v7357_v54  ;;  %v7381_v54 = vld [vmem:[#allocation8 + $0x240] ss:$16 sps:$4 sm:$0xff]  }
 0x2a1   :  { %3237 = vmatmul.mubr.bf16.gmra.mrb[60].mxu1 %v9395_v31  ;;  %4899 = vmatprep.subr.bf16.mxu0 %v7365_v28  ;;  %v7384_v28 = vld [vmem:[#allocation8 + $0x248] ss:$16 sps:$4 sm:$0xff]  }
 0x2a2   :  { %5350 = vmatpush1.bf16.msra.mxu1 %v7360_v25 }
 0x2a3   :  { %5351 = vmatprep.subr.bf16.mxu1 %v7368_v57  ;;  %v7389_v57 = vld [vmem:[#allocation8 + $0x264] ss:$16 sps:$4 sm:$0xff]  }
 0x2a4   :  { %4900 = vmatpush1.bf16.msra.mxu0 %v7363_v1  ;;  %v7392_v1 = vld [vmem:[#allocation8 + $0x26c] ss:$16 sps:$4 sm:$0xff]  }
 0x2a5   :  { %4982 = vmatprep.subr.bf16.mxu0 %v7371_v26 }
 0x2a6   :  { %5352 = vmatpush1.bf16.msra.mxu1 %v7366_v46 }
 0x2a7   :  { %5434 = vmatprep.subr.bf16.mxu1 %v7374_v14 }
 0x2ba   :  { %v2490_v31 = vpop.f32.mrb[0].mxu0 }
 0x2bb   :  { %v2716_v61 = vpop.f32.mrb[0].mxu1  ;;  %v2492_v56 = vpop.f32.mrb[1].mxu0  ;;  %v6752_v44 = vadd.f32 %v2490_v31, %v9498_v34 }
 0x2bc   :  { %v2718_v58 = vpop.f32.mrb[1].mxu1  ;;  %v2494_v43 = vpop.f32.mrb[2].mxu0  ;;  %v6784_v5 = vadd.f32 %v2716_v61, %v9502_v41  ;;  %v6753_v29 = vadd.f32 %v2492_v56, %v9506_v18  ;;  %v7387_v56 = vld [vmem:[#allocation8 + $0x260] ss:$16 sps:$4 sm:$0xff]  }
 0x2bd   :  { %v6754_v27 = vadd.f32 %v2494_v43, %v9498_v34  ;;  %v2720_v60 = vpop.f32.mrb[2].mxu1  ;;  %v2496_v17 = vpop.f32.mrb[3].mxu0  ;;  %v6785_v2 = vadd.f32 %v2718_v58, %v9510_v8  ;;  %v7390_v58 = vld [vmem:[#allocation8 + $0x268] ss:$16 sps:$4 sm:$0xff]  }
 0x2be   :  { %v6786_v33 = vadd.f32 %v2720_v60, %v9502_v41  ;;  %v6755_v42 = vadd.f32 %v2496_v17, %v9506_v18  ;;  %v2722_v49 = vpop.f32.mrb[3].mxu1  ;;  %v7395_v17 = vld [vmem:[#allocation8 + $0x284] ss:$16 sps:$4 sm:$0xff]  }
 0x2bf   :  { %v3247_v10 = vpack.c.bf16 %v6754_v27, %v6752_v44  ;;  %v6787_v21 = vadd.f32 %v2722_v49, %v9510_v8 }
 0x2c0   :  { %v9520_v63 = vpack.c.bf16 %v6786_v33, %v6784_v5  ;;  %v3248_v59 = vpack.c.bf16 %v6755_v42, %v6753_v29  ;;  %v7398_v5 = vld [vmem:[#allocation8 + $0x28c] ss:$16 sps:$4 sm:$0xff]  }
 0x2c1   :  { %v9522_v37 = vpack.c.bf16 %v6787_v21, %v6785_v2 }
 0x2c2   :  { %v2500_v50 = vpop.f32.mrb[4].mxu0  ;;  %4901 = vmatprep.mubr.bf16.mxu0 %v3248_v59  ;;  %5353 = vmatprep.mubr.bf16.mxu1 %v3248_v59 }
 0x2c3   :  { %v2726_v39 = vpop.f32.mrb[4].mxu1  ;;  %v2502_v15 = vpop.f32.mrb[5].mxu0  ;;  %4902 = vmatmul.mubr.bf16.vlgmr.msra.gmra.mrb[64].mxu0 %v3247_v10  ;;  %5354 = vmatmul.mubr.bf16.vlgmr.msra.gmra.mrb[64].mxu1 %v3247_v10  ;;  %v6756_v51 = vadd.f32 %v2500_v50, %v9498_v34 }
 0x2c4   :  { %v2728_v7 = vpop.f32.mrb[5].mxu1  ;;  %4983 = vmatpush1.bf16.msra.mxu0 %v7369_v52  ;;  %5435 = vmatpush1.bf16.msra.mxu1 %v7372_v38  ;;  %v2504_v20 = vpop.f32.mrb[6].mxu0  ;;  %v6788_v23 = vadd.f32 %v2726_v39, %v9502_v41  ;;  %v6757_v30 = vadd.f32 %v2502_v15, %v9506_v18  ;;  %v7401_v39 = vld [vmem:[#allocation8 + $0x2a4] ss:$16 sps:$4 sm:$0xff]   ;;  %v7404_v15 = vld [vmem:[#allocation8 + $0x2ac] ss:$16 sps:$4 sm:$0xff]  }
 0x2c5   :  { %v6758_v3 = vadd.f32 %v2504_v20, %v9498_v34  ;;  %v2730_v0 = vpop.f32.mrb[6].mxu1  ;;  %v2506_v62 = vpop.f32.mrb[7].mxu0  ;;  %4984 = vmatprep.subr.bf16.mxu0 %v7377_v36  ;;  %5436 = vmatprep.subr.bf16.mxu1 %v7380_v22  ;;  %v6789_v24 = vadd.f32 %v2728_v7, %v9510_v8  ;;  %v7393_v36 = vld [vmem:[#allocation8 + $0x280] ss:$16 sps:$4 sm:$0xff]   ;;  %v7396_v22 = vld [vmem:[#allocation8 + $0x288] ss:$16 sps:$4 sm:$0xff]  }
 0x2c6   :  { %v6790_v12 = vadd.f32 %v2730_v0, %v9502_v41  ;;  %v6759_v48 = vadd.f32 %v2506_v62, %v9506_v18  ;;  %v2732_v45 = vpop.f32.mrb[7].mxu1  ;;  %v7402_v0 = vld [vmem:[#allocation8 + $0x2a8] ss:$16 sps:$4 sm:$0xff]  }
 0x2c7   :  { %v3255_v47 = vpack.c.bf16 %v6758_v3, %v6756_v51  ;;  %v6791_v13 = vadd.f32 %v2732_v45, %v9510_v8  ;;  %v7399_v3 = vld [vmem:[#allocation8 + $0x2a0] ss:$16 sps:$4 sm:$0xff]  }
 0x2c8   :  { %v9532_v19 = vpack.c.bf16 %v6790_v12, %v6788_v23  ;;  %v3256_v6 = vpack.c.bf16 %v6759_v48, %v6757_v30  ;;  %4985 = vmatpush1.bf16.msra.mxu0 %v7375_v4  ;;  %5437 = vmatpush1.bf16.msra.mxu1 %v7378_v9  ;;  %v7407_v30 = vld [vmem:[#allocation8 + $0x2c4] ss:$16 sps:$4 sm:$0xff]   ;;  %v7410_v12 = vld [vmem:[#allocation8 + $0x2cc] ss:$16 sps:$4 sm:$0xff]  }
 0x2c9   :  { %v9534_v25 = vpack.c.bf16 %v6791_v13, %v6789_v24  ;;  %4986 = vmatprep.subr.bf16.mxu0 %v7383_v11  ;;  %5438 = vmatprep.subr.bf16.mxu1 %v7386_v35 }
 0x2ca   :  { %v2510_v26 = vpop.f32.mrb[8].mxu0  ;;  %4911 = vmatprep.mubr.bf16.mxu0 %v3256_v6  ;;  %5363 = vmatprep.mubr.bf16.mxu1 %v3256_v6 }
 0x2cb   :  { %v2736_v46 = vpop.f32.mrb[8].mxu1  ;;  %v2512_v14 = vpop.f32.mrb[9].mxu0  ;;  %4912 = vmatmul.mubr.bf16.gmra.mrb[68].mxu0 %v3255_v47  ;;  %5364 = vmatmul.mubr.bf16.gmra.mrb[68].mxu1 %v3255_v47  ;;  %v6760_v43 = vadd.f32 %v2510_v26, %v9498_v34  ;;  %v7405_v26 = vld [vmem:[#allocation8 + $0x2c0] ss:$16 sps:$4 sm:$0xff]  }
 0x2cc   :  { %v2738_v31 = vpop.f32.mrb[9].mxu1  ;;  %4987 = vmatpush1.bf16.msra.mxu0 %v7381_v54  ;;  %5439 = vmatpush1.bf16.msra.mxu1 %v7384_v28  ;;  %v2514_v61 = vpop.f32.mrb[10].mxu0  ;;  %v6792_v29 = vadd.f32 %v2736_v46, %v9502_v41  ;;  %v6761_v33 = vadd.f32 %v2512_v14, %v9506_v18  ;;  %v7408_v46 = vld [vmem:[#allocation8 + $0x2c8] ss:$16 sps:$4 sm:$0xff]  }
 0x2cd   :  { %v6762_v44 = vadd.f32 %v2514_v61, %v9498_v34  ;;  %v2740_v27 = vpop.f32.mrb[10].mxu1  ;;  %v2516_v60 = vpop.f32.mrb[11].mxu0  ;;  %4988 = vmatprep.subr.bf16.mxu0 %v7389_v57  ;;  %5440 = vmatprep.subr.bf16.mxu1 %v7392_v1  ;;  %v6793_v10 = vadd.f32 %v2738_v31, %v9510_v8  ;;  %v7413_v31 = vld [vmem:[#allocation8 + $0x2e4] ss:$16 sps:$4 sm:$0xff]   ;;  %v7416_v61 = vld [vmem:[#allocation8 + $0x2ec] ss:$16 sps:$4 sm:$0xff]  }
 0x2ce   :  { %v6794_v42 = vadd.f32 %v2740_v27, %v9502_v41  ;;  %v6763_v49 = vadd.f32 %v2516_v60, %v9506_v18  ;;  %v2742_v2 = vpop.f32.mrb[11].mxu1  ;;  %v7411_v60 = vld [vmem:[#allocation8 + $0x2e0] ss:$16 sps:$4 sm:$0xff]  }
 0x2cf   :  { %v3263_v21 = vpack.c.bf16 %v6762_v44, %v6760_v43  ;;  %v6795_v59 = vadd.f32 %v2742_v2, %v9510_v8  ;;  %v7422_v2 = vld [vmem:[#allocation8 + $0x30c] ss:$16 sps:$4 sm:$0xff]  }
 0x2d0   :  { %v9544_v52 = vpack.c.bf16 %v6794_v42, %v6792_v29  ;;  %v3264_v38 = vpack.c.bf16 %v6763_v49, %v6761_v33  ;;  %4989 = vmatpush1.bf16.msra.mxu0 %v7387_v56  ;;  %5441 = vmatpush1.bf16.msra.mxu1 %v7390_v58  ;;  %v7419_v49 = vld [vmem:[#allocation8 + $0x304] ss:$16 sps:$4 sm:$0xff]  }
 0x2d1   :  { %v9546_v50 = vpack.c.bf16 %v6795_v59, %v6793_v10  ;;  %4990 = vmatprep.subr.bf16.mxu0 %v7395_v17  ;;  %5442 = vmatprep.subr.bf16.mxu1 %v7398_v5  ;;  %v7414_v17 = vld [vmem:[#allocation8 + $0x2e8] ss:$16 sps:$4 sm:$0xff]  }
 0x2d2   :  { %v2520_v7 = vpop.f32.mrb[12].mxu0  ;;  %4921 = vmatprep.mubr.bf16.mxu0 %v3264_v38  ;;  %5373 = vmatprep.mubr.bf16.mxu1 %v3264_v38 }
 0x2d3   :  { %v2746_v20 = vpop.f32.mrb[12].mxu1  ;;  %v2522_v4 = vpop.f32.mrb[13].mxu0  ;;  %4922 = vmatmul.mubr.bf16.gmra.mrb[72].mxu0 %v3263_v21  ;;  %5374 = vmatmul.mubr.bf16.gmra.mrb[72].mxu1 %v3263_v21  ;;  %v6764_v62 = vadd.f32 %v2520_v7, %v9498_v34 }
 0x2d4   :  { %v2748_v9 = vpop.f32.mrb[13].mxu1  ;;  %4991 = vmatpush1.bf16.msra.mxu0 %v7393_v36  ;;  %5443 = vmatpush1.bf16.msra.mxu1 %v7396_v22  ;;  %v2524_v51 = vpop.f32.mrb[14].mxu0  ;;  %v6796_v48 = vadd.f32 %v2746_v20, %v9502_v41  ;;  %v6765_v45 = vadd.f32 %v2522_v4, %v9506_v18  ;;  %v7417_v4 = vld [vmem:[#allocation8 + $0x300] ss:$16 sps:$4 sm:$0xff]  }
 0x2d5   :  { %v6766_v11 = vadd.f32 %v2524_v51, %v9498_v34  ;;  %v2750_v35 = vpop.f32.mrb[14].mxu1  ;;  %v2526_v23 = vpop.f32.mrb[15].mxu0  ;;  %4992 = vmatprep.subr.bf16.mxu0 %v7401_v39  ;;  %5444 = vmatprep.subr.bf16.mxu1 %v7404_v15  ;;  %v6797_v6 = vadd.f32 %v2748_v9, %v9510_v8  ;;  %v7420_v9 = vld [vmem:[#allocation8 + $0x308] ss:$16 sps:$4 sm:$0xff]  }
 0x2d6   :  { %v6798_v24 = vadd.f32 %v2750_v35, %v9502_v41  ;;  %v6767_v47 = vadd.f32 %v2526_v23, %v9506_v18  ;;  %v2752_v13 = vpop.f32.mrb[15].mxu1 }
 0x2d7   :  { %v3271_v54 = vpack.c.bf16 %v6766_v11, %v6764_v62  ;;  %v6799_v28 = vadd.f32 %v2752_v13, %v9510_v8 }
 0x2d8   :  { %v9556_v57 = vpack.c.bf16 %v6798_v24, %v6796_v48  ;;  %v3272_v1 = vpack.c.bf16 %v6767_v47, %v6765_v45  ;;  %4993 = vmatpush1.bf16.msra.mxu0 %v7399_v3  ;;  %5445 = vmatpush1.bf16.msra.mxu1 %v7402_v0  ;;  %v7425_v3 = vld [vmem:[#allocation8 + $0x324] ss:$16 sps:$4 sm:$0xff]   ;;  %v7428_v0 = vld [vmem:[#allocation8 + $0x32c] ss:$16 sps:$4 sm:$0xff]   ;;  %v7426_v48 = vld [vmem:[#allocation8 + $0x328] ss:$16 sps:$4 sm:$0xff]  }
 0x2d9   :  { %v9558_v14 = vpack.c.bf16 %v6799_v28, %v6797_v6  ;;  %4994 = vmatprep.subr.bf16.mxu0 %v7407_v30  ;;  %5446 = vmatprep.subr.bf16.mxu1 %v7410_v12  ;;  %v7423_v12 = vld [vmem:[#allocation8 + $0x320] ss:$16 sps:$4 sm:$0xff]   ;;  %v7431_v6 = vld [vmem:[#allocation8 + $0x344] ss:$16 sps:$4 sm:$0xff]  }
 0x2da   :  { %v2530_v56 = vpop.f32.mrb[16].mxu0  ;;  %4931 = vmatprep.mubr.bf16.mxu0 %v3272_v1  ;;  %5383 = vmatprep.mubr.bf16.mxu1 %v3272_v1 }
 0x2db   :  { %v2756_v58 = vpop.f32.mrb[16].mxu1  ;;  %v2532_v43 = vpop.f32.mrb[17].mxu0  ;;  %4932 = vmatmul.mubr.bf16.gmra.mrb[76].mxu0 %v3271_v54  ;;  %5384 = vmatmul.mubr.bf16.gmra.mrb[76].mxu1 %v3271_v54  ;;  %v6768_v5 = vadd.f32 %v2530_v56, %v9498_v34  ;;  %v7434_v54 = vld [vmem:[#allocation8 + $0x34c] ss:$16 sps:$4 sm:$0xff]  }
 0x2dc   :  { %v2758_v44 = vpop.f32.mrb[17].mxu1  ;;  %4995 = vmatpush1.bf16.msra.mxu0 %v7405_v26  ;;  %5447 = vmatpush1.bf16.msra.mxu1 %v7408_v46  ;;  %v2534_v27 = vpop.f32.mrb[18].mxu0  ;;  %v6800_v10 = vadd.f32 %v2756_v58, %v9502_v41  ;;  %v6769_v21 = vadd.f32 %v2532_v43, %v9506_v18 }
 0x2dd   :  { %v6770_v29 = vadd.f32 %v2534_v27, %v9498_v34  ;;  %v2760_v33 = vpop.f32.mrb[18].mxu1  ;;  %v2536_v42 = vpop.f32.mrb[19].mxu0  ;;  %4996 = vmatprep.subr.bf16.mxu0 %v7413_v31  ;;  %5448 = vmatprep.subr.bf16.mxu1 %v7416_v61  ;;  %v6801_v22 = vadd.f32 %v2758_v44, %v9510_v8  ;;  %v7429_v27 = vld [vmem:[#allocation8 + $0x340] ss:$16 sps:$4 sm:$0xff]  }
 0x2de   :  { %v6802_v59 = vadd.f32 %v2760_v33, %v9502_v41  ;;  %v6771_v38 = vadd.f32 %v2536_v42, %v9506_v18  ;;  %v2762_v36 = vpop.f32.mrb[19].mxu1 }
 0x2df   :  { %v3279_v39 = vpack.c.bf16 %v6770_v29, %v6768_v5  ;;  %v6803_v15 = vadd.f32 %v2762_v36, %v9510_v8  ;;  %v7437_v5 = vld [vmem:[#allocation8 + $0x364] ss:$16 sps:$4 sm:$0xff]   ;;  %v7440_v29 = vld [vmem:[#allocation8 + $0x36c] ss:$16 sps:$4 sm:$0xff]  }
 0x2e0   :  { %v9568_v7 = vpack.c.bf16 %v6802_v59, %v6800_v10  ;;  %v3280_v20 = vpack.c.bf16 %v6771_v38, %v6769_v21  ;;  %4997 = vmatpush1.bf16.msra.mxu0 %v7411_v60  ;;  %5449 = vmatpush1.bf16.msra.mxu1 %v7414_v17  ;;  %v7432_v60 = vld [vmem:[#allocation8 + $0x348] ss:$16 sps:$4 sm:$0xff]   ;;  %v7435_v21 = vld [vmem:[#allocation8 + $0x360] ss:$16 sps:$4 sm:$0xff]  }
 0x2e1   :  { %v9570_v51 = vpack.c.bf16 %v6803_v15, %v6801_v22  ;;  %4998 = vmatprep.subr.bf16.mxu0 %v7419_v49  ;;  %5450 = vmatprep.subr.bf16.mxu1 %v7422_v2  ;;  %v7438_v59 = vld [vmem:[#allocation8 + $0x368] ss:$16 sps:$4 sm:$0xff]   ;;  %v7443_v15 = vld [vmem:[#allocation8 + $0x384] ss:$16 sps:$4 sm:$0xff]  }
 0x2e2   :  { %v2540_v62 = vpop.f32.mrb[20].mxu0  ;;  %4941 = vmatprep.mubr.bf16.mxu0 %v3280_v20  ;;  %5393 = vmatprep.mubr.bf16.mxu1 %v3280_v20  ;;  %v7446_v20 = vld [vmem:[#allocation8 + $0x38c] ss:$16 sps:$4 sm:$0xff]  }
 0x2e3   :  { %v2766_v11 = vpop.f32.mrb[20].mxu1  ;;  %v2542_v35 = vpop.f32.mrb[21].mxu0  ;;  %4942 = vmatmul.mubr.bf16.gmra.mrb[80].mxu0 %v3279_v39  ;;  %5394 = vmatmul.mubr.bf16.gmra.mrb[80].mxu1 %v3279_v39  ;;  %v6772_v45 = vadd.f32 %v2540_v62, %v9498_v34 }
 0x2e4   :  { %v2768_v23 = vpop.f32.mrb[21].mxu1  ;;  %4999 = vmatpush1.bf16.msra.mxu0 %v7417_v4  ;;  %5451 = vmatpush1.bf16.msra.mxu1 %v7420_v9  ;;  %v2544_v30 = vpop.f32.mrb[22].mxu0  ;;  %v6804_v28 = vadd.f32 %v2766_v11, %v9502_v41  ;;  %v6773_v1 = vadd.f32 %v2542_v35, %v9506_v18 }
 0x2e5   :  { %v6774_v24 = vadd.f32 %v2544_v30, %v9498_v34  ;;  %v2770_v47 = vpop.f32.mrb[22].mxu1  ;;  %v2546_v13 = vpop.f32.mrb[23].mxu0  ;;  %5000 = vmatprep.subr.bf16.mxu0 %v7425_v3  ;;  %5452 = vmatprep.subr.bf16.mxu1 %v7428_v0  ;;  %v6805_v61 = vadd.f32 %v2768_v23, %v9510_v8 }
 0x2e6   :  { %v6806_v26 = vadd.f32 %v2770_v47, %v9502_v41  ;;  %v6775_v46 = vadd.f32 %v2546_v13, %v9506_v18  ;;  %v2772_v31 = vpop.f32.mrb[23].mxu1  ;;  %v7449_v47 = vld [vmem:[#allocation8 + $0x3a4] ss:$16 sps:$4 sm:$0xff]   ;;  %v7452_v13 = vld [vmem:[#allocation8 + $0x3ac] ss:$16 sps:$4 sm:$0xff]  }
 0x2e7   :  { %v3287_v56 = vpack.c.bf16 %v6774_v24, %v6772_v45  ;;  %v6807_v58 = vadd.f32 %v2772_v31, %v9510_v8  ;;  %v7444_v45 = vld [vmem:[#allocation8 + $0x388] ss:$16 sps:$4 sm:$0xff]  }
 0x2e8   :  { %v9580_v43 = vpack.c.bf16 %v6806_v26, %v6804_v28  ;;  %v3288_v44 = vpack.c.bf16 %v6775_v46, %v6773_v1  ;;  %5001 = vmatpush1.bf16.msra.mxu0 %v7423_v12  ;;  %5453 = vmatpush1.bf16.msra.mxu1 %v7426_v48  ;;  %v7441_v48 = vld [vmem:[#allocation8 + $0x380] ss:$16 sps:$4 sm:$0xff]   ;;  %v7450_v31 = vld [vmem:[#allocation8 + $0x3a8] ss:$16 sps:$4 sm:$0xff]  }
 0x2e9   :  { %v9582_v17 = vpack.c.bf16 %v6807_v58, %v6805_v61  ;;  %5002 = vmatprep.subr.bf16.mxu0 %v7431_v6  ;;  %5454 = vmatprep.subr.bf16.mxu1 %v7434_v54  ;;  %v7447_v46 = vld [vmem:[#allocation8 + $0x3a0] ss:$16 sps:$4 sm:$0xff]  }
 0x2ea   :  { %v2550_v33 = vpop.f32.mrb[24].mxu0  ;;  %4951 = vmatprep.mubr.bf16.mxu0 %v3288_v44  ;;  %5403 = vmatprep.mubr.bf16.mxu1 %v3288_v44 }
 0x2eb   :  { %v2776_v42 = vpop.f32.mrb[24].mxu1  ;;  %v2552_v49 = vpop.f32.mrb[25].mxu0  ;;  %4952 = vmatmul.mubr.bf16.gmra.mrb[84].mxu0 %v3287_v56  ;;  %5404 = vmatmul.mubr.bf16.gmra.mrb[84].mxu1 %v3287_v56  ;;  %v6776_v38 = vadd.f32 %v2550_v33, %v9498_v34 }
 0x2ec   :  { %v2778_v2 = vpop.f32.mrb[25].mxu1  ;;  %5003 = vmatpush1.bf16.msra.mxu0 %v7429_v27  ;;  %5455 = vmatpush1.bf16.msra.mxu1 %v7432_v60  ;;  %v2554_v10 = vpop.f32.mrb[26].mxu0  ;;  %v6808_v4 = vadd.f32 %v2776_v42, %v9502_v41  ;;  %v6777_v9 = vadd.f32 %v2552_v49, %v9506_v18  ;;  %v7455_v27 = vld [vmem:[#allocation8 + $0x3c4] ss:$16 sps:$4 sm:$0xff]   ;;  %v7458_v60 = vld [vmem:[#allocation8 + $0x3cc] ss:$16 sps:$4 sm:$0xff]  }
 0x2ed   :  { %v6778_v36 = vadd.f32 %v2554_v10, %v9498_v34  ;;  %v2780_v22 = vpop.f32.mrb[26].mxu1  ;;  %v2556_v39 = vpop.f32.mrb[27].mxu0  ;;  %5004 = vmatprep.subr.bf16.mxu0 %v7437_v5  ;;  %5456 = vmatprep.subr.bf16.mxu1 %v7440_v29  ;;  %v6809_v11 = vadd.f32 %v2778_v2, %v9510_v8 }
 0x2ee   :  { %v6810_v3 = vadd.f32 %v2780_v22, %v9502_v41  ;;  %v6779_v0 = vadd.f32 %v2556_v39, %v9506_v18  ;;  %v2782_v62 = vpop.f32.mrb[27].mxu1  ;;  %v7462_v39 = vld [vmem:[#allocation8 + $0x3e8] ss:$16 sps:$4 sm:$0xff]  }
 0x2ef   :  { %v3295_v35 = vpack.c.bf16 %v6778_v36, %v6776_v38  ;;  %v6811_v23 = vadd.f32 %v2782_v62, %v9510_v8  ;;  %v7453_v38 = vld [vmem:[#allocation8 + $0x3c0] ss:$16 sps:$4 sm:$0xff]   ;;  %v7456_v36 = vld [vmem:[#allocation8 + $0x3c8] ss:$16 sps:$4 sm:$0xff]  }
 0x2f0   :  { %v9592_v30 = vpack.c.bf16 %v6810_v3, %v6808_v4  ;;  %v3296_v12 = vpack.c.bf16 %v6779_v0, %v6777_v9  ;;  %5005 = vmatpush1.bf16.msra.mxu0 %v7435_v21  ;;  %5457 = vmatpush1.bf16.msra.mxu1 %v7438_v59  ;;  %v7465_v4 = vld [vmem:[#allocation8 + $0x400] ss:$16 sps:$4 sm:$0xff]   ;;  %v7468_v9 = vld [vmem:[#allocation8 + $0x408] ss:$16 sps:$4 sm:$0xff]   ;;  %v7473_v3 = vld [vmem:[#allocation8 + $0x424] ss:$16 sps:$4 sm:$0xff]  }
 0x2f1   :  { %v9594_v24 = vpack.c.bf16 %v6811_v23, %v6809_v11  ;;  %5006 = vmatprep.subr.bf16.mxu0 %v7443_v15  ;;  %5458 = vmatprep.subr.bf16.mxu1 %v7446_v20  ;;  %v7467_v15 = vld [vmem:[#allocation8 + $0x404] ss:$16 sps:$4 sm:$0xff]   ;;  %v7470_v20 = vld [vmem:[#allocation8 + $0x40c] ss:$16 sps:$4 sm:$0xff]   ;;  %v7471_v62 = vld [vmem:[#allocation8 + $0x420] ss:$16 sps:$4 sm:$0xff]  }
 0x2f2   :  { %v2560_v6 = vpop.f32.mrb[28].mxu0  ;;  %4961 = vmatprep.mubr.bf16.mxu0 %v3296_v12  ;;  %5413 = vmatprep.mubr.bf16.mxu1 %v3296_v12  ;;  %v7476_v0 = vld [vmem:[#allocation8 + $0x42c] ss:$16 sps:$4 sm:$0xff]   ;;  %v7479_v11 = vld [vmem:[#allocation8 + $0x444] ss:$16 sps:$4 sm:$0xff]  }
 0x2f3   :  { %v2786_v54 = vpop.f32.mrb[28].mxu1  ;;  %v2562_v28 = vpop.f32.mrb[29].mxu0  ;;  %4962 = vmatmul.mubr.bf16.gmra.mrb[88].mxu0 %v3295_v35  ;;  %5414 = vmatmul.mubr.bf16.gmra.mrb[88].mxu1 %v3295_v35  ;;  %v6780_v61 = vadd.f32 %v2560_v6, %v9498_v34  ;;  %v7482_v35 = vld [vmem:[#allocation8 + $0x44c] ss:$16 sps:$4 sm:$0xff]   ;;  %v7477_v23 = vld [vmem:[#allocation8 + $0x440] ss:$16 sps:$4 sm:$0xff]  }
 0x2f4   :  { %v2788_v1 = vpop.f32.mrb[29].mxu1  ;;  %5007 = vmatpush1.bf16.msra.mxu0 %v7441_v48  ;;  %5459 = vmatpush1.bf16.msra.mxu1 %v7444_v45  ;;  %v2564_v26 = vpop.f32.mrb[30].mxu0  ;;  %v6812_v5 = vadd.f32 %v2786_v54, %v9502_v41  ;;  %v6781_v29 = vadd.f32 %v2562_v28, %v9506_v18  ;;  %v7480_v12 = vld [vmem:[#allocation8 + $0x448] ss:$16 sps:$4 sm:$0xff]   ;;  %v7485_v48 = vld [vmem:[#allocation8 + $0x464] ss:$16 sps:$4 sm:$0xff]  }
 0x2f5   :  { %v6782_v56 = vadd.f32 %v2564_v26, %v9498_v34  ;;  %v2790_v58 = vpop.f32.mrb[30].mxu1  ;;  %v2566_v44 = vpop.f32.mrb[31].mxu0  ;;  %5008 = vmatprep.subr.bf16.mxu0 %v7449_v47  ;;  %5460 = vmatprep.subr.bf16.mxu1 %v7452_v13  ;;  %v6813_v2 = vadd.f32 %v2788_v1, %v9510_v8  ;;  %v7483_v45 = vld [vmem:[#allocation8 + $0x460] ss:$16 sps:$4 sm:$0xff]   ;;  %v7491_v47 = vld [vmem:[#allocation8 + $0x484] ss:$16 sps:$4 sm:$0xff]  }
 0x2f6   :  { %v6814_v33 = vadd.f32 %v2790_v58, %v9502_v41  ;;  %v6783_v42 = vadd.f32 %v2566_v44, %v9506_v18  ;;  %v2792_v49 = vpop.f32.mrb[31].mxu1  ;;  %v7461_v41 = vld [vmem:[#allocation8 + $0x3e4] ss:$16 sps:$4 sm:$0xff]   ;;  %v7464_v18 = vld [vmem:[#allocation8 + $0x3ec] ss:$16 sps:$4 sm:$0xff]  }
 0x2f7   :  { %v3303_v10 = vpack.c.bf16 %v6782_v56, %v6780_v61  ;;  %v6815_v34 = vadd.f32 %v2792_v49, %v9510_v8  ;;  %v7459_v8 = vld [vmem:[#allocation8 + $0x3e0] ss:$16 sps:$4 sm:$0xff]   ;;  %v7494_v13 = vld [vmem:[#allocation8 + $0x48c] ss:$16 sps:$4 sm:$0xff]   ;;  %v7492_v54 = vld [vmem:[#allocation8 + $0x488] ss:$16 sps:$4 sm:$0xff]  }
 0x2f8   :  { %v9604_v21 = vpack.c.bf16 %v6814_v33, %v6812_v5  ;;  %v3304_v59 = vpack.c.bf16 %v6783_v42, %v6781_v29  ;;  %5009 = vmatpush1.bf16.msra.mxu0 %v7447_v46  ;;  %5461 = vmatpush1.bf16.msra.mxu1 %v7450_v31  ;;  %v7489_v6 = vld [vmem:[#allocation8 + $0x480] ss:$16 sps:$4 sm:$0xff]   ;;  %v7497_v28 = vld [vmem:[#allocation8 + $0x4a4] ss:$16 sps:$4 sm:$0xff]   ;;  %v7506_v46 = vld [vmem:[#allocation8 + $0x4cc] ss:$16 sps:$4 sm:$0xff]  }
 0x2f9   :  { %v9606_v22 = vpack.c.bf16 %v6815_v34, %v6813_v2  ;;  %5010 = vmatprep.subr.bf16.mxu0 %v7455_v27  ;;  %5462 = vmatprep.subr.bf16.mxu1 %v7458_v60  ;;  %v7495_v1 = vld [vmem:[#allocation8 + $0x4a0] ss:$16 sps:$4 sm:$0xff]   ;;  %v7503_v26 = vld [vmem:[#allocation8 + $0x4c4] ss:$16 sps:$4 sm:$0xff]   ;;  %v7504_v61 = vld [vmem:[#allocation8 + $0x4c8] ss:$16 sps:$4 sm:$0xff]  }
 0x2fa   :  { %4971 = vmatprep.mubr.bf16.mxu0 %v3304_v59  ;;  %5423 = vmatprep.mubr.bf16.mxu1 %v3304_v59  ;;  %v7501_v31 = vld [vmem:[#allocation8 + $0x4c0] ss:$16 sps:$4 sm:$0xff]   ;;  %v7509_v56 = vld [vmem:[#allocation8 + $0x4e4] ss:$16 sps:$4 sm:$0xff]   ;;  %v7518_v27 = vld [vmem:[#allocation8 + $0x50c] ss:$16 sps:$4 sm:$0xff]  }
 0x2fb   :  { %4972 = vmatmul.mubr.bf16.gmra.mrb[92].mxu0 %v3303_v10  ;;  %5424 = vmatmul.mubr.bf16.gmra.mrb[92].mxu1 %v3303_v10  ;;  %v7507_v58 = vld [vmem:[#allocation8 + $0x4e0] ss:$16 sps:$4 sm:$0xff]   ;;  %v7515_v44 = vld [vmem:[#allocation8 + $0x504] ss:$16 sps:$4 sm:$0xff]   ;;  %v7516_v5 = vld [vmem:[#allocation8 + $0x508] ss:$16 sps:$4 sm:$0xff]  }
 0x2fc   :  { %5011 = vmatpush1.bf16.msra.mxu0 %v7453_v38  ;;  %5463 = vmatpush1.bf16.msra.mxu1 %v7456_v36  ;;  %v7513_v60 = vld [vmem:[#allocation8 + $0x500] ss:$16 sps:$4 sm:$0xff]   ;;  %v7521_v29 = vld [vmem:[#allocation8 + $0x524] ss:$16 sps:$4 sm:$0xff]   ;;  %v7530_v49 = vld [vmem:[#allocation8 + $0x54c] ss:$16 sps:$4 sm:$0xff]  }
 0x2fd   :  { %5014 = vmatprep.mubr.bf16.mxu0 %v9522_v37  ;;  %5466 = vmatprep.mubr.bf16.mxu1 %v9522_v37  ;;  %v7474_v37 = vld [vmem:[#allocation8 + $0x428] ss:$16 sps:$4 sm:$0xff]   ;;  %v7519_v33 = vld [vmem:[#allocation8 + $0x520] ss:$16 sps:$4 sm:$0xff]   ;;  %v7527_v42 = vld [vmem:[#allocation8 + $0x544] ss:$16 sps:$4 sm:$0xff]  }
 0x2fe   :  { %5012 = vmatprep.subr.bf16.mxu0 %v7461_v41  ;;  %5464 = vmatprep.subr.bf16.mxu1 %v7464_v18  ;;  %v7525_v2 = vld [vmem:[#allocation8 + $0x540] ss:$16 sps:$4 sm:$0xff]   ;;  %v7528_v10 = vld [vmem:[#allocation8 + $0x548] ss:$16 sps:$4 sm:$0xff]   ;;  %v7533_v34 = vld [vmem:[#allocation8 + $0x564] ss:$16 sps:$4 sm:$0xff]  }
 0x2ff   :  { %v7531_v59 = vld [vmem:[#allocation8 + $0x560] ss:$16 sps:$4 sm:$0xff]   ;;  %v7539_v38 = vld [vmem:[#allocation8 + $0x584] ss:$16 sps:$4 sm:$0xff]   ;;  %v7542_v36 = vld [vmem:[#allocation8 + $0x58c] ss:$16 sps:$4 sm:$0xff]  }
 0x300   :  { %5013 = vmatpush1.bf16.msra.mxu0 %v7459_v8  ;;  %5465 = vmatpush1.bf16.msra.mxu1 %v7462_v39  ;;  %v7537_v41 = vld [vmem:[#allocation8 + $0x580] ss:$16 sps:$4 sm:$0xff]   ;;  %v7540_v18 = vld [vmem:[#allocation8 + $0x588] ss:$16 sps:$4 sm:$0xff]   ;;  %v7545_v8 = vld [vmem:[#allocation8 + $0x5a4] ss:$16 sps:$4 sm:$0xff]  }
 0x301   :  { %5095 = vmatprep.subr.bf16.mxu0 %v7467_v15  ;;  %5547 = vmatprep.subr.bf16.mxu1 %v7470_v20  ;;  %v7543_v39 = vld [vmem:[#allocation8 + $0x5a0] ss:$16 sps:$4 sm:$0xff]  }
 0x302   :  { %v10588_v15 = vld [vmem:[#allocation57_spill] sm:$0xff] }
 0x303   :  { %5015 = vmatmul.mubr.bf16.vlgmr.msra.gmra.mrb[64].mxu0 %v9520_v63  ;;  %5467 = vmatmul.mubr.bf16.vlgmr.msra.gmra.mrb[64].mxu1 %v9520_v63  ;;  %v7488_v63 = vld [vmem:[#allocation8 + $0x46c] ss:$16 sps:$4 sm:$0xff]   ;;  %v1041_v20 = vsub.s32 4, %v10588_v15 }
 0x304   :  { %5096 = vmatpush1.bf16.msra.mxu0 %v7465_v4  ;;  %5548 = vmatpush1.bf16.msra.mxu1 %v7468_v9  ;;  %v7551_v4 = vld [vmem:[#allocation8 + $0x5c4] ss:$16 sps:$4 sm:$0xff]   ;;  %v7554_v9 = vld [vmem:[#allocation8 + $0x5cc] ss:$16 sps:$4 sm:$0xff]  }
 0x305   :  { %5024 = vmatprep.mubr.bf16.mxu0 %v9534_v25  ;;  %5476 = vmatprep.mubr.bf16.mxu1 %v9534_v25  ;;  %v7486_v25 = vld [vmem:[#allocation8 + $0x468] ss:$16 sps:$4 sm:$0xff]  }
 0x306   :  { %5097 = vmatprep.subr.bf16.mxu0 %v7473_v3  ;;  %5549 = vmatprep.subr.bf16.mxu1 %v7476_v0  ;;  %v1045_v3 = vsub.s32 5, %v10588_v15  ;;  %v1049_v0 = vsub.s32 6, %v10588_v15 }
 0x308   :  { %5098 = vmatpush1.bf16.msra.mxu0 %v7471_v62  ;;  %5550 = vmatpush1.bf16.msra.mxu1 %v7474_v37  ;;  %v7552_v62 = vld [vmem:[#allocation8 + $0x5c8] ss:$16 sps:$4 sm:$0xff]   ;;  %v1053_v37 = vsub.s32 7, %v10588_v15 }
 0x309   :  { %5099 = vmatprep.subr.bf16.mxu0 %v7479_v11  ;;  %5551 = vmatprep.subr.bf16.mxu1 %v7482_v35  ;;  %v9643_v11 = vrot.slane %v9494_v40, %v1041_v20  ;;  %v7560_v35 = vld [vmem:[#allocation8 + $0x5ec] ss:$16 sps:$4 sm:$0xff]  }
 0x30b   :  { %5025 = vmatmul.mubr.bf16.gmra.mrb[68].mxu0 %v9532_v19  ;;  %5477 = vmatmul.mubr.bf16.gmra.mrb[68].mxu1 %v9532_v19  ;;  %v7500_v19 = vld [vmem:[#allocation8 + $0x4ac] ss:$16 sps:$4 sm:$0xff]  }
 0x30c   :  { %5100 = vmatpush1.bf16.msra.mxu0 %v7477_v23  ;;  %5552 = vmatpush1.bf16.msra.mxu1 %v7480_v12  ;;  %v9646_v12 = vrot.slane %v9494_v40, %v1045_v3 }
 0x30d   :  { %5034 = vmatprep.mubr.bf16.mxu0 %v9546_v50  ;;  %5486 = vmatprep.mubr.bf16.mxu1 %v9546_v50  ;;  %v7498_v50 = vld [vmem:[#allocation8 + $0x4a8] ss:$16 sps:$4 sm:$0xff]  }
 0x30e   :  { %5101 = vmatprep.subr.bf16.mxu0 %v7485_v48  ;;  %5553 = vmatprep.subr.bf16.mxu1 %v7488_v63  ;;  %v9649_v48 = vrot.slane %v9494_v40, %v1049_v0  ;;  %v7573_v0 = vld [vmem:[#allocation8 + $0x640] ss:$16 sps:$4 sm:$0xff]  }
 0x310   :  { %5102 = vmatpush1.bf16.msra.mxu0 %v7483_v45  ;;  %5554 = vmatpush1.bf16.msra.mxu1 %v7486_v25  ;;  %v9654_v25 = vrot.slane %v9494_v40, %v1053_v37  ;;  %v7581_v37 = vld [vmem:[#allocation8 + $0x664] ss:$16 sps:$4 sm:$0xff]  }
 0x311   :  { %5103 = vmatprep.subr.bf16.mxu0 %v7491_v47  ;;  %5555 = vmatprep.subr.bf16.mxu1 %v7494_v13  ;;  %v7555_v13 = vld [vmem:[#allocation8 + $0x5e0] ss:$16 sps:$4 sm:$0xff]  }
 0x313   :  { %5035 = vmatmul.mubr.bf16.gmra.mrb[72].mxu0 %v9544_v52  ;;  %5487 = vmatmul.mubr.bf16.gmra.mrb[72].mxu1 %v9544_v52  ;;  %v7512_v52 = vld [vmem:[#allocation8 + $0x4ec] ss:$16 sps:$4 sm:$0xff]  }
 0x314   :  { %5104 = vmatpush1.bf16.msra.mxu0 %v7489_v6  ;;  %5556 = vmatpush1.bf16.msra.mxu1 %v7492_v54  ;;  %v7558_v6 = vld [vmem:[#allocation8 + $0x5e8] ss:$16 sps:$4 sm:$0xff]  }
 0x315   :  { %5044 = vmatprep.mubr.bf16.mxu0 %v9558_v14  ;;  %5496 = vmatprep.mubr.bf16.mxu1 %v9558_v14  ;;  %v7510_v14 = vld [vmem:[#allocation8 + $0x4e8] ss:$16 sps:$4 sm:$0xff]  }
 0x316   :  { %5105 = vmatprep.subr.bf16.mxu0 %v7497_v28  ;;  %5557 = vmatprep.subr.bf16.mxu1 %v7500_v19 }
 0x318   :  { %5106 = vmatpush1.bf16.msra.mxu0 %v7495_v1  ;;  %5558 = vmatpush1.bf16.msra.mxu1 %v7498_v50  ;;  %v7563_v50 = vld [vmem:[#allocation8 + $0x604] ss:$16 sps:$4 sm:$0xff]  }
 0x319   :  { %5107 = vmatprep.subr.bf16.mxu0 %v7503_v26  ;;  %5559 = vmatprep.subr.bf16.mxu1 %v7506_v46  ;;  %v7566_v26 = vld [vmem:[#allocation8 + $0x60c] ss:$16 sps:$4 sm:$0xff]  }
 0x31b   :  { %5045 = vmatmul.mubr.bf16.gmra.mrb[76].mxu0 %v9556_v57  ;;  %5497 = vmatmul.mubr.bf16.gmra.mrb[76].mxu1 %v9556_v57  ;;  %v7524_v57 = vld [vmem:[#allocation8 + $0x52c] ss:$16 sps:$4 sm:$0xff]  }
 0x31c   :  { %5108 = vmatpush1.bf16.msra.mxu0 %v7501_v31  ;;  %5560 = vmatpush1.bf16.msra.mxu1 %v7504_v61 }
 0x31d   :  { %5054 = vmatprep.mubr.bf16.mxu0 %v9570_v51  ;;  %5506 = vmatprep.mubr.bf16.mxu1 %v9570_v51  ;;  %v7522_v51 = vld [vmem:[#allocation8 + $0x528] ss:$16 sps:$4 sm:$0xff]  }
 0x31e   :  { %5109 = vmatprep.subr.bf16.mxu0 %v7509_v56  ;;  %5561 = vmatprep.subr.bf16.mxu1 %v7512_v52 }
 0x320   :  { %5110 = vmatpush1.bf16.msra.mxu0 %v7507_v58  ;;  %5562 = vmatpush1.bf16.msra.mxu1 %v7510_v14 }
 0x321   :  { %5111 = vmatprep.subr.bf16.mxu0 %v7515_v44  ;;  %5563 = vmatprep.subr.bf16.mxu1 %v7518_v27  ;;  %v7561_v27 = vld [vmem:[#allocation8 + $0x600] ss:$16 sps:$4 sm:$0xff]  }
 0x323   :  { %5055 = vmatmul.mubr.bf16.gmra.mrb[80].mxu0 %v9568_v7  ;;  %5507 = vmatmul.mubr.bf16.gmra.mrb[80].mxu1 %v9568_v7  ;;  %v7536_v7 = vld [vmem:[#allocation8 + $0x56c] ss:$16 sps:$4 sm:$0xff]  }
 0x324   :  { %5112 = vmatpush1.bf16.msra.mxu0 %v7513_v60  ;;  %5564 = vmatpush1.bf16.msra.mxu1 %v7516_v5  ;;  %v7564_v60 = vld [vmem:[#allocation8 + $0x608] ss:$16 sps:$4 sm:$0xff]  }
 0x325   :  { %5064 = vmatprep.mubr.bf16.mxu0 %v9582_v17  ;;  %5516 = vmatprep.mubr.bf16.mxu1 %v9582_v17  ;;  %v7534_v17 = vld [vmem:[#allocation8 + $0x568] ss:$16 sps:$4 sm:$0xff]  }
 0x326   :  { %5113 = vmatprep.subr.bf16.mxu0 %v7521_v29  ;;  %5565 = vmatprep.subr.bf16.mxu1 %v7524_v57  ;;  %v7569_v29 = vld [vmem:[#allocation8 + $0x624] ss:$16 sps:$4 sm:$0xff]   ;;  %v7572_v57 = vld [vmem:[#allocation8 + $0x62c] ss:$16 sps:$4 sm:$0xff]  }
 0x328   :  { %5114 = vmatpush1.bf16.msra.mxu0 %v7519_v33  ;;  %5566 = vmatpush1.bf16.msra.mxu1 %v7522_v51 }
 0x329   :  { %5115 = vmatprep.subr.bf16.mxu0 %v7527_v42  ;;  %5567 = vmatprep.subr.bf16.mxu1 %v7530_v49 }
 0x32b   :  { %5065 = vmatmul.mubr.bf16.gmra.mrb[84].mxu0 %v9580_v43  ;;  %5517 = vmatmul.mubr.bf16.gmra.mrb[84].mxu1 %v9580_v43  ;;  %v7548_v43 = vld [vmem:[#allocation8 + $0x5ac] ss:$16 sps:$4 sm:$0xff]  }
 0x32c   :  { %5116 = vmatpush1.bf16.msra.mxu0 %v7525_v2  ;;  %5568 = vmatpush1.bf16.msra.mxu1 %v7528_v10  ;;  %v7567_v10 = vld [vmem:[#allocation8 + $0x620] ss:$16 sps:$4 sm:$0xff]  }
 0x32d   :  { %5074 = vmatprep.mubr.bf16.mxu0 %v9594_v24  ;;  %5526 = vmatprep.mubr.bf16.mxu1 %v9594_v24  ;;  %v7546_v24 = vld [vmem:[#allocation8 + $0x5a8] ss:$16 sps:$4 sm:$0xff]  }
 0x32e   :  { %5117 = vmatprep.subr.bf16.mxu0 %v7533_v34  ;;  %5569 = vmatprep.subr.bf16.mxu1 %v7536_v7  ;;  %v7570_v34 = vld [vmem:[#allocation8 + $0x628] ss:$16 sps:$4 sm:$0xff]  }
 0x330   :  { %5118 = vmatpush1.bf16.msra.mxu0 %v7531_v59  ;;  %5570 = vmatpush1.bf16.msra.mxu1 %v7534_v17 }
 0x331   :  { %5119 = vmatprep.subr.bf16.mxu0 %v7539_v38  ;;  %5571 = vmatprep.subr.bf16.mxu1 %v7542_v36  ;;  %v7575_v36 = vld [vmem:[#allocation8 + $0x644] ss:$16 sps:$4 sm:$0xff]  }
 0x333   :  { %5075 = vmatmul.mubr.bf16.gmra.mrb[88].mxu0 %v9592_v30  ;;  %5527 = vmatmul.mubr.bf16.gmra.mrb[88].mxu1 %v9592_v30  ;;  %v7549_v30 = vld [vmem:[#allocation8 + $0x5c0] ss:$16 sps:$4 sm:$0xff]  }
 0x334   :  { %5120 = vmatpush1.bf16.msra.mxu0 %v7537_v41  ;;  %5572 = vmatpush1.bf16.msra.mxu1 %v7540_v18  ;;  %v7578_v41 = vld [vmem:[#allocation8 + $0x64c] ss:$16 sps:$4 sm:$0xff]  }
 0x335   :  { %5084 = vmatprep.mubr.bf16.mxu0 %v9606_v22  ;;  %5536 = vmatprep.mubr.bf16.mxu1 %v9606_v22  ;;  %v7557_v22 = vld [vmem:[#allocation8 + $0x5e4] ss:$16 sps:$4 sm:$0xff]  }
 0x336   :  { %5121 = vmatprep.subr.bf16.mxu0 %v7545_v8  ;;  %5573 = vmatprep.subr.bf16.mxu1 %v7548_v43 }
 0x338   :  { %5122 = vmatpush1.bf16.msra.mxu0 %v7543_v39  ;;  %5574 = vmatpush1.bf16.msra.mxu1 %v7546_v24 }
 0x339   :  { %5123 = vmatprep.subr.bf16.mxu0 %v7551_v4  ;;  %5575 = vmatprep.subr.bf16.mxu1 %v7554_v9 }
 0x33a   :  { %v2942_v23 = vpop.f32.mrb[32].mxu0 }
 0x33b   :  { %v2944_v63 = vpop.f32.mrb[33].mxu0  ;;  %5085 = vmatmul.mubr.bf16.gmra.mrb[92].mxu0 %v9604_v21  ;;  %5537 = vmatmul.mubr.bf16.gmra.mrb[92].mxu1 %v9604_v21  ;;  %v6816_v54 = vadd.f32 %v2942_v23, %v9643_v11 }
 0x33c   :  { %v3168_v45 = vpop.f32.mrb[32].mxu1  ;;  %5124 = vmatpush1.bf16.msra.mxu0 %v7549_v30  ;;  %5576 = vmatpush1.bf16.msra.mxu1 %v7552_v62  ;;  %v2946_v47 = vpop.f32.mrb[34].mxu0  ;;  %v6817_v21 = vadd.f32 %v2944_v63, %v9646_v12  ;;  %v7576_v30 = vld [vmem:[#allocation8 + $0x648] ss:$16 sps:$4 sm:$0xff]  }
 0x33d   :  { %v3170_v28 = vpop.f32.mrb[33].mxu1  ;;  %v6818_v19 = vadd.f32 %v2946_v47, %v9643_v11  ;;  %v2948_v1 = vpop.f32.mrb[35].mxu0  ;;  %5125 = vmatprep.subr.bf16.mxu0 %v7557_v22  ;;  %5577 = vmatprep.subr.bf16.mxu1 %v7560_v35  ;;  %v6848_v31 = vadd.f32 %v3168_v45, %v9649_v48  ;;  %v7584_v22 = vld [vmem:[#allocation8 + $0x66c] ss:$16 sps:$4 sm:$0xff]  }
 0x33e   :  { %v3172_v46 = vpop.f32.mrb[34].mxu1  ;;  %v6819_v40 = vadd.f32 %v2948_v1, %v9646_v12  ;;  %v6849_v58 = vadd.f32 %v3170_v28, %v9654_v25 }
 0x33f   :  { %v3251_v61 = vpack.c.bf16 %v6818_v19, %v6816_v54  ;;  %v6850_v56 = vadd.f32 %v3172_v46, %v9649_v48  ;;  %v3174_v52 = vpop.f32.mrb[35].mxu1 }
 0x340   :  { %v3252_v14 = vpack.c.bf16 %v6819_v40, %v6817_v21  ;;  %v6851_v44 = vadd.f32 %v3174_v52, %v9654_v25  ;;  %5126 = vmatpush1.bf16.msra.mxu0 %v7555_v13  ;;  %5578 = vmatpush1.bf16.msra.mxu1 %v7558_v6  ;;  %v7579_v13 = vld [vmem:[#allocation8 + $0x660] ss:$16 sps:$4 sm:$0xff]   ;;  %v7582_v6 = vld [vmem:[#allocation8 + $0x668] ss:$16 sps:$4 sm:$0xff]  }
 0x341   :  { %v9664_v5 = vpack.c.bf16 %v6850_v56, %v6848_v31  ;;  %5208 = vmatprep.subr.bf16.mxu0 %v7563_v50  ;;  %5660 = vmatprep.subr.bf16.mxu1 %v7566_v26  ;;  %v7587_v50 = vld [vmem:[#allocation8 + $0x684] ss:$16 sps:$4 sm:$0xff]   ;;  %v7590_v26 = vld [vmem:[#allocation8 + $0x68c] ss:$16 sps:$4 sm:$0xff]  }
 0x342   :  { %v9666_v33 = vpack.c.bf16 %v6851_v44, %v6849_v58  ;;  %v2952_v51 = vpop.f32.mrb[36].mxu0  ;;  %5127 = vmatprep.mubr.bf16.mxu0 %v3252_v14  ;;  %5579 = vmatprep.mubr.bf16.mxu1 %v3252_v14 }
 0x343   :  { %v2954_v42 = vpop.f32.mrb[37].mxu0  ;;  %5128 = vmatmul.mubr.bf16.vlgmr.msra.gmra.mrb[64].mxu0 %v3251_v61  ;;  %5580 = vmatmul.mubr.bf16.vlgmr.msra.gmra.mrb[64].mxu1 %v3251_v61  ;;  %v6820_v7 = vadd.f32 %v2952_v51, %v9643_v11  ;;  %v7596_v51 = vld [vmem:[#allocation8 + $0x6ac] ss:$16 sps:$4 sm:$0xff]  }
 0x344   :  { %v3178_v49 = vpop.f32.mrb[36].mxu1  ;;  %5209 = vmatpush1.bf16.msra.mxu0 %v7561_v27  ;;  %5661 = vmatpush1.bf16.msra.mxu1 %v7564_v60  ;;  %v2956_v2 = vpop.f32.mrb[38].mxu0  ;;  %v6821_v18 = vadd.f32 %v2954_v42, %v9646_v12  ;;  %v7585_v27 = vld [vmem:[#allocation8 + $0x680] ss:$16 sps:$4 sm:$0xff]   ;;  %v7588_v60 = vld [vmem:[#allocation8 + $0x688] ss:$16 sps:$4 sm:$0xff]  }
 0x345   :  { %v3180_v59 = vpop.f32.mrb[37].mxu1  ;;  %v6822_v17 = vadd.f32 %v2956_v2, %v9643_v11  ;;  %v2958_v38 = vpop.f32.mrb[39].mxu0  ;;  %5210 = vmatprep.subr.bf16.mxu0 %v7569_v29  ;;  %5662 = vmatprep.subr.bf16.mxu1 %v7572_v57  ;;  %v6852_v39 = vadd.f32 %v3178_v49, %v9649_v48  ;;  %v7593_v57 = vld [vmem:[#allocation8 + $0x6a4] ss:$16 sps:$4 sm:$0xff]  }
 0x346   :  { %v3182_v8 = vpop.f32.mrb[38].mxu1  ;;  %v6823_v43 = vadd.f32 %v2958_v38, %v9646_v12  ;;  %v6853_v4 = vadd.f32 %v3180_v59, %v9654_v25  ;;  %v7594_v59 = vld [vmem:[#allocation8 + $0x6a8] ss:$16 sps:$4 sm:$0xff]  }
 0x347   :  { %v3259_v24 = vpack.c.bf16 %v6822_v17, %v6820_v7  ;;  %v6854_v15 = vadd.f32 %v3182_v8, %v9649_v48  ;;  %v3184_v20 = vpop.f32.mrb[39].mxu1  ;;  %v7591_v7 = vld [vmem:[#allocation8 + $0x6a0] ss:$16 sps:$4 sm:$0xff]   ;;  %v7602_v8 = vld [vmem:[#allocation8 + $0x6cc] ss:$16 sps:$4 sm:$0xff]  }
 0x348   :  { %v3260_v9 = vpack.c.bf16 %v6823_v43, %v6821_v18  ;;  %v6855_v3 = vadd.f32 %v3184_v20, %v9654_v25  ;;  %5211 = vmatpush1.bf16.msra.mxu0 %v7567_v10  ;;  %5663 = vmatpush1.bf16.msra.mxu1 %v7570_v34  ;;  %v7599_v18 = vld [vmem:[#allocation8 + $0x6c4] ss:$16 sps:$4 sm:$0xff]  }
 0x349   :  { %v9676_v62 = vpack.c.bf16 %v6854_v15, %v6852_v39  ;;  %5212 = vmatprep.subr.bf16.mxu0 %v7575_v36  ;;  %5664 = vmatprep.subr.bf16.mxu1 %v7578_v41 }
 0x34a   :  { %v9678_v35 = vpack.c.bf16 %v6855_v3, %v6853_v4  ;;  %v2962_v23 = vpop.f32.mrb[40].mxu0  ;;  %5137 = vmatprep.mubr.bf16.mxu0 %v3260_v9  ;;  %5589 = vmatprep.mubr.bf16.mxu1 %v3260_v9 }
 0x34b   :  { %v2964_v63 = vpop.f32.mrb[41].mxu0  ;;  %5138 = vmatmul.mubr.bf16.gmra.mrb[68].mxu0 %v3259_v24  ;;  %5590 = vmatmul.mubr.bf16.gmra.mrb[68].mxu1 %v3259_v24  ;;  %v6824_v54 = vadd.f32 %v2962_v23, %v9643_v11 }
 0x34c   :  { %v3188_v45 = vpop.f32.mrb[40].mxu1  ;;  %5213 = vmatpush1.bf16.msra.mxu0 %v7573_v0  ;;  %5665 = vmatpush1.bf16.msra.mxu1 %v7576_v30  ;;  %v2966_v47 = vpop.f32.mrb[42].mxu0  ;;  %v6825_v21 = vadd.f32 %v2964_v63, %v9646_v12  ;;  %v7605_v63 = vld [vmem:[#allocation8 + $0x6e4] ss:$16 sps:$4 sm:$0xff]  }
 0x34d   :  { %v3190_v28 = vpop.f32.mrb[41].mxu1  ;;  %v6826_v19 = vadd.f32 %v2966_v47, %v9643_v11  ;;  %v2968_v1 = vpop.f32.mrb[43].mxu0  ;;  %5214 = vmatprep.subr.bf16.mxu0 %v7581_v37  ;;  %5666 = vmatprep.subr.bf16.mxu1 %v7584_v22  ;;  %v6856_v31 = vadd.f32 %v3188_v45, %v9649_v48  ;;  %v7597_v37 = vld [vmem:[#allocation8 + $0x6c0] ss:$16 sps:$4 sm:$0xff]   ;;  %v7600_v22 = vld [vmem:[#allocation8 + $0x6c8] ss:$16 sps:$4 sm:$0xff]  }
 0x34e   :  { %v3192_v46 = vpop.f32.mrb[42].mxu1  ;;  %v6827_v40 = vadd.f32 %v2968_v1, %v9646_v12  ;;  %v6857_v58 = vadd.f32 %v3190_v28, %v9654_v25  ;;  %v7608_v45 = vld [vmem:[#allocation8 + $0x6ec] ss:$16 sps:$4 sm:$0xff]   ;;  %v7606_v1 = vld [vmem:[#allocation8 + $0x6e8] ss:$16 sps:$4 sm:$0xff]  }
 0x34f   :  { %v3267_v61 = vpack.c.bf16 %v6826_v19, %v6824_v54  ;;  %v6858_v56 = vadd.f32 %v3192_v46, %v9649_v48  ;;  %v3194_v52 = vpop.f32.mrb[43].mxu1  ;;  %v7603_v19 = vld [vmem:[#allocation8 + $0x6e0] ss:$16 sps:$4 sm:$0xff]  }
 0x350   :  { %v3268_v14 = vpack.c.bf16 %v6827_v40, %v6825_v21  ;;  %v6859_v44 = vadd.f32 %v3194_v52, %v9654_v25  ;;  %5215 = vmatpush1.bf16.msra.mxu0 %v7579_v13  ;;  %5667 = vmatpush1.bf16.msra.mxu1 %v7582_v6  ;;  %v7611_v40 = vld [vmem:[#allocation8 + $0x704] ss:$16 sps:$4 sm:$0xff]  }
 0x351   :  { %v9688_v29 = vpack.c.bf16 %v6858_v56, %v6856_v31  ;;  %5216 = vmatprep.subr.bf16.mxu0 %v7587_v50  ;;  %5668 = vmatprep.subr.bf16.mxu1 %v7590_v26  ;;  %v7614_v31 = vld [vmem:[#allocation8 + $0x70c] ss:$16 sps:$4 sm:$0xff]  }
 0x352   :  { %v9690_v42 = vpack.c.bf16 %v6859_v44, %v6857_v58  ;;  %v2972_v49 = vpop.f32.mrb[44].mxu0  ;;  %5147 = vmatprep.mubr.bf16.mxu0 %v3268_v14  ;;  %5599 = vmatprep.mubr.bf16.mxu1 %v3268_v14 }
 0x353   :  { %v2974_v2 = vpop.f32.mrb[45].mxu0  ;;  %5148 = vmatmul.mubr.bf16.gmra.mrb[72].mxu0 %v3267_v61  ;;  %5600 = vmatmul.mubr.bf16.gmra.mrb[72].mxu1 %v3267_v61  ;;  %v6828_v17 = vadd.f32 %v2972_v49, %v9643_v11  ;;  %v7609_v49 = vld [vmem:[#allocation8 + $0x700] ss:$16 sps:$4 sm:$0xff]  }
 0x354   :  { %v3198_v10 = vpop.f32.mrb[44].mxu1  ;;  %5217 = vmatpush1.bf16.msra.mxu0 %v7585_v27  ;;  %5669 = vmatpush1.bf16.msra.mxu1 %v7588_v60  ;;  %v2976_v34 = vpop.f32.mrb[46].mxu0  ;;  %v6829_v43 = vadd.f32 %v2974_v2, %v9646_v12  ;;  %v7612_v2 = vld [vmem:[#allocation8 + $0x708] ss:$16 sps:$4 sm:$0xff]  }
 0x355   :  { %v3200_v38 = vpop.f32.mrb[45].mxu1  ;;  %v6830_v36 = vadd.f32 %v2976_v34, %v9643_v11  ;;  %v2978_v41 = vpop.f32.mrb[47].mxu0  ;;  %5218 = vmatprep.subr.bf16.mxu0 %v7593_v57  ;;  %5670 = vmatprep.subr.bf16.mxu1 %v7596_v51  ;;  %v6860_v15 = vadd.f32 %v3198_v10, %v9649_v48  ;;  %v7617_v34 = vld [vmem:[#allocation8 + $0x724] ss:$16 sps:$4 sm:$0xff]  }
 0x356   :  { %v3202_v39 = vpop.f32.mrb[46].mxu1  ;;  %v6831_v24 = vadd.f32 %v2978_v41, %v9646_v12  ;;  %v6861_v3 = vadd.f32 %v3200_v38, %v9654_v25 }
 0x357   :  { %v3275_v20 = vpack.c.bf16 %v6830_v36, %v6828_v17  ;;  %v6862_v4 = vadd.f32 %v3202_v39, %v9649_v48  ;;  %v3204_v9 = vpop.f32.mrb[47].mxu1 }
 0x358   :  { %v3276_v0 = vpack.c.bf16 %v6831_v24, %v6829_v43  ;;  %v6863_v30 = vadd.f32 %v3204_v9, %v9654_v25  ;;  %5219 = vmatpush1.bf16.msra.mxu0 %v7591_v7  ;;  %5671 = vmatpush1.bf16.msra.mxu1 %v7594_v59  ;;  %v7620_v7 = vld [vmem:[#allocation8 + $0x72c] ss:$16 sps:$4 sm:$0xff]  }
 0x359   :  { %v9700_v23 = vpack.c.bf16 %v6862_v4, %v6860_v15  ;;  %5220 = vmatprep.subr.bf16.mxu0 %v7599_v18  ;;  %5672 = vmatprep.subr.bf16.mxu1 %v7602_v8  ;;  %v7615_v18 = vld [vmem:[#allocation8 + $0x720] ss:$16 sps:$4 sm:$0xff]   ;;  %v7618_v8 = vld [vmem:[#allocation8 + $0x728] ss:$16 sps:$4 sm:$0xff]   ;;  %v7626_v4 = vld [vmem:[#allocation8 + $0x74c] ss:$16 sps:$4 sm:$0xff]  }
 0x35a   :  { %v9702_v47 = vpack.c.bf16 %v6863_v30, %v6861_v3  ;;  %v2982_v13 = vpop.f32.mrb[48].mxu0  ;;  %5157 = vmatprep.mubr.bf16.mxu0 %v3276_v0  ;;  %5609 = vmatprep.mubr.bf16.mxu1 %v3276_v0 }
 0x35b   :  { %v2984_v6 = vpop.f32.mrb[49].mxu0  ;;  %5158 = vmatmul.mubr.bf16.gmra.mrb[76].mxu0 %v3275_v20  ;;  %5610 = vmatmul.mubr.bf16.gmra.mrb[76].mxu1 %v3275_v20  ;;  %v6832_v50 = vadd.f32 %v2982_v13, %v9643_v11  ;;  %v7623_v20 = vld [vmem:[#allocation8 + $0x744] ss:$16 sps:$4 sm:$0xff]  }
 0x35c   :  { %v3208_v54 = vpop.f32.mrb[48].mxu1  ;;  %5221 = vmatpush1.bf16.msra.mxu0 %v7597_v37  ;;  %5673 = vmatpush1.bf16.msra.mxu1 %v7600_v22  ;;  %v2986_v28 = vpop.f32.mrb[50].mxu0  ;;  %v6833_v61 = vadd.f32 %v2984_v6, %v9646_v12 }
 0x35d   :  { %v3210_v26 = vpop.f32.mrb[49].mxu1  ;;  %v6834_v21 = vadd.f32 %v2986_v28, %v9643_v11  ;;  %v2988_v46 = vpop.f32.mrb[51].mxu0  ;;  %5222 = vmatprep.subr.bf16.mxu0 %v7605_v63  ;;  %5674 = vmatprep.subr.bf16.mxu1 %v7608_v45  ;;  %v6864_v58 = vadd.f32 %v3208_v54, %v9649_v48  ;;  %v7621_v54 = vld [vmem:[#allocation8 + $0x740] ss:$16 sps:$4 sm:$0xff]   ;;  %v7624_v28 = vld [vmem:[#allocation8 + $0x748] ss:$16 sps:$4 sm:$0xff]  }
 0x35e   :  { %v3212_v56 = vpop.f32.mrb[50].mxu1  ;;  %v6835_v52 = vadd.f32 %v2988_v46, %v9646_v12  ;;  %v6865_v60 = vadd.f32 %v3210_v26, %v9654_v25 }
 0x35f   :  { %v3283_v14 = vpack.c.bf16 %v6834_v21, %v6832_v50  ;;  %v6866_v44 = vadd.f32 %v3212_v56, %v9649_v48  ;;  %v3214_v27 = vpop.f32.mrb[51].mxu1  ;;  %v7632_v50 = vld [vmem:[#allocation8 + $0x76c] ss:$16 sps:$4 sm:$0xff]   ;;  %v7630_v56 = vld [vmem:[#allocation8 + $0x768] ss:$16 sps:$4 sm:$0xff]  }
 0x360   :  { %v3284_v57 = vpack.c.bf16 %v6835_v52, %v6833_v61  ;;  %v6867_v51 = vadd.f32 %v3214_v27, %v9654_v25  ;;  %5223 = vmatpush1.bf16.msra.mxu0 %v7603_v19  ;;  %5675 = vmatpush1.bf16.msra.mxu1 %v7606_v1  ;;  %v7629_v1 = vld [vmem:[#allocation8 + $0x764] ss:$16 sps:$4 sm:$0xff]   ;;  %v7627_v61 = vld [vmem:[#allocation8 + $0x760] ss:$16 sps:$4 sm:$0xff]  }
 0x361   :  { %v9712_v10 = vpack.c.bf16 %v6866_v44, %v6864_v58  ;;  %5224 = vmatprep.subr.bf16.mxu0 %v7611_v40  ;;  %5676 = vmatprep.subr.bf16.mxu1 %v7614_v31  ;;  %v7635_v27 = vld [vmem:[#allocation8 + $0x784] ss:$16 sps:$4 sm:$0xff]  }
 0x362   :  { %v9714_v59 = vpack.c.bf16 %v6867_v51, %v6865_v60  ;;  %v2992_v17 = vpop.f32.mrb[52].mxu0  ;;  %5167 = vmatprep.mubr.bf16.mxu0 %v3284_v57  ;;  %5619 = vmatprep.mubr.bf16.mxu1 %v3284_v57  ;;  %v7638_v60 = vld [vmem:[#allocation8 + $0x78c] ss:$16 sps:$4 sm:$0xff]  }
 0x363   :  { %v2994_v38 = vpop.f32.mrb[53].mxu0  ;;  %5168 = vmatmul.mubr.bf16.gmra.mrb[80].mxu0 %v3283_v14  ;;  %5620 = vmatmul.mubr.bf16.gmra.mrb[80].mxu1 %v3283_v14  ;;  %v6836_v43 = vadd.f32 %v2992_v17, %v9643_v11 }
 0x364   :  { %v3218_v36 = vpop.f32.mrb[52].mxu1  ;;  %5225 = vmatpush1.bf16.msra.mxu0 %v7609_v49  ;;  %5677 = vmatpush1.bf16.msra.mxu1 %v7612_v2  ;;  %v2996_v41 = vpop.f32.mrb[54].mxu0  ;;  %v6837_v9 = vadd.f32 %v2994_v38, %v9646_v12 }
 0x365   :  { %v3220_v39 = vpop.f32.mrb[53].mxu1  ;;  %v6838_v24 = vadd.f32 %v2996_v41, %v9643_v11  ;;  %v2998_v15 = vpop.f32.mrb[55].mxu0  ;;  %5226 = vmatprep.subr.bf16.mxu0 %v7617_v34  ;;  %5678 = vmatprep.subr.bf16.mxu1 %v7620_v7  ;;  %v6868_v30 = vadd.f32 %v3218_v36, %v9649_v48 }
 0x366   :  { %v3222_v3 = vpop.f32.mrb[54].mxu1  ;;  %v6839_v0 = vadd.f32 %v2998_v15, %v9646_v12  ;;  %v6869_v45 = vadd.f32 %v3220_v39, %v9654_v25  ;;  %v7641_v39 = vld [vmem:[#allocation8 + $0x7a4] ss:$16 sps:$4 sm:$0xff]  }
 0x367   :  { %v3291_v37 = vpack.c.bf16 %v6838_v24, %v6836_v43  ;;  %v6870_v22 = vadd.f32 %v3222_v3, %v9649_v48  ;;  %v3224_v63 = vpop.f32.mrb[55].mxu1  ;;  %v7644_v24 = vld [vmem:[#allocation8 + $0x7ac] ss:$16 sps:$4 sm:$0xff]  }
 0x368   :  { %v3292_v13 = vpack.c.bf16 %v6839_v0, %v6837_v9  ;;  %v6871_v6 = vadd.f32 %v3224_v63, %v9654_v25  ;;  %5227 = vmatpush1.bf16.msra.mxu0 %v7615_v18  ;;  %5679 = vmatpush1.bf16.msra.mxu1 %v7618_v8  ;;  %v7633_v18 = vld [vmem:[#allocation8 + $0x780] ss:$16 sps:$4 sm:$0xff]   ;;  %v7636_v8 = vld [vmem:[#allocation8 + $0x788] ss:$16 sps:$4 sm:$0xff]  }
 0x369   :  { %v9724_v19 = vpack.c.bf16 %v6870_v22, %v6868_v30  ;;  %5228 = vmatprep.subr.bf16.mxu0 %v7623_v20  ;;  %5680 = vmatprep.subr.bf16.mxu1 %v7626_v4  ;;  %v7639_v0 = vld [vmem:[#allocation8 + $0x7a0] ss:$16 sps:$4 sm:$0xff]   ;;  %v7642_v30 = vld [vmem:[#allocation8 + $0x7a8] ss:$16 sps:$4 sm:$0xff]  }
 0x36a   :  { %v9726_v26 = vpack.c.bf16 %v6871_v6, %v6869_v45  ;;  %v3002_v21 = vpop.f32.mrb[56].mxu0  ;;  %5177 = vmatprep.mubr.bf16.mxu0 %v3292_v13  ;;  %5629 = vmatprep.mubr.bf16.mxu1 %v3292_v13  ;;  %v7647_v13 = vld [vmem:[#allocation8 + $0x7c4] ss:$16 sps:$4 sm:$0xff]   ;;  %v7650_v6 = vld [vmem:[#allocation8 + $0x7cc] ss:$16 sps:$4 sm:$0xff]  }
 0x36b   :  { %v3004_v46 = vpop.f32.mrb[57].mxu0  ;;  %5178 = vmatmul.mubr.bf16.gmra.mrb[84].mxu0 %v3291_v37  ;;  %5630 = vmatmul.mubr.bf16.gmra.mrb[84].mxu1 %v3291_v37  ;;  %v6840_v52 = vadd.f32 %v3002_v21, %v9643_v11 }
 0x36c   :  { %v3228_v40 = vpop.f32.mrb[56].mxu1  ;;  %5229 = vmatpush1.bf16.msra.mxu0 %v7621_v54  ;;  %5681 = vmatpush1.bf16.msra.mxu1 %v7624_v28  ;;  %v3006_v31 = vpop.f32.mrb[58].mxu0  ;;  %v6841_v57 = vadd.f32 %v3004_v46, %v9646_v12 }
 0x36d   :  { %v3230_v58 = vpop.f32.mrb[57].mxu1  ;;  %v6842_v14 = vadd.f32 %v3006_v31, %v9643_v11  ;;  %v3008_v44 = vpop.f32.mrb[59].mxu0  ;;  %5230 = vmatprep.subr.bf16.mxu0 %v7629_v1  ;;  %5682 = vmatprep.subr.bf16.mxu1 %v7632_v50  ;;  %v6872_v2 = vadd.f32 %v3228_v40, %v9649_v48 }
 0x36e   :  { %v3232_v51 = vpop.f32.mrb[58].mxu1  ;;  %v6843_v49 = vadd.f32 %v3008_v44, %v9646_v12  ;;  %v6873_v38 = vadd.f32 %v3230_v58, %v9654_v25  ;;  %v7656_v44 = vld [vmem:[#allocation8 + $0x7ec] ss:$16 sps:$4 sm:$0xff]  }
 0x36f   :  { %v3299_v34 = vpack.c.bf16 %v6842_v14, %v6840_v52  ;;  %v6874_v7 = vadd.f32 %v3232_v51, %v9649_v48  ;;  %v3234_v17 = vpop.f32.mrb[59].mxu1  ;;  %v7648_v52 = vld [vmem:[#allocation8 + $0x7c8] ss:$16 sps:$4 sm:$0xff]  }
 0x370   :  { %v3300_v36 = vpack.c.bf16 %v6843_v49, %v6841_v57  ;;  %v6875_v41 = vadd.f32 %v3234_v17, %v9654_v25  ;;  %5231 = vmatpush1.bf16.msra.mxu0 %v7627_v61  ;;  %5683 = vmatpush1.bf16.msra.mxu1 %v7630_v56  ;;  %v7645_v56 = vld [vmem:[#allocation8 + $0x7c0] ss:$16 sps:$4 sm:$0xff]  }
 0x371   :  { %v9736_v43 = vpack.c.bf16 %v6874_v7, %v6872_v2  ;;  %5232 = vmatprep.subr.bf16.mxu0 %v7635_v27  ;;  %5684 = vmatprep.subr.bf16.mxu1 %v7638_v60  ;;  %v7654_v27 = vld [vmem:[#allocation8 + $0x7e8] ss:$16 sps:$4 sm:$0xff]  }
 0x372   :  { %v9738_v15 = vpack.c.bf16 %v6875_v41, %v6873_v38  ;;  %v3012_v20 = vpop.f32.mrb[60].mxu0  ;;  %5187 = vmatprep.mubr.bf16.mxu0 %v3300_v36  ;;  %5639 = vmatprep.mubr.bf16.mxu1 %v3300_v36 }
 0x373   :  { %v3014_v4 = vpop.f32.mrb[61].mxu0  ;;  %5188 = vmatmul.mubr.bf16.gmra.mrb[88].mxu0 %v3299_v34  ;;  %5640 = vmatmul.mubr.bf16.gmra.mrb[88].mxu1 %v3299_v34  ;;  %v6844_v37 = vadd.f32 %v3012_v20, %v9643_v11 }
 0x374   :  { %v3238_v9 = vpop.f32.mrb[60].mxu1  ;;  %5233 = vmatpush1.bf16.msra.mxu0 %v7633_v18  ;;  %5685 = vmatpush1.bf16.msra.mxu1 %v7636_v8  ;;  %v3016_v3 = vpop.f32.mrb[62].mxu0  ;;  %v6845_v54 = vadd.f32 %v3014_v4, %v9646_v12 }
 0x375   :  { %v3240_v22 = vpop.f32.mrb[61].mxu1  ;;  %v6846_v63 = vadd.f32 %v3016_v3, %v9643_v11  ;;  %v3018_v45 = vpop.f32.mrb[63].mxu0  ;;  %5234 = vmatprep.subr.bf16.mxu0 %v7641_v39  ;;  %5686 = vmatprep.subr.bf16.mxu1 %v7644_v24  ;;  %v6876_v50 = vadd.f32 %v3238_v9, %v9649_v48 }
 0x376   :  { %v3242_v28 = vpop.f32.mrb[62].mxu1  ;;  %v6847_v1 = vadd.f32 %v3018_v45, %v9646_v12  ;;  %v6877_v31 = vadd.f32 %v3240_v22, %v9654_v25  ;;  %v7653_v12 = vld [vmem:[#allocation8 + $0x7e4] ss:$16 sps:$4 sm:$0xff]  }
 0x377   :  { %v3307_v21 = vpack.c.bf16 %v6846_v63, %v6844_v37  ;;  %v6878_v46 = vadd.f32 %v3242_v28, %v9649_v48  ;;  %v3244_v40 = vpop.f32.mrb[63].mxu1  ;;  %v7651_v48 = vld [vmem:[#allocation8 + $0x7e0] ss:$16 sps:$4 sm:$0xff]  }
 0x378   :  { %v3308_v61 = vpack.c.bf16 %v6847_v1, %v6845_v54  ;;  %v6879_v11 = vadd.f32 %v3244_v40, %v9654_v25  ;;  %5235 = vmatpush1.bf16.msra.mxu0 %v7639_v0  ;;  %5687 = vmatpush1.bf16.msra.mxu1 %v7642_v30  ;;  %v3567_v25 = vld [vmem:[%s10215_s6] sm:$0xf] }
 0x379   :  { %v3309_v58 = vpack.c.bf16 %v6878_v46, %v6876_v50  ;;  %5236 = vmatprep.subr.bf16.mxu0 %v7647_v13  ;;  %5688 = vmatprep.subr.bf16.mxu1 %v7650_v6 }
 0x37a   :  { %v3310_v14 = vpack.c.bf16 %v6879_v11, %v6877_v31  ;;  %5197 = vmatprep.mubr.bf16.mxu0 %v3308_v61  ;;  %5649 = vmatprep.mubr.bf16.mxu1 %v3308_v61 }
 0x37b   :  { %5198 = vmatmul.mubr.bf16.gmra.mrb[92].mxu0 %v3307_v21  ;;  %5650 = vmatmul.mubr.bf16.gmra.mrb[92].mxu1 %v3307_v21 }
 0x37c   :  { %5237 = vmatpush1.bf16.msra.mxu0 %v7645_v56  ;;  %5689 = vmatpush1.bf16.msra.mxu1 %v7648_v52 }
 0x37d   :  { %5240 = vmatprep.mubr.bf16.mxu0 %v9666_v33  ;;  %5692 = vmatprep.mubr.bf16.mxu1 %v9666_v33  ;;  %v9783_v33 = vrot.slane %v3567_v25, %v10585_v53 }
 0x37e   :  { %5238 = vmatprep.subr.bf16.mxu0 %v7653_v12  ;;  %5690 = vmatprep.subr.bf16.mxu1 %v7656_v44 }
 0x380   :  { %5239 = vmatpush1.bf16.msra.mxu0 %v7651_v48  ;;  %5691 = vmatpush1.bf16.msra.mxu1 %v7654_v27 }
 0x383   :  { %5241 = vmatmul.mubr.bf16.vlgmr.msra.gmra.mrb[64].mxu0 %v9664_v5  ;;  %5693 = vmatmul.mubr.bf16.vlgmr.msra.gmra.mrb[64].mxu1 %v9664_v5  ;;  %v9780_v5 = vrot.slane %v3567_v25, %v10584_v55 }
 0x384   :  { %5250 = vmatprep.mubr.bf16.mxu0 %v9678_v35  ;;  %5702 = vmatprep.mubr.bf16.mxu1 %v9678_v35  ;;  %v9789_v35 = vrot.slane %v3567_v25, %v10587_v32 }
 0x38b   :  { %5251 = vmatmul.mubr.bf16.gmra.mrb[68].mxu0 %v9676_v62  ;;  %5703 = vmatmul.mubr.bf16.gmra.mrb[68].mxu1 %v9676_v62  ;;  %v9786_v62 = vrot.slane %v3567_v25, %v10586_v16 }
 0x38c   :  { %5260 = vmatprep.mubr.bf16.mxu0 %v9690_v42  ;;  %5712 = vmatprep.mubr.bf16.mxu1 %v9690_v42 }
 0x393   :  { %5261 = vmatmul.mubr.bf16.gmra.mrb[72].mxu0 %v9688_v29  ;;  %5713 = vmatmul.mubr.bf16.gmra.mrb[72].mxu1 %v9688_v29 }
 0x394   :  { %5270 = vmatprep.mubr.bf16.mxu0 %v9702_v47  ;;  %5722 = vmatprep.mubr.bf16.mxu1 %v9702_v47 }
 0x39b   :  { %5271 = vmatmul.mubr.bf16.gmra.mrb[76].mxu0 %v9700_v23  ;;  %5723 = vmatmul.mubr.bf16.gmra.mrb[76].mxu1 %v9700_v23 }
 0x39c   :  { %5280 = vmatprep.mubr.bf16.mxu0 %v9714_v59  ;;  %5732 = vmatprep.mubr.bf16.mxu1 %v9714_v59 }
 0x3a3   :  { %5281 = vmatmul.mubr.bf16.gmra.mrb[80].mxu0 %v9712_v10  ;;  %5733 = vmatmul.mubr.bf16.gmra.mrb[80].mxu1 %v9712_v10 }
 0x3a4   :  { %5290 = vmatprep.mubr.bf16.mxu0 %v9726_v26  ;;  %5742 = vmatprep.mubr.bf16.mxu1 %v9726_v26 }
 0x3ab   :  { %5291 = vmatmul.mubr.bf16.gmra.mrb[84].mxu0 %v9724_v19  ;;  %5743 = vmatmul.mubr.bf16.gmra.mrb[84].mxu1 %v9724_v19 }
 0x3ac   :  { %5300 = vmatprep.mubr.bf16.mxu0 %v9738_v15  ;;  %5752 = vmatprep.mubr.bf16.mxu1 %v9738_v15 }
 0x3b3   :  { %5301 = vmatmul.mubr.bf16.gmra.mrb[88].mxu0 %v9736_v43  ;;  %5753 = vmatmul.mubr.bf16.gmra.mrb[88].mxu1 %v9736_v43 }
 0x3b4   :  { %5310 = vmatprep.mubr.bf16.mxu0 %v3310_v14  ;;  %5762 = vmatprep.mubr.bf16.mxu1 %v3310_v14 }
 0x3bb   :  { %5311 = vmatmul.mubr.bf16.gmra.mrb[92].mxu0 %v3309_v58  ;;  %5763 = vmatmul.mubr.bf16.gmra.mrb[92].mxu1 %v3309_v58 }
 0x456   :  { %v5242_v29 = vpop.f32.mrb[64].mxu0  ;;  %v5694_v42 = vpop.f32.mrb[64].mxu1 }
 0x457   :  { %v6880_v23 = vadd.f32 %v5242_v29, %v9780_v5  ;;  %v6912_v47 = vadd.f32 %v5694_v42, %v9783_v33  ;;  %v5244_v10 = vpop.f32.mrb[65].mxu0  ;;  %v5696_v59 = vpop.f32.mrb[65].mxu1 }
 0x458   :  { %v6881_v55 = vadd.f32 %v5244_v10, %v9786_v62  ;;  %v6913_v19 = vadd.f32 %v5696_v59, %v9789_v35  ;;  %v5246_v53 = vpop.f32.mrb[66].mxu0  ;;  %v5698_v26 = vpop.f32.mrb[66].mxu1 }
 0x459   :  { %v5837_v60 = vmul.f32 0.70710677, %v6880_v23  ;;  %v5839_v16 = vmul.f32 0.70710677, %v6912_v47  ;;  %v6882_v32 = vadd.f32 %v5246_v53, %v9780_v5  ;;  %v6914_v49 = vadd.f32 %v5698_v26, %v9783_v33  ;;  %v5248_v2 = vpop.f32.mrb[67].mxu0  ;;  %v5700_v34 = vpop.f32.mrb[67].mxu1 }
 0x45a   :  { %v5838_v57 = vmul.f32 0.70710677, %v6881_v55  ;;  %v5840_v51 = vmul.f32 0.70710677, %v6913_v19  ;;  %v6883_v7 = vadd.f32 %v5248_v2, %v9786_v62  ;;  %v6915_v17 = vadd.f32 %v5700_v34, %v9789_v35 }
 0x45b   :  { %7689 = verf.f32 %v5837_v60  ;;  %v5841_v38 = vmul.f32 0.70710677, %v6882_v32  ;;  %v5843_v36 = vmul.f32 0.70710677, %v6914_v49  ;;  %v5773_v8 = vmul.f32 0.5, %v6880_v23 }
 0x45c   :  { %7691 = verf.f32 %v5839_v16  ;;  %v5842_v41 = vmul.f32 0.70710677, %v6883_v7  ;;  %v5844_v43 = vmul.f32 0.70710677, %v6915_v17  ;;  %v5775_v20 = vmul.f32 0.5, %v6912_v47 }
 0x45d   :  { %7693 = verf.f32 %v5838_v57  ;;  %v5774_v30 = vmul.f32 0.5, %v6881_v55  ;;  %v5776_v13 = vmul.f32 0.5, %v6913_v19  ;;  %v5777_v6 = vmul.f32 0.5, %v6882_v32 }
 0x45e   :  { %7695 = verf.f32 %v5840_v51  ;;  %v5252_v18 = vpop.f32.mrb[68].mxu0  ;;  %v5704_v24 = vpop.f32.mrb[68].mxu1  ;;  %v9803_v1 = vmul.f32 0.5, %v6914_v49  ;;  %v5778_v11 = vmul.f32 0.5, %v6883_v7  ;;  %v9814_v56 = vmul.f32 0.5, %v6915_v17  ;;  %v7866_v7 = vld [vmem:[#allocation2] sm:$0xff] }
 0x45f   :  { %7697 = verf.f32 %v5841_v38  ;;  %v6884_v39 = vadd.f32 %v5252_v18, %v9780_v5  ;;  %v5254_v15 = vpop.f32.mrb[69].mxu0  ;;  %v6916_v4 = vadd.f32 %v5704_v24, %v9783_v33  ;;  %v5706_v3 = vpop.f32.mrb[69].mxu1 }
 0x460   :  { %7699 = verf.f32 %v5843_v36  ;;  %v6885_v9 = vadd.f32 %v5254_v15, %v9786_v62  ;;  %v5256_v0 = vpop.f32.mrb[70].mxu0  ;;  %v6917_v22 = vadd.f32 %v5706_v3, %v9789_v35  ;;  %v5708_v63 = vpop.f32.mrb[70].mxu1 }
 0x461   :  { %7701 = verf.f32 %v5842_v41  ;;  %v5845_v37 = vmul.f32 0.70710677, %v6884_v39  ;;  %v5258_v45 = vpop.f32.mrb[71].mxu0  ;;  %v5847_v54 = vmul.f32 0.70710677, %v6916_v4  ;;  %v5710_v28 = vpop.f32.mrb[71].mxu1  ;;  %v9806_v46 = vadd.f32 %v5256_v0, %v9780_v5 }
 0x462   :  { %7703 = verf.f32 %v5844_v43  ;;  %v5846_v50 = vmul.f32 0.70710677, %v6885_v9  ;;  %v5848_v21 = vmul.f32 0.70710677, %v6917_v22  ;;  %v9809_v40 = vadd.f32 %v5708_v63, %v9783_v33 }
 0x463   :  { %7705 = verf.f32 %v5845_v37  ;;  %v9812_v31 = vadd.f32 %v5258_v45, %v9786_v62  ;;  %v9816_v52 = vmul.f32 0.5, %v6884_v39  ;;  %v9818_v12 = vmul.f32 0.5, %v6916_v4  ;;  %v7868_v4 = vld [vmem:[#allocation2 + $0x8] sm:$0xff] }
 0x464   :  { %7707 = verf.f32 %v5847_v54  ;;  %v5849_v44 = vmul.f32 0.70710677, %v9806_v46  ;;  %v9823_v42 = vmul.f32 0.5, %v6885_v9  ;;  %v5851_v23 = vmul.f32 0.70710677, %v9809_v40 }
 0x465   :  { %v7690_v61 = vpop.eup %7689  ;;  %7709 = verf.f32 %v5846_v50  ;;  %v9827_v47 = vadd.f32 %v5710_v28, %v9789_v35  ;;  %v5850_v53 = vmul.f32 0.70710677, %v9812_v31  ;;  %v9836_v32 = vmul.f32 0.5, %v6917_v22  ;;  %v7869_v22 = vld [vmem:[#allocation2 + $0x18] sm:$0xff]  ;;  %v7870_v28 = vld [vmem:[#allocation2 + $0x20] sm:$0xff] }
 0x466   :  { %v7692_v58 = vpop.eup %7691  ;;  %v5965_v14 = vadd.f32 1.0, %v7690_v61  ;;  %7711 = verf.f32 %v5848_v21  ;;  %v5262_v48 = vpop.f32.mrb[72].mxu0 }
 0x467   :  { %v9821_v27 = vpop.f32.mrb[72].mxu1  ;;  %v7694_v25 = vpop.eup %7693  ;;  %v5967_v29 = vadd.f32 1.0, %v7692_v58  ;;  %7713 = verf.f32 %v5849_v44  ;;  %v5852_v15 = vmul.f32 0.70710677, %v9827_v47  ;;  %v9846_v37 = vadd.f32 %v5262_v48, %v9780_v5  ;;  %v7871_v48 = vld [vmem:[#allocation2 + $0x30] sm:$0xff] }
 0x468   :  { %v9829_v10 = vpop.f32.mrb[73].mxu0  ;;  %v7696_v59 = vpop.eup %7695  ;;  %v6029_v55 = vmul.f32 %v5965_v14, %v5773_v8  ;;  %v5966_v19 = vadd.f32 1.0, %v7694_v25  ;;  %7715 = verf.f32 %v5851_v23  ;;  %v7867_v8 = vld [vmem:[#allocation2 + $0x10] sm:$0xff] }
 0x469   :  { %v9832_v26 = vpop.f32.mrb[73].mxu1  ;;  %v9834_v60 = vpop.f32.mrb[74].mxu0  ;;  %v6031_v57 = vmul.f32 %v5967_v29, %v5775_v20  ;;  %v5968_v51 = vadd.f32 1.0, %v7696_v59  ;;  %7717 = verf.f32 %v5850_v53  ;;  %v5853_v23 = vmul.f32 0.70710677, %v9846_v37 }
 0x46a   :  { %v7698_v16 = vpop.eup %7697  ;;  %v9838_v49 = vpop.f32.mrb[74].mxu1  ;;  %v6093_v17 = vadd.f32 %v7866_v7, %v6029_v55  ;;  %v6030_v38 = vmul.f32 %v5966_v19, %v5774_v30  ;;  %7719 = verf.f32 %v5852_v15 }
 0x46b   :  { %v9840_v2 = vpop.f32.mrb[75].mxu0  ;;  %v7700_v34 = vpop.eup %7699  ;;  %v5969_v36 = vadd.f32 1.0, %v7698_v16  ;;  %v6095_v43 = vadd.f32 %v7867_v8, %v6031_v57  ;;  %v6032_v39 = vmul.f32 %v5968_v51, %v5776_v13  ;;  %v9863_v57 = vadd.f32 %v9821_v27, %v9783_v33  ;;  %v7874_v8 = vld [vmem:[#allocation2 + $0x40] sm:$0xff] }
 0x46c   :  { %v9842_v41 = vpop.f32.mrb[75].mxu1  ;;  %v7702_v18 = vpop.eup %7701  ;;  %v5971_v24 = vadd.f32 1.0, %v7700_v34  ;;  %6157 = vst [vmem:[#allocation10] sm:$0xff] %v6093_v17  ;;  %v6094_v9 = vadd.f32 %v7868_v4, %v6030_v38  ;;  %v7873_v34 = vld [vmem:[#allocation2 + $0x38] sm:$0xff]  ;;  %7721 = verf.f32 %v5853_v23 }
 0x46d   :  { %v7704_v20 = vpop.eup %7703  ;;  %v6033_v3 = vmul.f32 %v5969_v36, %v5777_v6  ;;  %v5970_v0 = vadd.f32 1.0, %v7702_v18  ;;  %6159 = vst [vmem:[#allocation10 + $0x10] sm:$0xff] %v6095_v43  ;;  %v6096_v63 = vadd.f32 %v7869_v22, %v6032_v39  ;;  %v5785_v6 = vmul.f32 0.5, %v9806_v46  ;;  %v7872_v46 = vld [vmem:[#allocation2 + $0x28] sm:$0xff] }
 0x46e   :  { %v7706_v30 = vpop.eup %7705  ;;  %v6035_v45 = vmul.f32 %v5971_v24, %v9803_v1  ;;  %v5972_v54 = vadd.f32 1.0, %v7704_v20  ;;  %6158 = vst [vmem:[#allocation10 + $0x8] sm:$0xff] %v6094_v9  ;;  %v9850_v58 = vpop.f32.mrb[76].mxu0  ;;  %v5787_v39 = vmul.f32 0.5, %v9809_v40  ;;  %v5855_v24 = vmul.f32 0.70710677, %v9863_v57 }
 0x46f   :  { %v7708_v13 = vpop.eup %7707  ;;  %v6097_v50 = vadd.f32 %v7870_v28, %v6033_v3  ;;  %v6034_v21 = vmul.f32 %v5970_v0, %v5778_v11  ;;  %v5973_v61 = vadd.f32 1.0, %v7706_v30  ;;  %v9852_v14 = vpop.f32.mrb[76].mxu1  ;;  %6160 = vst [vmem:[#allocation10 + $0x18] sm:$0xff] %v6096_v63  ;;  %v7875_v20 = vld [vmem:[#allocation2 + $0x50] sm:$0xff]  ;;  %v6889_v3 = vadd.f32 %v9829_v10, %v9786_v62  ;;  %v7876_v30 = vld [vmem:[#allocation2 + $0x48] sm:$0xff] }
 0x470   :  { %v7710_v44 = vpop.eup %7709  ;;  %v6099_v25 = vadd.f32 %v7871_v48, %v6035_v45  ;;  %v6036_v1 = vmul.f32 %v5972_v54, %v9814_v56  ;;  %v5975_v29 = vadd.f32 1.0, %v7708_v13  ;;  %v9856_v59 = vpop.f32.mrb[77].mxu0  ;;  %7723 = verf.f32 %v5855_v24  ;;  %v7878_v48 = vld [vmem:[#allocation2 + $0x60] sm:$0xff]  ;;  %v7881_v24 = vld [vmem:[#allocation2 + $0x78] sm:$0xff] }
 0x471   :  { %v9858_v55 = vpop.f32.mrb[77].mxu1  ;;  %v7712_v11 = vpop.eup %7711  ;;  %6161 = vst [vmem:[#allocation10 + $0x20] sm:$0xff] %v6097_v50  ;;  %v6098_v19 = vadd.f32 %v7872_v46, %v6034_v21  ;;  %v6037_v53 = vmul.f32 %v5973_v61, %v9816_v52  ;;  %v5974_v16 = vadd.f32 1.0, %v7710_v44  ;;  %v6921_v40 = vadd.f32 %v9832_v26, %v9789_v35 }
 0x472   :  { %v9865_v51 = vpop.f32.mrb[78].mxu0  ;;  %v9867_v56 = vpop.f32.mrb[78].mxu1  ;;  %6163 = vst [vmem:[#allocation10 + $0x30] sm:$0xff] %v6099_v25  ;;  %v6100_v7 = vadd.f32 %v7873_v34, %v6036_v1  ;;  %v6039_v17 = vmul.f32 %v5975_v29, %v9818_v12  ;;  %v5976_v38 = vadd.f32 1.0, %v7712_v11  ;;  %v5786_v13 = vmul.f32 0.5, %v9812_v31 }
 0x473   :  { %v9870_v36 = vpop.f32.mrb[79].mxu0  ;;  %v9872_v18 = vpop.f32.mrb[79].mxu1  ;;  %6162 = vst [vmem:[#allocation10 + $0x28] sm:$0xff] %v6098_v19  ;;  %v6101_v27 = vadd.f32 %v7874_v8, %v6037_v53  ;;  %v6038_v43 = vmul.f32 %v5974_v16, %v9823_v42  ;;  %v7877_v42 = vld [vmem:[#allocation2 + $0x58] sm:$0xff]  ;;  %v5788_v10 = vmul.f32 0.5, %v9827_v47  ;;  %v6890_v1 = vadd.f32 %v9834_v60, %v9780_v5  ;;  %v7879_v47 = vld [vmem:[#allocation2 + $0x70] sm:$0xff] }
 0x474   :  { %v7714_v52 = vpop.eup %7713  ;;  %6164 = vst [vmem:[#allocation10 + $0x38] sm:$0xff] %v6100_v7  ;;  %v6103_v12 = vadd.f32 %v7875_v20, %v6039_v17  ;;  %v6040_v4 = vmul.f32 %v5976_v38, %v9836_v32  ;;  %v5854_v50 = vmul.f32 0.70710677, %v6889_v3  ;;  %v5856_v21 = vmul.f32 0.70710677, %v6921_v40  ;;  %v7880_v60 = vld [vmem:[#allocation2 + $0x68] sm:$0xff] }
 0x475   :  { %v7716_v15 = vpop.eup %7715  ;;  %v5977_v9 = vadd.f32 1.0, %v7714_v52  ;;  %6165 = vst [vmem:[#allocation10 + $0x40] sm:$0xff] %v6101_v27  ;;  %v6102_v22 = vadd.f32 %v7876_v30, %v6038_v43  ;;  %v9890_v31 = vadd.f32 %v9838_v49, %v9783_v33  ;;  %v6891_v46 = vadd.f32 %v9840_v2, %v9786_v62 }
 0x476   :  { %v7718_v0 = vpop.eup %7717  ;;  %v5979_v63 = vadd.f32 1.0, %v7716_v15  ;;  %6167 = vst [vmem:[#allocation10 + $0x50] sm:$0xff] %v6103_v12  ;;  %v6104_v45 = vadd.f32 %v7877_v42, %v6040_v4  ;;  %v9884_v61 = vpop.f32.mrb[80].mxu0  ;;  %7725 = verf.f32 %v5854_v50  ;;  %v5857_v49 = vmul.f32 0.70710677, %v6890_v1 }
 0x477   :  { %v6041_v54 = vmul.f32 %v5977_v9, %v5785_v6  ;;  %v5978_v32 = vadd.f32 1.0, %v7718_v0  ;;  %6166 = vst [vmem:[#allocation10 + $0x48] sm:$0xff] %v6102_v22  ;;  %v7720_v44 = vpop.eup %7719  ;;  %v9892_v6 = vpop.f32.mrb[80].mxu1  ;;  %7727 = verf.f32 %v5856_v21  ;;  %v5789_v38 = vmul.f32 0.5, %v9846_v37 }
 0x478   :  { %v6043_v28 = vmul.f32 %v5979_v63, %v5787_v39  ;;  %6168 = vst [vmem:[#allocation10 + $0x58] sm:$0xff] %v6104_v45  ;;  %v9894_v29 = vpop.f32.mrb[81].mxu0  ;;  %v5980_v11 = vadd.f32 1.0, %v7720_v44  ;;  %v9898_v19 = vpop.f32.mrb[81].mxu1  ;;  %v5859_v52 = vmul.f32 0.70710677, %v9890_v31  ;;  %7729 = verf.f32 %v5857_v49 }
 0x479   :  { %v6105_v25 = vadd.f32 %v7878_v48, %v6041_v54  ;;  %v6042_v26 = vmul.f32 %v5978_v32, %v5786_v13  ;;  %v9900_v53 = vpop.f32.mrb[82].mxu0  ;;  %v9902_v34 = vpop.f32.mrb[82].mxu1  ;;  %v5858_v27 = vmul.f32 0.70710677, %v6891_v46  ;;  %v6923_v43 = vadd.f32 %v9842_v41, %v9789_v35 }
 0x47a   :  { %v6107_v23 = vadd.f32 %v7879_v47, %v6043_v28  ;;  %v9904_v7 = vpop.f32.mrb[83].mxu0  ;;  %v6044_v17 = vmul.f32 %v5980_v11, %v5788_v10  ;;  %v9908_v2 = vpop.f32.mrb[83].mxu1  ;;  %v6892_v39 = vadd.f32 %v9850_v58, %v9780_v5  ;;  %7731 = verf.f32 %v5859_v52 }
 0x47b   :  { %6169 = vst [vmem:[#allocation10 + $0x60] sm:$0xff] %v6105_v25  ;;  %v6106_v16 = vadd.f32 %v7880_v60, %v6042_v26  ;;  %v7722_v8 = vpop.eup %7721  ;;  %v9916_v37 = vadd.f32 %v9852_v14, %v9783_v33  ;;  %v5791_v12 = vmul.f32 0.5, %v9863_v57  ;;  %v5790_v4 = vmul.f32 0.5, %v6889_v3 }
 0x47c   :  { %6171 = vst [vmem:[#allocation10 + $0x70] sm:$0xff] %v6107_v23  ;;  %v6108_v15 = vadd.f32 %v7881_v24, %v6044_v17  ;;  %v5981_v20 = vadd.f32 1.0, %v7722_v8  ;;  %7733 = verf.f32 %v5858_v27  ;;  %v5860_v9 = vmul.f32 0.70710677, %v6923_v43  ;;  %v7724_v0 = vpop.eup %7723  ;;  %v7883_v23 = vld [vmem:[#allocation2 + $0x90] sm:$0xff] }
 0x47d   :  { %6170 = vst [vmem:[#allocation10 + $0x68] sm:$0xff] %v6106_v16  ;;  %v5792_v41 = vmul.f32 0.5, %v6921_v40  ;;  %v5861_v22 = vmul.f32 0.70710677, %v6892_v39  ;;  %v5863_v58 = vmul.f32 0.70710677, %v9916_v37  ;;  %v9924_v14 = vadd.f32 %v9856_v59, %v9786_v62 }
 0x47e   :  { %6172 = vst [vmem:[#allocation10 + $0x78] sm:$0xff] %v6108_v15  ;;  %v6045_v30 = vmul.f32 %v5981_v20, %v5789_v38  ;;  %v9920_v63 = vpop.f32.mrb[84].mxu0  ;;  %v5983_v42 = vadd.f32 1.0, %v7724_v0  ;;  %7735 = verf.f32 %v5860_v9  ;;  %v9928_v57 = vadd.f32 %v9858_v55, %v9789_v35  ;;  %v9930_v3 = vpop.f32.mrb[84].mxu1  ;;  %v7882_v40 = vld [vmem:[#allocation2 + $0x80] sm:$0xff] }
 0x47f   :  { %v9932_v45 = vpop.f32.mrb[85].mxu0  ;;  %7737 = verf.f32 %v5861_v22  ;;  %v9936_v13 = vadd.f32 %v9865_v51, %v9780_v5  ;;  %v9940_v32 = vadd.f32 %v9867_v56, %v9783_v33  ;;  %v9942_v59 = vpop.f32.mrb[85].mxu1  ;;  %v5793_v10 = vmul.f32 0.5, %v6890_v1 }
 0x480   :  { %v6109_v54 = vadd.f32 %v7882_v40, %v6045_v30  ;;  %v9944_v28 = vpop.f32.mrb[86].mxu0  ;;  %v6047_v55 = vmul.f32 %v5983_v42, %v5791_v12  ;;  %7739 = verf.f32 %v5863_v58  ;;  %v5862_v50 = vmul.f32 0.70710677, %v9924_v14  ;;  %v9947_v21 = vpop.f32.mrb[86].mxu1 }
 0x481   :  { %v9949_v44 = vpop.f32.mrb[87].mxu0  ;;  %v7726_v48 = vpop.eup %7725  ;;  %v5795_v51 = vmul.f32 0.5, %v9890_v31  ;;  %v5794_v25 = vmul.f32 0.5, %v6891_v46  ;;  %v5864_v56 = vmul.f32 0.70710677, %v9928_v57  ;;  %v5796_v60 = vmul.f32 0.5, %v6923_v43 }
 0x482   :  { %6173 = vst [vmem:[#allocation10 + $0x80] sm:$0xff] %v6109_v54  ;;  %v5865_v26 = vmul.f32 0.70710677, %v9936_v13  ;;  %v7728_v47 = vpop.eup %7727  ;;  %v6111_v11 = vadd.f32 %v7883_v23, %v6047_v55  ;;  %v5982_v1 = vadd.f32 1.0, %v7726_v48  ;;  %7741 = verf.f32 %v5862_v50  ;;  %v9954_v16 = vpop.f32.mrb[87].mxu1  ;;  %v7886_v23 = vld [vmem:[#allocation2 + $0xa0] sm:$0xff] }
 0x483   :  { %v5984_v49 = vadd.f32 1.0, %v7728_v47  ;;  %7743 = verf.f32 %v5864_v56  ;;  %v5867_v17 = vmul.f32 0.70710677, %v9940_v32  ;;  %v9959_v31 = vadd.f32 %v9870_v36, %v9786_v62  ;;  %v7730_v46 = vpop.eup %7729 }
 0x484   :  { %6175 = vst [vmem:[#allocation10 + $0x90] sm:$0xff] %v6111_v11  ;;  %v6046_v38 = vmul.f32 %v5982_v1, %v5790_v4  ;;  %7745 = verf.f32 %v5865_v26  ;;  %v9963_v52 = vadd.f32 %v9872_v18, %v9789_v35  ;;  %v9967_v8 = vadd.f32 %v9884_v61, %v9780_v5  ;;  %v7732_v27 = vpop.eup %7731  ;;  %v7884_v4 = vld [vmem:[#allocation2 + $0x88] sm:$0xff] }
 0x485   :  { %v6048_v43 = vmul.f32 %v5984_v49, %v5792_v41  ;;  %v5985_v24 = vadd.f32 1.0, %v7730_v46  ;;  %v5797_v15 = vmul.f32 0.5, %v6892_v39  ;;  %7747 = verf.f32 %v5867_v17  ;;  %v7885_v41 = vld [vmem:[#allocation2 + $0x98] sm:$0xff]  ;;  %v7887_v46 = vld [vmem:[#allocation2 + $0xb0] sm:$0xff] }
 0x486   :  { %v9969_v20 = vpop.f32.mrb[88].mxu0  ;;  %v9971_v36 = vpop.f32.mrb[88].mxu1  ;;  %v6110_v9 = vadd.f32 %v7884_v4, %v6046_v38  ;;  %v5987_v0 = vadd.f32 1.0, %v7732_v27  ;;  %v5799_v18 = vmul.f32 0.5, %v9916_v37  ;;  %v5866_v30 = vmul.f32 0.70710677, %v9959_v31 }
 0x487   :  { %v7734_v12 = vpop.eup %7733  ;;  %v9975_v22 = vpop.f32.mrb[89].mxu0  ;;  %v6112_v58 = vadd.f32 %v7885_v41, %v6048_v43  ;;  %v6049_v39 = vmul.f32 %v5985_v24, %v5793_v10  ;;  %v5868_v40 = vmul.f32 0.70710677, %v9963_v52  ;;  %v5798_v37 = vmul.f32 0.5, %v9924_v14  ;;  %v7888_v27 = vld [vmem:[#allocation2 + $0xa8] sm:$0xff] }
 0x488   :  { %v9977_v61 = vpop.f32.mrb[89].mxu1  ;;  %v5986_v42 = vadd.f32 1.0, %v7734_v12  ;;  %v9980_v54 = vpop.f32.mrb[90].mxu0  ;;  %6174 = vst [vmem:[#allocation10 + $0x88] sm:$0xff] %v6110_v9  ;;  %v6051_v48 = vmul.f32 %v5987_v0, %v5795_v51  ;;  %7749 = verf.f32 %v5866_v30  ;;  %v5869_v56 = vmul.f32 0.70710677, %v9967_v8 }
 0x489   :  { %v9982_v55 = vpop.f32.mrb[90].mxu1  ;;  %v7736_v50 = vpop.eup %7735  ;;  %6176 = vst [vmem:[#allocation10 + $0x98] sm:$0xff] %v6112_v58  ;;  %v6113_v11 = vadd.f32 %v7886_v23, %v6049_v39  ;;  %7751 = verf.f32 %v5868_v40  ;;  %v9992_v14 = vadd.f32 %v9892_v6, %v9783_v33  ;;  %v9996_v4 = vadd.f32 %v9894_v29, %v9786_v62  ;;  %v7889_v58 = vld [vmem:[#allocation2 + $0xb8] sm:$0xff] }
 0x48a   :  { %v9986_v26 = vpop.f32.mrb[91].mxu0  ;;  %v9988_v47 = vpop.f32.mrb[91].mxu1  ;;  %v6050_v1 = vmul.f32 %v5986_v42, %v5794_v25  ;;  %v5988_v49 = vadd.f32 1.0, %v7736_v50  ;;  %v6115_v38 = vadd.f32 %v7887_v46, %v6051_v48  ;;  %7753 = verf.f32 %v5869_v56 }
 0x48b   :  { %v7738_v10 = vpop.eup %7737  ;;  %6177 = vst [vmem:[#allocation10 + $0xa0] sm:$0xff] %v6113_v11  ;;  %v5800_v0 = vmul.f32 0.5, %v9928_v57  ;;  %v5871_v30 = vmul.f32 0.70710677, %v9992_v14  ;;  %v10002_v6 = vadd.f32 %v9898_v19, %v9789_v35  ;;  %v5801_v29 = vmul.f32 0.5, %v9936_v13  ;;  %v7890_v57 = vld [vmem:[#allocation2 + $0xc0] sm:$0xff] }
 0x48c   :  { %v7740_v17 = vpop.eup %7739  ;;  %v5989_v51 = vadd.f32 1.0, %v7738_v10  ;;  %v6114_v43 = vadd.f32 %v7888_v27, %v6050_v1  ;;  %v6052_v24 = vmul.f32 %v5988_v49, %v5796_v60  ;;  %6179 = vst [vmem:[#allocation10 + $0xb0] sm:$0xff] %v6115_v38  ;;  %v5870_v19 = vmul.f32 0.70710677, %v9996_v4 }
 0x48d   :  { %v5991_v12 = vadd.f32 1.0, %v7740_v17  ;;  %v7742_v25 = vpop.eup %7741  ;;  %7755 = verf.f32 %v5871_v30  ;;  %v5803_v17 = vmul.f32 0.5, %v9940_v32  ;;  %v10026_v32 = vadd.f32 %v9900_v53, %v9780_v5 }
 0x48e   :  { %v6053_v9 = vmul.f32 %v5989_v51, %v5797_v15  ;;  %v7744_v41 = vpop.eup %7743  ;;  %6178 = vst [vmem:[#allocation10 + $0xa8] sm:$0xff] %v6114_v43  ;;  %v6116_v60 = vadd.f32 %v7889_v58, %v6052_v24  ;;  %v5990_v42 = vadd.f32 1.0, %v7742_v25  ;;  %v10005_v40 = vpop.f32.mrb[92].mxu0  ;;  %7757 = verf.f32 %v5870_v19  ;;  %v7892_v25 = vld [vmem:[#allocation2 + $0xc8] sm:$0xff] }
 0x48f   :  { %v6055_v39 = vmul.f32 %v5991_v12, %v5799_v18  ;;  %v10007_v50 = vpop.f32.mrb[92].mxu1  ;;  %v7746_v15 = vpop.eup %7745  ;;  %v5992_v56 = vadd.f32 1.0, %v7744_v41  ;;  %v7891_v18 = vld [vmem:[#allocation2 + $0xd0] sm:$0xff]  ;;  %v5872_v43 = vmul.f32 0.70710677, %v10002_v6  ;;  %v10030_v30 = vadd.f32 %v9902_v34, %v9783_v33  ;;  %v7893_v41 = vld [vmem:[#allocation2 + $0xd8] sm:$0xff] }
 0x490   :  { %v6117_v48 = vadd.f32 %v7890_v57, %v6053_v9  ;;  %v10010_v10 = vpop.f32.mrb[93].mxu0  ;;  %v10012_v23 = vpop.f32.mrb[93].mxu1  ;;  %6180 = vst [vmem:[#allocation10 + $0xb8] sm:$0xff] %v6116_v60  ;;  %v6054_v13 = vmul.f32 %v5990_v42, %v5798_v37  ;;  %v5993_v49 = vadd.f32 1.0, %v7746_v15  ;;  %v5802_v53 = vmul.f32 0.5, %v9959_v31 }
 0x491   :  { %v7748_v11 = vpop.eup %7747  ;;  %v6119_v1 = vadd.f32 %v7891_v18, %v6055_v39  ;;  %v10015_v46 = vpop.f32.mrb[94].mxu0  ;;  %v6056_v51 = vmul.f32 %v5992_v56, %v5800_v0  ;;  %7759 = verf.f32 %v5872_v43  ;;  %v10034_v39 = vadd.f32 %v9904_v7, %v9786_v62  ;;  %v7895_v56 = vld [vmem:[#allocation2 + $0xf0] sm:$0xff] }
 0x492   :  { %v10017_v38 = vpop.f32.mrb[94].mxu1  ;;  %6181 = vst [vmem:[#allocation10 + $0xc0] sm:$0xff] %v6117_v48  ;;  %v5995_v27 = vadd.f32 1.0, %v7748_v11  ;;  %v10020_v24 = vpop.f32.mrb[95].mxu0  ;;  %v6118_v37 = vadd.f32 %v7892_v25, %v6054_v13  ;;  %v6057_v9 = vmul.f32 %v5993_v49, %v5801_v29  ;;  %v7894_v29 = vld [vmem:[#allocation2 + $0xe0] sm:$0xff]  ;;  %v5804_v11 = vmul.f32 0.5, %v9963_v52 }
 0x493   :  { %v10022_v12 = vpop.f32.mrb[95].mxu1  ;;  %6183 = vst [vmem:[#allocation10 + $0xd0] sm:$0xff] %v6119_v1  ;;  %v7750_v0 = vpop.eup %7749  ;;  %v6120_v58 = vadd.f32 %v7893_v41, %v6056_v51  ;;  %v5873_v48 = vmul.f32 0.70710677, %v10026_v32  ;;  %v5875_v1 = vmul.f32 0.70710677, %v10030_v30  ;;  %v6931_v51 = vadd.f32 %v9908_v2, %v9789_v35 }
 0x494   :  { %v6059_v60 = vmul.f32 %v5995_v27, %v5803_v17  ;;  %v7752_v42 = vpop.eup %7751  ;;  %6182 = vst [vmem:[#allocation10 + $0xc8] sm:$0xff] %v6118_v37  ;;  %v6121_v15 = vadd.f32 %v7894_v29, %v6057_v9  ;;  %v5994_v57 = vadd.f32 1.0, %v7750_v0  ;;  %v5805_v13 = vmul.f32 0.5, %v9967_v8  ;;  %v7896_v27 = vld [vmem:[#allocation2 + $0xe8] sm:$0xff]  ;;  %v7897_v9 = vld [vmem:[#allocation2 + $0xf8] sm:$0xff] }
 0x495   :  { %v7754_v34 = vpop.eup %7753  ;;  %6184 = vst [vmem:[#allocation10 + $0xd8] sm:$0xff] %v6120_v58  ;;  %v5996_v18 = vadd.f32 1.0, %v7752_v42  ;;  %7761 = verf.f32 %v5873_v48  ;;  %v5874_v17 = vmul.f32 0.70710677, %v10034_v39  ;;  %v10046_v25 = vadd.f32 %v9920_v63, %v9780_v5  ;;  %v7898_v58 = vld [vmem:[#allocation2 + $0x100] sm:$0xff] }
 0x496   :  { %v6123_v19 = vadd.f32 %v7895_v56, %v6059_v60  ;;  %6185 = vst [vmem:[#allocation10 + $0xe0] sm:$0xff] %v6121_v15  ;;  %v6058_v7 = vmul.f32 %v5994_v57, %v5802_v53  ;;  %v5997_v49 = vadd.f32 1.0, %v7754_v34  ;;  %7763 = verf.f32 %v5875_v1 }
 0x497   :  { %v6060_v31 = vmul.f32 %v5996_v18, %v5804_v11  ;;  %v10050_v8 = vadd.f32 %v9930_v3, %v9783_v33  ;;  %v7756_v37 = vpop.eup %7755  ;;  %7765 = verf.f32 %v5874_v17  ;;  %v5876_v41 = vmul.f32 0.70710677, %v6931_v51 }
 0x498   :  { %6187 = vst [vmem:[#allocation10 + $0xf0] sm:$0xff] %v6123_v19  ;;  %v6122_v43 = vadd.f32 %v7896_v27, %v6058_v7  ;;  %v6061_v52 = vmul.f32 %v5997_v49, %v5805_v13  ;;  %v5807_v2 = vmul.f32 0.5, %v9992_v14  ;;  %v5999_v42 = vadd.f32 1.0, %v7756_v37  ;;  %v7758_v15 = vpop.eup %7757 }
 0x499   :  { %v6124_v0 = vadd.f32 %v7897_v9, %v6060_v31  ;;  %v5877_v29 = vmul.f32 0.70710677, %v10046_v25  ;;  %v5806_v63 = vmul.f32 0.5, %v9996_v4  ;;  %7767 = verf.f32 %v5876_v41  ;;  %v7900_v31 = vld [vmem:[#allocation2 + $0x108] sm:$0xff]  ;;  %v7901_v9 = vld [vmem:[#allocation2 + $0x118] sm:$0xff] }
 0x49a   :  { %6186 = vst [vmem:[#allocation10 + $0xe8] sm:$0xff] %v6122_v43  ;;  %v6125_v60 = vadd.f32 %v7898_v58, %v6061_v52  ;;  %v5879_v3 = vmul.f32 0.70710677, %v10050_v8  ;;  %v10058_v53 = vadd.f32 %v9932_v45, %v9786_v62  ;;  %v6063_v57 = vmul.f32 %v5999_v42, %v5807_v2  ;;  %v7899_v45 = vld [vmem:[#allocation2 + $0x110] sm:$0xff] }
 0x49b   :  { %6188 = vst [vmem:[#allocation10 + $0xf8] sm:$0xff] %v6124_v0  ;;  %v5998_v48 = vadd.f32 1.0, %v7758_v15  ;;  %7769 = verf.f32 %v5877_v29  ;;  %v10062_v14 = vadd.f32 %v9942_v59, %v9789_v35  ;;  %v7760_v34 = vpop.eup %7759  ;;  %v5808_v56 = vmul.f32 0.5, %v10002_v6 }
 0x49c   :  { %6189 = vst [vmem:[#allocation10 + $0x100] sm:$0xff] %v6125_v60  ;;  %7771 = verf.f32 %v5879_v3  ;;  %v5878_v4 = vmul.f32 0.70710677, %v10058_v53  ;;  %v10068_v19 = vadd.f32 %v9944_v28, %v9780_v5  ;;  %v6127_v11 = vadd.f32 %v7899_v45, %v6063_v57  ;;  %v7902_v3 = vld [vmem:[#allocation2 + $0x120] sm:$0xff] }
 0x49d   :  { %v6062_v18 = vmul.f32 %v5998_v48, %v5806_v63  ;;  %v6000_v1 = vadd.f32 1.0, %v7760_v34  ;;  %v5809_v7 = vmul.f32 0.5, %v10026_v32  ;;  %v5811_v13 = vmul.f32 0.5, %v10030_v30  ;;  %v7903_v34 = vld [vmem:[#allocation2 + $0x130] sm:$0xff] }
 0x49e   :  { %7773 = verf.f32 %v5878_v4  ;;  %v5880_v59 = vmul.f32 0.70710677, %v10062_v14  ;;  %v5881_v6 = vmul.f32 0.70710677, %v10068_v19  ;;  %6191 = vst [vmem:[#allocation10 + $0x110] sm:$0xff] %v6127_v11  ;;  %v10076_v28 = vadd.f32 %v9947_v21, %v9783_v33 }
 0x49f   :  { %v7762_v49 = vpop.eup %7761  ;;  %v6126_v17 = vadd.f32 %v7900_v31, %v6062_v18  ;;  %v6064_v27 = vmul.f32 %v6000_v1, %v5808_v56  ;;  %v10080_v43 = vadd.f32 %v9949_v44, %v9786_v62  ;;  %v10084_v52 = vadd.f32 %v9954_v16, %v9789_v35  ;;  %v7904_v1 = vld [vmem:[#allocation2 + $0x128] sm:$0xff] }
 0x4a0   :  { %v7764_v32 = vpop.eup %7763  ;;  %v6001_v30 = vadd.f32 1.0, %v7762_v49  ;;  %7775 = verf.f32 %v5880_v59  ;;  %v10088_v37 = vadd.f32 %v9969_v20, %v9780_v5  ;;  %v5810_v41 = vmul.f32 0.5, %v10034_v39 }
 0x4a1   :  { %6190 = vst [vmem:[#allocation10 + $0x108] sm:$0xff] %v6126_v17  ;;  %v6128_v0 = vadd.f32 %v7901_v9, %v6064_v27  ;;  %v6003_v21 = vadd.f32 1.0, %v7764_v32  ;;  %7777 = verf.f32 %v5881_v6  ;;  %v7766_v44 = vpop.eup %7765  ;;  %v5812_v60 = vmul.f32 0.5, %v6931_v51 }
 0x4a2   :  { %v6065_v58 = vmul.f32 %v6001_v30, %v5809_v7  ;;  %v5883_v2 = vmul.f32 0.70710677, %v10076_v28  ;;  %v5882_v42 = vmul.f32 0.70710677, %v10080_v43  ;;  %v6002_v29 = vadd.f32 1.0, %v7766_v44 }
 0x4a3   :  { %6192 = vst [vmem:[#allocation10 + $0x118] sm:$0xff] %v6128_v0  ;;  %v6067_v16 = vmul.f32 %v6003_v21, %v5811_v13  ;;  %v5813_v20 = vmul.f32 0.5, %v10046_v25  ;;  %v5884_v15 = vmul.f32 0.70710677, %v10084_v52  ;;  %v7768_v63 = vpop.eup %7767  ;;  %v5815_v39 = vmul.f32 0.5, %v10050_v8  ;;  %v7906_v21 = vld [vmem:[#allocation2 + $0x140] sm:$0xff] }
 0x4a4   :  { %v6129_v57 = vadd.f32 %v7902_v3, %v6065_v58  ;;  %7779 = verf.f32 %v5883_v2  ;;  %v5885_v48 = vmul.f32 0.70710677, %v10088_v37  ;;  %v6066_v4 = vmul.f32 %v6002_v29, %v5810_v41  ;;  %v7907_v58 = vld [vmem:[#allocation2 + $0x150] sm:$0xff] }
 0x4a5   :  { %v7770_v51 = vpop.eup %7769  ;;  %v6131_v56 = vadd.f32 %v7903_v34, %v6067_v16  ;;  %v6004_v45 = vadd.f32 1.0, %v7768_v63  ;;  %7781 = verf.f32 %v5882_v42  ;;  %v10099_v25 = vadd.f32 %v9971_v36, %v9783_v33  ;;  %v7905_v36 = vld [vmem:[#allocation2 + $0x138] sm:$0xff] }
 0x4a6   :  { %v7772_v11 = vpop.eup %7771  ;;  %6193 = vst [vmem:[#allocation10 + $0x120] sm:$0xff] %v6129_v57  ;;  %v6005_v18 = vadd.f32 1.0, %v7770_v51  ;;  %7783 = verf.f32 %v5884_v15  ;;  %v10103_v8 = vadd.f32 %v9975_v22, %v9786_v62  ;;  %v6130_v7 = vadd.f32 %v7904_v1, %v6066_v4  ;;  %v7908_v15 = vld [vmem:[#allocation2 + $0x148] sm:$0xff]  ;;  %v7909_v34 = vld [vmem:[#allocation2 + $0x158] sm:$0xff] }
 0x4a7   :  { %6195 = vst [vmem:[#allocation10 + $0x130] sm:$0xff] %v6131_v56  ;;  %v6068_v13 = vmul.f32 %v6004_v45, %v5812_v60  ;;  %v6007_v59 = vadd.f32 1.0, %v7772_v11  ;;  %7785 = verf.f32 %v5885_v48  ;;  %v5814_v31 = vmul.f32 0.5, %v10058_v53  ;;  %v7910_v11 = vld [vmem:[#allocation2 + $0x160] sm:$0xff] }
 0x4a8   :  { %v7774_v6 = vpop.eup %7773  ;;  %v6069_v49 = vmul.f32 %v6005_v18, %v5813_v20  ;;  %v5816_v17 = vmul.f32 0.5, %v10062_v14  ;;  %v5887_v27 = vmul.f32 0.70710677, %v10099_v25  ;;  %6194 = vst [vmem:[#allocation10 + $0x128] sm:$0xff] %v6130_v7  ;;  %v5886_v9 = vmul.f32 0.70710677, %v10103_v8 }
 0x4a9   :  { %v6132_v32 = vadd.f32 %v7905_v36, %v6068_v13  ;;  %v6071_v30 = vmul.f32 %v6007_v59, %v5815_v39  ;;  %v6006_v22 = vadd.f32 1.0, %v7774_v6  ;;  %v10111_v44 = vadd.f32 %v9977_v61, %v9789_v35 }
 0x4aa   :  { %v7776_v0 = vpop.eup %7775  ;;  %v6133_v41 = vadd.f32 %v7906_v21, %v6069_v49  ;;  %7787 = verf.f32 %v5887_v27  ;;  %v10115_v53 = vadd.f32 %v9980_v54, %v9780_v5  ;;  %v5817_v16 = vmul.f32 0.5, %v10068_v19  ;;  %v7911_v27 = vld [vmem:[#allocation2 + $0x170] sm:$0xff] }
 0x4ab   :  { %v7778_v14 = vpop.eup %7777  ;;  %6196 = vst [vmem:[#allocation10 + $0x138] sm:$0xff] %v6132_v32  ;;  %v6135_v60 = vadd.f32 %v7907_v58, %v6071_v30  ;;  %v6070_v2 = vmul.f32 %v6006_v22, %v5814_v31  ;;  %v6008_v42 = vadd.f32 1.0, %v7776_v0  ;;  %7789 = verf.f32 %v5886_v9  ;;  %v7912_v22 = vld [vmem:[#allocation2 + $0x168] sm:$0xff] }
 0x4ac   :  { %6197 = vst [vmem:[#allocation10 + $0x140] sm:$0xff] %v6133_v41  ;;  %v6009_v29 = vadd.f32 1.0, %v7778_v14  ;;  %v5819_v20 = vmul.f32 0.5, %v10076_v28  ;;  %v5888_v61 = vmul.f32 0.70710677, %v10111_v44  ;;  %v10123_v57 = vadd.f32 %v9982_v55, %v9783_v33  ;;  %v7913_v41 = vld [vmem:[#allocation2 + $0x178] sm:$0xff] }
 0x4ad   :  { %6199 = vst [vmem:[#allocation10 + $0x150] sm:$0xff] %v6135_v60  ;;  %v6134_v63 = vadd.f32 %v7908_v15, %v6070_v2  ;;  %v6072_v54 = vmul.f32 %v6008_v42, %v5816_v17  ;;  %v5889_v3 = vmul.f32 0.70710677, %v10115_v53  ;;  %v10127_v19 = vadd.f32 %v9986_v26, %v9786_v62 }
 0x4ae   :  { %v7780_v39 = vpop.eup %7779  ;;  %v6073_v48 = vmul.f32 %v6009_v29, %v5817_v16  ;;  %7791 = verf.f32 %v5888_v61  ;;  %v10131_v28 = vadd.f32 %v9988_v47, %v9789_v35  ;;  %v5818_v45 = vmul.f32 0.5, %v10080_v43 }
 0x4af   :  { %v7782_v51 = vpop.eup %7781  ;;  %6198 = vst [vmem:[#allocation10 + $0x148] sm:$0xff] %v6134_v63  ;;  %v6136_v56 = vadd.f32 %v7909_v34, %v6072_v54  ;;  %v6011_v4 = vadd.f32 1.0, %v7780_v39  ;;  %7793 = verf.f32 %v5889_v3  ;;  %v5820_v7 = vmul.f32 0.5, %v10084_v52  ;;  %v7915_v39 = vld [vmem:[#allocation2 + $0x190] sm:$0xff]  ;;  %v7916_v34 = vld [vmem:[#allocation2 + $0x188] sm:$0xff] }
 0x4b0   :  { %v7784_v55 = vpop.eup %7783  ;;  %v6137_v18 = vadd.f32 %v7910_v11, %v6073_v48  ;;  %v6010_v1 = vadd.f32 1.0, %v7782_v51  ;;  %v5891_v26 = vmul.f32 0.70710677, %v10123_v57  ;;  %v5821_v6 = vmul.f32 0.5, %v10088_v37 }
 0x4b1   :  { %v7786_v13 = vpop.eup %7785  ;;  %6200 = vst [vmem:[#allocation10 + $0x158] sm:$0xff] %v6136_v56  ;;  %v6075_v47 = vmul.f32 %v6011_v4, %v5819_v20  ;;  %v6012_v59 = vadd.f32 1.0, %v7784_v55  ;;  %v5890_v49 = vmul.f32 0.70710677, %v10127_v19  ;;  %v5892_v17 = vmul.f32 0.70710677, %v10131_v28 }
 0x4b2   :  { %6201 = vst [vmem:[#allocation10 + $0x160] sm:$0xff] %v6137_v18  ;;  %v6074_v31 = vmul.f32 %v6010_v1, %v5818_v45  ;;  %v6013_v43 = vadd.f32 1.0, %v7786_v13  ;;  %7795 = verf.f32 %v5891_v26  ;;  %v10141_v52 = vadd.f32 %v10005_v40, %v9780_v5  ;;  %v7914_v40 = vld [vmem:[#allocation2 + $0x180] sm:$0xff] }
 0x4b3   :  { %v6139_v36 = vadd.f32 %v7911_v27, %v6075_v47  ;;  %v6076_v32 = vmul.f32 %v6012_v59, %v5820_v7  ;;  %7797 = verf.f32 %v5890_v49  ;;  %v10145_v0 = vadd.f32 %v10007_v50, %v9783_v33  ;;  %v7918_v47 = vld [vmem:[#allocation2 + $0x1a0] sm:$0xff] }
 0x4b4   :  { %v7788_v30 = vpop.eup %7787  ;;  %v6138_v9 = vadd.f32 %v7912_v22, %v6074_v31  ;;  %v6077_v37 = vmul.f32 %v6013_v43, %v5821_v6  ;;  %7799 = verf.f32 %v5892_v17  ;;  %v5823_v58 = vmul.f32 0.5, %v10099_v25 }
 0x4b5   :  { %v7790_v21 = vpop.eup %7789  ;;  %6203 = vst [vmem:[#allocation10 + $0x170] sm:$0xff] %v6139_v36  ;;  %v6140_v14 = vadd.f32 %v7913_v41, %v6076_v32  ;;  %v6015_v60 = vadd.f32 1.0, %v7788_v30  ;;  %v5893_v2 = vmul.f32 0.70710677, %v10141_v52  ;;  %v5822_v16 = vmul.f32 0.5, %v10103_v8  ;;  %v7919_v36 = vld [vmem:[#allocation2 + $0x1b0] sm:$0xff] }
 0x4b6   :  { %6202 = vst [vmem:[#allocation10 + $0x168] sm:$0xff] %v6138_v9  ;;  %v6141_v42 = vadd.f32 %v7914_v40, %v6077_v37  ;;  %v6014_v29 = vadd.f32 1.0, %v7790_v21  ;;  %v5895_v20 = vmul.f32 0.70710677, %v10145_v0  ;;  %v10153_v61 = vadd.f32 %v10010_v10, %v9786_v62  ;;  %v7920_v9 = vld [vmem:[#allocation2 + $0x1a8] sm:$0xff] }
 0x4b7   :  { %6204 = vst [vmem:[#allocation10 + $0x178] sm:$0xff] %v6140_v14  ;;  %v6079_v50 = vmul.f32 %v6015_v60, %v5823_v58  ;;  %7801 = verf.f32 %v5893_v2  ;;  %v10157_v25 = vadd.f32 %v10012_v23, %v9789_v35  ;;  %v10161_v8 = vadd.f32 %v10015_v46, %v9780_v5 }
 0x4b8   :  { %v7792_v15 = vpop.eup %7791  ;;  %6205 = vst [vmem:[#allocation10 + $0x180] sm:$0xff] %v6141_v42  ;;  %v6078_v63 = vmul.f32 %v6014_v29, %v5822_v16  ;;  %7803 = verf.f32 %v5895_v20  ;;  %v10165_v54 = vadd.f32 %v10017_v38, %v9783_v33  ;;  %v5824_v48 = vmul.f32 0.5, %v10111_v44  ;;  %v7922_v42 = vld [vmem:[#allocation2 + $0x1c0] sm:$0xff] }
 0x4b9   :  { %v7794_v3 = vpop.eup %7793  ;;  %v6143_v10 = vadd.f32 %v7915_v39, %v6079_v50  ;;  %v6016_v51 = vadd.f32 1.0, %v7792_v15  ;;  %v5894_v23 = vmul.f32 0.70710677, %v10153_v61  ;;  %v5825_v4 = vmul.f32 0.5, %v10115_v53  ;;  %v7917_v53 = vld [vmem:[#allocation2 + $0x198] sm:$0xff]  ;;  %v7923_v50 = vld [vmem:[#allocation2 + $0x1d0] sm:$0xff] }
 0x4ba   :  { %v6142_v56 = vadd.f32 %v7916_v34, %v6078_v63  ;;  %v6017_v45 = vadd.f32 1.0, %v7794_v3  ;;  %v5896_v5 = vmul.f32 0.70710677, %v10157_v25  ;;  %v5827_v33 = vmul.f32 0.5, %v10123_v57 }
 0x4bb   :  { %6207 = vst [vmem:[#allocation10 + $0x190] sm:$0xff] %v6143_v10  ;;  %v6080_v46 = vmul.f32 %v6016_v51, %v5824_v48  ;;  %7805 = verf.f32 %v5894_v23  ;;  %v5897_v38 = vmul.f32 0.70710677, %v10161_v8  ;;  %v5826_v11 = vmul.f32 0.5, %v10127_v19 }
 0x4bc   :  { %v7796_v55 = vpop.eup %7795  ;;  %6206 = vst [vmem:[#allocation10 + $0x188] sm:$0xff] %v6142_v56  ;;  %v6081_v44 = vmul.f32 %v6017_v45, %v5825_v4  ;;  %7807 = verf.f32 %v5896_v5  ;;  %v5899_v18 = vmul.f32 0.70710677, %v10165_v54  ;;  %v10177_v13 = vadd.f32 %v10020_v24, %v9786_v62  ;;  %v7924_v56 = vld [vmem:[#allocation2 + $0x1c8] sm:$0xff]  ;;  %v7925_v5 = vld [vmem:[#allocation2 + $0x1d8] sm:$0xff] }
 0x4bd   :  { %v7798_v1 = vpop.eup %7797  ;;  %v6144_v7 = vadd.f32 %v7917_v53, %v6080_v46  ;;  %v6019_v26 = vadd.f32 1.0, %v7796_v55  ;;  %7809 = verf.f32 %v5897_v38  ;;  %v10181_v19 = vadd.f32 %v10022_v12, %v9789_v35  ;;  %v7926_v38 = vld [vmem:[#allocation2 + $0x1e0] sm:$0xff] }
 0x4be   :  { %v7800_v57 = vpop.eup %7799  ;;  %v6145_v59 = vadd.f32 %v7918_v47, %v6081_v44  ;;  %v6018_v6 = vadd.f32 1.0, %v7798_v1  ;;  %7811 = verf.f32 %v5899_v18  ;;  %v5828_v31 = vmul.f32 0.5, %v10131_v28  ;;  %v7921_v28 = vld [vmem:[#allocation2 + $0x1b8] sm:$0xff] }
 0x4bf   :  { %6208 = vst [vmem:[#allocation10 + $0x198] sm:$0xff] %v6144_v7  ;;  %v6083_v49 = vmul.f32 %v6019_v26, %v5827_v33  ;;  %v6020_v43 = vadd.f32 1.0, %v7800_v57  ;;  %v5898_v17 = vmul.f32 0.70710677, %v10177_v13  ;;  %v5900_v62 = vmul.f32 0.70710677, %v10181_v19 }
 0x4c0   :  { %6209 = vst [vmem:[#allocation10 + $0x1a0] sm:$0xff] %v6145_v59  ;;  %v6082_v27 = vmul.f32 %v6018_v6, %v5826_v11  ;;  %v5829_v12 = vmul.f32 0.5, %v10141_v52  ;;  %v5831_v41 = vmul.f32 0.5, %v10145_v0  ;;  %v5830_v29 = vmul.f32 0.5, %v10153_v61  ;;  %v7927_v11 = vld [vmem:[#allocation2 + $0x1f0] sm:$0xff]  ;;  %v7928_v26 = vld [vmem:[#allocation2 + $0x1e8] sm:$0xff] }
 0x4c1   :  { %v7802_v24 = vpop.eup %7801  ;;  %v6147_v32 = vadd.f32 %v7919_v36, %v6083_v49  ;;  %v6084_v30 = vmul.f32 %v6020_v43, %v5828_v31  ;;  %7813 = verf.f32 %v5898_v17  ;;  %v5832_v63 = vmul.f32 0.5, %v10157_v25  ;;  %v7929_v47 = vld [vmem:[#allocation2 + $0x1f8] sm:$0xff] }
 0x4c2   :  { %v7804_v22 = vpop.eup %7803  ;;  %v6146_v35 = vadd.f32 %v7920_v9, %v6082_v27  ;;  %v6021_v37 = vadd.f32 1.0, %v7802_v24  ;;  %7815 = verf.f32 %v5900_v62  ;;  %v5833_v10 = vmul.f32 0.5, %v10161_v8 }
 0x4c3   :  { %6211 = vst [vmem:[#allocation10 + $0x1b0] sm:$0xff] %v6147_v32  ;;  %v6148_v21 = vadd.f32 %v7921_v28, %v6084_v30  ;;  %v6023_v14 = vadd.f32 1.0, %v7804_v22  ;;  %v5835_v23 = vmul.f32 0.5, %v10165_v54  ;;  %v5834_v44 = vmul.f32 0.5, %v10177_v13 }
 0x4c4   :  { %6210 = vst [vmem:[#allocation10 + $0x1a8] sm:$0xff] %v6146_v35  ;;  %v6085_v58 = vmul.f32 %v6021_v37, %v5829_v12  ;;  %v5836_v54 = vmul.f32 0.5, %v10181_v19 }
 0x4c5   :  { %v7806_v60 = vpop.eup %7805  ;;  %6212 = vst [vmem:[#allocation10 + $0x1b8] sm:$0xff] %v6148_v21  ;;  %v6087_v2 = vmul.f32 %v6023_v14, %v5831_v41 }
 0x4c6   :  { %v7808_v40 = vpop.eup %7807  ;;  %v6149_v16 = vadd.f32 %v7922_v42, %v6085_v58  ;;  %v6022_v20 = vadd.f32 1.0, %v7806_v60 }
 0x4c7   :  { %v7810_v52 = vpop.eup %7809  ;;  %v6151_v15 = vadd.f32 %v7923_v50, %v6087_v2  ;;  %v6024_v3 = vadd.f32 1.0, %v7808_v40 }
 0x4c8   :  { %v7812_v39 = vpop.eup %7811  ;;  %6213 = vst [vmem:[#allocation10 + $0x1c0] sm:$0xff] %v6149_v16  ;;  %v6086_v0 = vmul.f32 %v6022_v20, %v5830_v29  ;;  %v6025_v48 = vadd.f32 1.0, %v7810_v52 }
 0x4c9   :  { %6215 = vst [vmem:[#allocation10 + $0x1d0] sm:$0xff] %v6151_v15  ;;  %v6088_v51 = vmul.f32 %v6024_v3, %v5832_v63  ;;  %v6027_v34 = vadd.f32 1.0, %v7812_v39 }
 0x4ca   :  { %v6150_v61 = vadd.f32 %v7924_v56, %v6086_v0  ;;  %v6089_v4 = vmul.f32 %v6025_v48, %v5833_v10 }
 0x4cb   :  { %v7814_v45 = vpop.eup %7813  ;;  %v6152_v46 = vadd.f32 %v7925_v5, %v6088_v51  ;;  %v6091_v33 = vmul.f32 %v6027_v34, %v5835_v23 }
 0x4cc   :  { %v7816_v25 = vpop.eup %7815  ;;  %6214 = vst [vmem:[#allocation10 + $0x1c8] sm:$0xff] %v6150_v61  ;;  %v6153_v55 = vadd.f32 %v7926_v38, %v6089_v4  ;;  %v6026_v8 = vadd.f32 1.0, %v7814_v45 }
 0x4cd   :  { %6216 = vst [vmem:[#allocation10 + $0x1d8] sm:$0xff] %v6152_v46  ;;  %v6155_v18 = vadd.f32 %v7927_v11, %v6091_v33  ;;  %v6028_v1 = vadd.f32 1.0, %v7816_v25 }
 0x4ce   :  { %6217 = vst [vmem:[#allocation10 + $0x1e0] sm:$0xff] %v6153_v55  ;;  %v6090_v53 = vmul.f32 %v6026_v8, %v5834_v44 }
 0x4cf   :  { %6219 = vst [vmem:[#allocation10 + $0x1f0] sm:$0xff] %v6155_v18  ;;  %v6092_v7 = vmul.f32 %v6028_v1, %v5836_v54 }
 0x4d0   :  { %v6154_v57 = vadd.f32 %v7928_v26, %v6090_v53 }
 0x4d1   :  { %v6156_v59 = vadd.f32 %v7929_v47, %v6092_v7 }
 0x4d2   :  { %6218 = vst [vmem:[#allocation10 + $0x1e8] sm:$0xff] %v6154_v57 }
 0x4d3   :  { %6220 = vst [vmem:[#allocation10 + $0x1f8] sm:$0xff] %v6156_v59 }
 0x4d4   :  { %6225 = vsyncadd [#allocation4], 6656  ;;  %s8056_s6 = smov [#allocation10]  }
 0x4d5   :  { %s6226_s10 = sshll.u32 %s8056_s6, 4  ;;  %s6227_s10 = int_to_ptr.vmem [resolvable:$true] %s6226_s10 }
 0x4d6   :  { %s8018_s11 = scalar_lea.vmem %s6227_s10, 1536  ;;  %s8022_s12 = scalar_lea.vmem %s6227_s10, 8192 }
 0x4d7   :  { %p8019_p4 = scmp.ne.s32.totalorder %s6227_s10, %s8018_s11  ;;  %p8023_p5 = scmp.lt.s32.totalorder %s6227_s10, %s6227_s10 }
 0x4d8   :  { %p8024_p6 = scmp.lt.s32.totalorder %s8022_s12, %s8018_s11 }
 0x4da   :  { %p8025_p7 = por %p8024_p6, %p8023_p5 }
 0x4dc   :  { %p8026_p8 = pnand %p8025_p7, %p8019_p4 }
 0x4de   :  { %8029 = shalt.err (!%p8026_p8)
}
 0x4df   :  { %s8030_s15 = scalar_lea.hbm %s10216_s7, 1536 }
 0x4e0   :  { %p8031_p9 = scmp.ne.s32.totalorder %s10216_s7, %s8030_s15  ;;  %p8034_p10 = scmp.lt.u32.totalorder %s8030_s15, %s10216_s7 }
 0x4e2   :  { %p8036_p11 = pnand %p8034_p10, %p8031_p9 }
 0x4e4   :  { %8039 = shalt.err (!%p8036_p11)
}
 0x4e5   :  { %6232 = dma.vmem_to_hbm [thread:$0]  %s6227_s10, 1536, %s10216_s7, [#allocation4], %s8050_s23, %s8050_s23, %s8051_s24  }
 0x4e6   :  { %8046 = dma.done.wait [#allocation4], 8192  }
 0x4e7   :  { %8047 = vsyncadd [#allocation4], 4294959104 }
 0x4e8   :  { %6236 = vsyncpa [#allocation3], 1 }
 0x4e9   :  { %6237 = vsyncpa [#allocation6], 1 }
 0x4ea   :  { %6238 = vsyncpa [#allocation9], 1 }
 0x4eb   :  { %6239 = vsyncpa [#allocation4], 1 }

</bundles_post_ra>
